<compile_context>
chip_gen: v7x
topology: tpu7x:2x2x1
jax: 0.10.0
libtpu: 0.0.40
codegen_flags: <defaults>
</compile_context>

<pallas_src>
import functools
import math

import jax
import jax.numpy as jnp
from jax.experimental import pallas as pl
from jax.experimental.pallas import tpu as pltpu


def _round_up(x, m):
    return ((x + m - 1) // m) * m


def _choose_row_tile(ho, wo, k1):
    """Pick an output-row tile that divides Ho, targets ~512 matmul rows per
    grid step and keeps the bf16 input block <= ~2 MiB (VMEM-safe on v5e/v7x)."""
    target_rows = max(1, 512 // max(wo, 1))
    cap_rows = max(1, (2 << 20) // max((wo + 1) * k1 * 2, 1))
    max_rows = min(ho, target_rows, cap_rows)
    for t in range(max_rows, 0, -1):
        if ho % t == 0:
            return t
    return 1


# ---------------------------------------------------------------------------
# Pallas kernel: fused 2x2 stride-1 conv (4 shifted taps) + bias (+ LeakyReLU)
# ---------------------------------------------------------------------------
def _conv_sd_kernel(x_ref, halo_ref, w_ref, b_ref, o_ref, *, apply_relu):
    # x_ref   : (TOH, Wo+1, K1)  bf16  -- rows [oh0, oh0+TOH) of x_sd
    # halo_ref: (1,   Wo+1, K1)  bf16  -- row  oh0+TOH of x_sd
    # w_ref   : (4, K1, Coutp)   bf16  -- super-tap weights (di,dj)
    # b_ref   : (1, Coutp)       f32
    # o_ref   : (TOH, Wo, Coutp)
    toh, _, k1 = x_ref.shape
    wo, coutp = o_ref.shape[1], o_ref.shape[2]

    m = x_ref[...]                     # rows oh .. oh+TOH-1
    hrow = halo_ref[...]
    if toh > 1:
        hi = jnp.concatenate([m[1:], hrow], axis=0)   # rows oh+1 .. oh+TOH
    else:
        hi = hrow

    acc = None
    for t, (di, dj) in enumerate(((0, 0), (0, 1), (1, 0), (1, 1))):
        src = m if di == 0 else hi
        tap = src[:, dj:dj + wo, :].reshape(toh * wo, k1)          # bf16
        d = jnp.dot(tap, w_ref[t], preferred_element_type=jnp.float32)
        acc = d if acc is None else acc + d

    acc = acc + b_ref[...]                                          # f32 bias
    if apply_relu:
        acc = jnp.maximum(acc, 0.2 * acc)                           # LeakyReLU
    o_ref[...] = acc.reshape(toh, wo, coutp).astype(o_ref.dtype)


# ---------------------------------------------------------------------------
# Conv2d(k=4, s=2, p=1) (+ optional LeakyReLU 0.2) via space-to-depth + Pallas
# ---------------------------------------------------------------------------
def conv4x4_s2_p1(x, w_taps, bias, *, apply_relu, out_dtype):
    """x: (N, H, W, Cp) bf16 (Cp = padded in-channels),
    w_taps: (4, 4*Cp, Coutp) bf16, bias: (1, Coutp) f32.
    Returns (N, H//2, W//2, Coutp) in out_dtype."""
    n, h, w, cp = x.shape
    # TODO(synk): odd spatial sizes would need a masked tail tile; CMDA uses even sizes.
    assert h % 2 == 0 and w % 2 == 0, "even spatial sizes only"
    ho, wo = h // 2, w // 2
    hs, wsd = ho + 1, wo + 1
    k1 = 4 * cp
    assert w_taps.shape[0] == 4 and w_taps.shape[1] == k1
    coutp = w_taps.shape[2]

    # pad=1 border + 2x2 space-to-depth -> (N, Ho+1, Wo+1, 4*Cp), channel
    # order (si, sj, c) matching the weight layout below.
    xp = jnp.pad(x, ((0, 0), (1, 1), (1, 1), (0, 0)))
    x_sd = xp.reshape(n, hs, 2, wsd, 2, cp)
    x_sd = jnp.transpose(x_sd, (0, 1, 3, 2, 4, 5)).reshape(n, hs, wsd, k1)

    toh = _choose_row_tile(ho, wo, k1)
    grid = (n, ho // toh)

    out_isize = jnp.dtype(out_dtype).itemsize
    blk_bytes = (2 * (toh * wsd * k1 * 2 + wsd * k1 * 2
                      + toh * wo * coutp * out_isize)
                 + 4 * k1 * coutp * 2 + coutp * 4)
    vmem_limit = int(min(max(2 * blk_bytes + (8 << 20), 32 << 20), 56 << 20))

    cost = pl.CostEstimate(
        flops=2 * n * ho * wo * (4 * k1) * coutp,
        transcendentals=0,
        bytes_accessed=int(x_sd.size * 2 + w_taps.size * 2
                           + n * ho * wo * coutp * out_isize))

    return pl.pallas_call(
        functools.partial(_conv_sd_kernel, apply_relu=apply_relu),
        out_shape=jax.ShapeDtypeStruct((n, ho, wo, coutp), out_dtype),
        grid_spec=pltpu.PrefetchScalarGridSpec(
            num_scalar_prefetch=0,
            grid=grid,
            in_specs=[
                pl.BlockSpec((None, toh, wsd, k1), lambda b, i: (b, i, 0, 0)),
                pl.BlockSpec((None, 1, wsd, k1),
                             lambda b, i: (b, (i + 1) * toh, 0, 0)),
                pl.BlockSpec((4, k1, coutp), lambda b, i: (0, 0, 0)),
                pl.BlockSpec((1, coutp), lambda b, i: (0, 0)),
            ],
            out_specs=pl.BlockSpec((None, toh, wo, coutp),
                                   lambda b, i: (b, i, 0, 0)),
        ),
        compiler_params=pltpu.CompilerParams(
            dimension_semantics=("parallel", "parallel"),
            vmem_limit_bytes=vmem_limit),
        cost_estimate=cost,
    )(x_sd, x_sd, w_taps, bias)


# ---------------------------------------------------------------------------
# Parameter handling
# ---------------------------------------------------------------------------
def init_params(num_classes, ndf=64, out_channel=1, seed=0):
    """PyTorch-layout params: list of (weight (Cout,Cin,4,4) f32, bias (Cout,) f32)."""
    channels = [num_classes, ndf, ndf * 2, ndf * 4, ndf * 8, out_channel]
    key = jax.random.PRNGKey(seed)
    params = []
    for li in range(5):
        cin, cout = channels[li], channels[li + 1]
        key, kw, kb = jax.random.split(key, 3)
        scale = 1.0 / math.sqrt(cin * 16)
        wgt = jax.random.normal(kw, (cout, cin, 4, 4), jnp.float32) * scale
        b = jax.random.normal(kb, (cout,), jnp.float32) * 0.01
        params.append((wgt, b))
    return params


def prepare_params(params):
    """Convert OIHW params to fused kernel layout:
    per layer (w_taps (4, 4*Cin_p, Cout_p) bf16, bias (1, Cout_p) f32)."""
    prepped = []
    for li, (wgt, b) in enumerate(params):
        cout, cin, kh, kw = wgt.shape
        assert kh == 4 and kw == 4
        cin_p = (_round_up(cin, 32) if li == 0
                 else _round_up(params[li - 1][0].shape[0], 128))
        cout_p = _round_up(cout, 128)
        # (co, c, ki, kj) -> (co, c, di, si, dj, sj) -> (di, dj, si, sj, c, co)
        wr = wgt.reshape(cout, cin, 2, 2, 2, 2)
        wr = jnp.transpose(wr, (2, 4, 3, 5, 1, 0))
        w_taps = jnp.zeros((2, 2, 2, 2, cin_p, cout_p), jnp.float32)
        w_taps = w_taps.at[:, :, :, :, :cin, :cout].set(wr)
        w_taps = w_taps.reshape(4, 4 * cin_p, cout_p).astype(jnp.bfloat16)
        bp = jnp.zeros((1, cout_p), jnp.float32).at[0, :cout].set(
            b.astype(jnp.float32))
        prepped.append((w_taps, bp))
    return prepped


# ---------------------------------------------------------------------------
# FCDiscriminator forward
# ---------------------------------------------------------------------------
def fc_discriminator_forward(x_nchw, params):
    num_classes = x_nchw.shape[1]
    out_channel = params[-1][0].shape[0]
    n_layers = len(params)

    kparams = prepare_params(params)

    # NCHW -> NHWC, pad channels so 4*Cp is lane aligned, bf16 activations.
    x = jnp.transpose(x_nchw, (0, 2, 3, 1)).astype(jnp.float32)
    cin_p = _round_up(num_classes, 32)
    x = jnp.pad(x, ((0, 0), (0, 0), (0, 0), (0, cin_p - num_classes)))
    x = x.astype(jnp.bfloat16)

    for li, (w_taps, bp) in enumerate(kparams):
        last = li == n_layers - 1
        x = conv4x4_s2_p1(x, w_taps, bp, apply_relu=not last,
                          out_dtype=jnp.float32 if last else jnp.bfloat16)

    # crop padded classifier channels, NHWC -> NCHW (PyTorch convention)
    x = x[..., :out_channel]
    return jnp.transpose(x, (0, 3, 1, 2)).astype(jnp.float32)


# ---------------------------------------------------------------------------
# Pure-JAX references
# ---------------------------------------------------------------------------
def _reference_forward(x_nchw, params, *, quantize_bf16):
    """quantize_bf16=True mirrors the kernel numerics (bf16 operands /
    activations, f32 accumulation); False is the true f32 module."""
    def q(a):
        return a.astype(jnp.bfloat16).astype(jnp.float32) if quantize_bf16 else a

    x = q(x_nchw.astype(jnp.float32))
    n_layers = len(params)
    for li, (wgt, b) in enumerate(params):
        x = jax.lax.conv_general_dilated(
            x, q(wgt.astype(jnp.float32)), window_strides=(2, 2),
            padding=((1, 1), (1, 1)),
            dimension_numbers=("NCHW", "OIHW", "NCHW"),
            precision=jax.lax.Precision.HIGHEST)
        x = x + b[None, :, None, None]
        if li < n_layers - 1:
            x = jnp.maximum(x, 0.2 * x)
            x = q(x)
    return x


if __name__ == "__main__":
    num_classes = 4
    ndf = 8
    out_channel = 1
    N, H, W = 2, 32, 32   # 5 stride-2 convs: 32 -> 16 -> 8 -> 4 -> 2 -> 1

    params = init_params(num_classes, ndf=ndf, out_channel=out_channel, seed=0)
    x = jax.random.normal(jax.random.PRNGKey(0), (N, num_classes, H, W),
                          jnp.float32)

    fwd = jax.jit(fc_discriminator_forward)
    out = jax.block_until_ready(fwd(x, params))
    assert out.shape == (N, out_channel, 1, 1), out.shape

    # Tight check vs a reference with matched bf16 numerics.
    ref_q = jax.block_until_ready(
        _reference_forward(x, params, quantize_bf16=True))
    err_q = float(jnp.max(jnp.abs(out - ref_q)))
    assert jnp.allclose(out, ref_q, rtol=5e-3, atol=5e-3), err_q

    # Loose check vs the true f32 module (bf16 storage error only).
    ref_f = jax.block_until_ready(
        _reference_forward(x, params, quantize_bf16=False))
    err_f = float(jnp.max(jnp.abs(out - ref_f)))
    assert jnp.allclose(out, ref_f, rtol=2e-1, atol=2e-1), err_f

    print("KERNEL_OK")
</pallas_src>

<mosaic_0001>
module attributes {stable_mosaic.version = 11 : i64} {
  func.func @_conv_sd_kernel(%arg0: i32, %arg1: i32, %arg2: memref<1x16x17x128xbf16, #tpu.memory_space<vmem>>, %arg3: memref<1x1x17x128xbf16, #tpu.memory_space<vmem>>, %arg4: memref<4x128x128xbf16, #tpu.memory_space<vmem>>, %arg5: memref<1x128xf32, #tpu.memory_space<vmem>>, %arg6: memref<1x16x16x128xbf16, #tpu.memory_space<vmem>>) attributes {dimension_semantics = [#tpu.dimension_semantics<parallel>, #tpu.dimension_semantics<parallel>], iteration_bounds = array<i64: 2, 1>, scalar_prefetch = 0 : i64, scratch_operands = 0 : i64, tpu.core_type = #tpu.core_type<tc>, window_params = [{transform_indices = @transform_0, window_bounds = array<i64: 1, 16, 17, 128>}, {transform_indices = @transform_1, window_bounds = array<i64: 1, 1, 17, 128>}, {pipeline_mode = #tpu.pipeline_mode<synchronous>, transform_indices = @transform_2, window_bounds = array<i64: 4, 128, 128>}, {pipeline_mode = #tpu.pipeline_mode<synchronous>, transform_indices = @transform_3, window_bounds = array<i64: 1, 128>}, {transform_indices = @transform_4, window_bounds = array<i64: 1, 16, 16, 128>}]} {
    %c0 = arith.constant 0 : index
    %c0_0 = arith.constant 0 : index
    %c0_1 = arith.constant 0 : index
    %c0_2 = arith.constant 0 : index
    %0 = vector.load %arg2[%c0, %c0_0, %c0_1, %c0_2] : memref<1x16x17x128xbf16, #tpu.memory_space<vmem>>, vector<1x16x17x128xbf16>
    %1 = vector.shape_cast %0 : vector<1x16x17x128xbf16> to vector<16x17x128xbf16>
    %c0_3 = arith.constant 0 : index
    %c0_4 = arith.constant 0 : index
    %c0_5 = arith.constant 0 : index
    %c0_6 = arith.constant 0 : index
    %2 = vector.load %arg3[%c0_3, %c0_4, %c0_5, %c0_6] : memref<1x1x17x128xbf16, #tpu.memory_space<vmem>>, vector<1x1x17x128xbf16>
    %3 = vector.shape_cast %2 : vector<1x1x17x128xbf16> to vector<1x17x128xbf16>
    %4 = vector.extract_strided_slice %1 {offsets = [1, 0, 0], sizes = [15, 17, 128], strides = [1, 1, 1]} : vector<16x17x128xbf16> to vector<15x17x128xbf16>
    %5 = tpu.concatenate %4, %3 in 0 : vector<15x17x128xbf16>, vector<1x17x128xbf16> -> vector<16x17x128xbf16>
    %6 = vector.extract_strided_slice %1 {offsets = [0, 0, 0], sizes = [16, 16, 128], strides = [1, 1, 1]} : vector<16x17x128xbf16> to vector<16x16x128xbf16>
    %7 = vector.shape_cast %6 : vector<16x16x128xbf16> to vector<256x128xbf16>
    %c0_7 = arith.constant 0 : index
    %c0_8 = arith.constant 0 : index
    %c0_9 = arith.constant 0 : index
    %8 = vector.load %arg4[%c0_7, %c0_8, %c0_9] : memref<4x128x128xbf16, #tpu.memory_space<vmem>>, vector<1x128x128xbf16>
    %9 = vector.shape_cast %8 : vector<1x128x128xbf16> to vector<128x128xbf16>
    %cst = arith.constant dense<0.000000e+00> : vector<256x128xf32>
    %10 = tpu.matmul %7, %9, %cst {dimension_numbers = #tpu.dot_dimension_numbers<[1], [0], [0], [1], [0, 0, 1, 1], [], []>} : vector<256x128xbf16>, vector<128x128xbf16>, vector<256x128xf32> -> vector<256x128xf32>
    %11 = vector.extract_strided_slice %1 {offsets = [0, 1, 0], sizes = [16, 16, 128], strides = [1, 1, 1]} : vector<16x17x128xbf16> to vector<16x16x128xbf16>
    %12 = vector.shape_cast %11 : vector<16x16x128xbf16> to vector<256x128xbf16>
    %c1 = arith.constant 1 : index
    %c0_10 = arith.constant 0 : index
    %c0_11 = arith.constant 0 : index
    %13 = vector.load %arg4[%c1, %c0_10, %c0_11] : memref<4x128x128xbf16, #tpu.memory_space<vmem>>, vector<1x128x128xbf16>
    %14 = vector.shape_cast %13 : vector<1x128x128xbf16> to vector<128x128xbf16>
    %cst_12 = arith.constant dense<0.000000e+00> : vector<256x128xf32>
    %15 = tpu.matmul %12, %14, %cst_12 {dimension_numbers = #tpu.dot_dimension_numbers<[1], [0], [0], [1], [0, 0, 1, 1], [], []>} : vector<256x128xbf16>, vector<128x128xbf16>, vector<256x128xf32> -> vector<256x128xf32>
    %16 = arith.addf %10, %15 : vector<256x128xf32>
    %17 = vector.extract_strided_slice %5 {offsets = [0, 0, 0], sizes = [16, 16, 128], strides = [1, 1, 1]} : vector<16x17x128xbf16> to vector<16x16x128xbf16>
    %18 = vector.shape_cast %17 : vector<16x16x128xbf16> to vector<256x128xbf16>
    %c2 = arith.constant 2 : index
    %c0_13 = arith.constant 0 : index
    %c0_14 = arith.constant 0 : index
    %19 = vector.load %arg4[%c2, %c0_13, %c0_14] : memref<4x128x128xbf16, #tpu.memory_space<vmem>>, vector<1x128x128xbf16>
    %20 = vector.shape_cast %19 : vector<1x128x128xbf16> to vector<128x128xbf16>
    %cst_15 = arith.constant dense<0.000000e+00> : vector<256x128xf32>
    %21 = tpu.matmul %18, %20, %cst_15 {dimension_numbers = #tpu.dot_dimension_numbers<[1], [0], [0], [1], [0, 0, 1, 1], [], []>} : vector<256x128xbf16>, vector<128x128xbf16>, vector<256x128xf32> -> vector<256x128xf32>
    %22 = arith.addf %16, %21 : vector<256x128xf32>
    %23 = vector.extract_strided_slice %5 {offsets = [0, 1, 0], sizes = [16, 16, 128], strides = [1, 1, 1]} : vector<16x17x128xbf16> to vector<16x16x128xbf16>
    %24 = vector.shape_cast %23 : vector<16x16x128xbf16> to vector<256x128xbf16>
    %c3 = arith.constant 3 : index
    %c0_16 = arith.constant 0 : index
    %c0_17 = arith.constant 0 : index
    %25 = vector.load %arg4[%c3, %c0_16, %c0_17] : memref<4x128x128xbf16, #tpu.memory_space<vmem>>, vector<1x128x128xbf16>
    %26 = vector.shape_cast %25 : vector<1x128x128xbf16> to vector<128x128xbf16>
    %cst_18 = arith.constant dense<0.000000e+00> : vector<256x128xf32>
    %27 = tpu.matmul %24, %26, %cst_18 {dimension_numbers = #tpu.dot_dimension_numbers<[1], [0], [0], [1], [0, 0, 1, 1], [], []>} : vector<256x128xbf16>, vector<128x128xbf16>, vector<256x128xf32> -> vector<256x128xf32>
    %28 = arith.addf %22, %27 : vector<256x128xf32>
    %c0_19 = arith.constant 0 : index
    %c0_20 = arith.constant 0 : index
    %29 = vector.load %arg5[%c0_19, %c0_20] : memref<1x128xf32, #tpu.memory_space<vmem>>, vector<1x128xf32>
    %30 = vector.broadcast %29 : vector<1x128xf32> to vector<256x128xf32>
    %31 = arith.addf %28, %30 : vector<256x128xf32>
    %cst_21 = arith.constant 2.000000e-01 : f32
    %32 = vector.broadcast %cst_21 : f32 to vector<256x128xf32>
    %33 = arith.mulf %32, %31 : vector<256x128xf32>
    %34 = arith.maximumf %31, %33 : vector<256x128xf32>
    %35 = vector.shape_cast %34 : vector<256x128xf32> to vector<16x16x128xf32>
    %36 = arith.truncf %35 : vector<16x16x128xf32> to vector<16x16x128xbf16>
    %c0_22 = arith.constant 0 : index
    %c0_23 = arith.constant 0 : index
    %c0_24 = arith.constant 0 : index
    %c0_25 = arith.constant 0 : index
    %37 = vector.load %arg6[%c0_22, %c0_23, %c0_24, %c0_25] : memref<1x16x16x128xbf16, #tpu.memory_space<vmem>>, vector<1x16x16x128xbf16>
    %38 = vector.shape_cast %37 : vector<1x16x16x128xbf16> to vector<16x16x128xbf16>
    %39 = vector.shape_cast %36 : vector<16x16x128xbf16> to vector<1x16x16x128xbf16>
    tpu.vector_store %arg6[%c0_22, %c0_23, %c0_24, %c0_25], %39 {strides = array<i32>} : memref<1x16x16x128xbf16, #tpu.memory_space<vmem>>, vector<1x16x16x128xbf16>,
    return
  }
  func.func @transform_0(%arg0: i32, %arg1: i32) -> (i32, i32, i32, i32) {
    %c0_i32 = arith.constant 0 : i32
    %c0_i32_0 = arith.constant 0 : i32
    %c0_i32_1 = arith.constant 0 : i32
    return %arg0, %arg1, %c0_i32, %c0_i32_0 : i32, i32, i32, i32
  }
  func.func @transform_1(%arg0: i32, %arg1: i32) -> (i32, i32, i32, i32) {
    %c1_i32 = arith.constant 1 : i32
    %0 = arith.addi %arg1, %c1_i32 : i32
    %c16_i32 = arith.constant 16 : i32
    %1 = arith.muli %0, %c16_i32 : i32
    %c0_i32 = arith.constant 0 : i32
    %c0_i32_0 = arith.constant 0 : i32
    %c0_i32_1 = arith.constant 0 : i32
    return %arg0, %1, %c0_i32, %c0_i32_0 : i32, i32, i32, i32
  }
  func.func @transform_2(%arg0: i32, %arg1: i32) -> (i32, i32, i32) {
    %c0_i32 = arith.constant 0 : i32
    %c0_i32_0 = arith.constant 0 : i32
    %c0_i32_1 = arith.constant 0 : i32
    %c0_i32_2 = arith.constant 0 : i32
    return %c0_i32, %c0_i32_0, %c0_i32_1 : i32, i32, i32
  }
  func.func @transform_3(%arg0: i32, %arg1: i32) -> (i32, i32) {
    %c0_i32 = arith.constant 0 : i32
    %c0_i32_0 = arith.constant 0 : i32
    %c0_i32_1 = arith.constant 0 : i32
    return %c0_i32, %c0_i32_0 : i32, i32
  }
  func.func @transform_4(%arg0: i32, %arg1: i32) -> (i32, i32, i32, i32) {
    %c0_i32 = arith.constant 0 : i32
    %c0_i32_0 = arith.constant 0 : i32
    %c0_i32_1 = arith.constant 0 : i32
    return %arg0, %arg1, %c0_i32, %c0_i32_0 : i32, i32, i32, i32
  }
}

module attributes {stable_mosaic.version = 11 : i64} {
  func.func @_conv_sd_kernel(%arg0: i32, %arg1: i32, %arg2: memref<1x8x9x512xbf16, #tpu.memory_space<vmem>>, %arg3: memref<1x1x9x512xbf16, #tpu.memory_space<vmem>>, %arg4: memref<4x512x128xbf16, #tpu.memory_space<vmem>>, %arg5: memref<1x128xf32, #tpu.memory_space<vmem>>, %arg6: memref<1x8x8x128xbf16, #tpu.memory_space<vmem>>) attributes {dimension_semantics = [#tpu.dimension_semantics<parallel>, #tpu.dimension_semantics<parallel>], iteration_bounds = array<i64: 2, 1>, scalar_prefetch = 0 : i64, scratch_operands = 0 : i64, tpu.core_type = #tpu.core_type<tc>, window_params = [{transform_indices = @transform_0, window_bounds = array<i64: 1, 8, 9, 512>}, {transform_indices = @transform_1, window_bounds = array<i64: 1, 1, 9, 512>}, {pipeline_mode = #tpu.pipeline_mode<synchronous>, transform_indices = @transform_2, window_bounds = array<i64: 4, 512, 128>}, {pipeline_mode = #tpu.pipeline_mode<synchronous>, transform_indices = @transform_3, window_bounds = array<i64: 1, 128>}, {transform_indices = @transform_4, window_bounds = array<i64: 1, 8, 8, 128>}]} {
    %c0 = arith.constant 0 : index
    %c0_0 = arith.constant 0 : index
    %c0_1 = arith.constant 0 : index
    %c0_2 = arith.constant 0 : index
    %0 = vector.load %arg2[%c0, %c0_0, %c0_1, %c0_2] : memref<1x8x9x512xbf16, #tpu.memory_space<vmem>>, vector<1x8x9x512xbf16>
    %1 = vector.shape_cast %0 : vector<1x8x9x512xbf16> to vector<8x9x512xbf16>
    %c0_3 = arith.constant 0 : index
    %c0_4 = arith.constant 0 : index
    %c0_5 = arith.constant 0 : index
    %c0_6 = arith.constant 0 : index
    %2 = vector.load %arg3[%c0_3, %c0_4, %c0_5, %c0_6] : memref<1x1x9x512xbf16, #tpu.memory_space<vmem>>, vector<1x1x9x512xbf16>
    %3 = vector.shape_cast %2 : vector<1x1x9x512xbf16> to vector<1x9x512xbf16>
    %4 = vector.extract_strided_slice %1 {offsets = [1, 0, 0], sizes = [7, 9, 512], strides = [1, 1, 1]} : vector<8x9x512xbf16> to vector<7x9x512xbf16>
    %5 = tpu.concatenate %4, %3 in 0 : vector<7x9x512xbf16>, vector<1x9x512xbf16> -> vector<8x9x512xbf16>
    %6 = vector.extract_strided_slice %1 {offsets = [0, 0, 0], sizes = [8, 8, 512], strides = [1, 1, 1]} : vector<8x9x512xbf16> to vector<8x8x512xbf16>
    %7 = vector.shape_cast %6 : vector<8x8x512xbf16> to vector<64x512xbf16>
    %c0_7 = arith.constant 0 : index
    %c0_8 = arith.constant 0 : index
    %c0_9 = arith.constant 0 : index
    %8 = vector.load %arg4[%c0_7, %c0_8, %c0_9] : memref<4x512x128xbf16, #tpu.memory_space<vmem>>, vector<1x512x128xbf16>
    %9 = vector.shape_cast %8 : vector<1x512x128xbf16> to vector<512x128xbf16>
    %cst = arith.constant dense<0.000000e+00> : vector<64x128xf32>
    %10 = tpu.matmul %7, %9, %cst {dimension_numbers = #tpu.dot_dimension_numbers<[1], [0], [0], [1], [0, 0, 1, 1], [], []>} : vector<64x512xbf16>, vector<512x128xbf16>, vector<64x128xf32> -> vector<64x128xf32>
    %11 = vector.extract_strided_slice %1 {offsets = [0, 1, 0], sizes = [8, 8, 512], strides = [1, 1, 1]} : vector<8x9x512xbf16> to vector<8x8x512xbf16>
    %12 = vector.shape_cast %11 : vector<8x8x512xbf16> to vector<64x512xbf16>
    %c1 = arith.constant 1 : index
    %c0_10 = arith.constant 0 : index
    %c0_11 = arith.constant 0 : index
    %13 = vector.load %arg4[%c1, %c0_10, %c0_11] : memref<4x512x128xbf16, #tpu.memory_space<vmem>>, vector<1x512x128xbf16>
    %14 = vector.shape_cast %13 : vector<1x512x128xbf16> to vector<512x128xbf16>
    %cst_12 = arith.constant dense<0.000000e+00> : vector<64x128xf32>
    %15 = tpu.matmul %12, %14, %cst_12 {dimension_numbers = #tpu.dot_dimension_numbers<[1], [0], [0], [1], [0, 0, 1, 1], [], []>} : vector<64x512xbf16>, vector<512x128xbf16>, vector<64x128xf32> -> vector<64x128xf32>
    %16 = arith.addf %10, %15 : vector<64x128xf32>
    %17 = vector.extract_strided_slice %5 {offsets = [0, 0, 0], sizes = [8, 8, 512], strides = [1, 1, 1]} : vector<8x9x512xbf16> to vector<8x8x512xbf16>
    %18 = vector.shape_cast %17 : vector<8x8x512xbf16> to vector<64x512xbf16>
    %c2 = arith.constant 2 : index
    %c0_13 = arith.constant 0 : index
    %c0_14 = arith.constant 0 : index
    %19 = vector.load %arg4[%c2, %c0_13, %c0_14] : memref<4x512x128xbf16, #tpu.memory_space<vmem>>, vector<1x512x128xbf16>
    %20 = vector.shape_cast %19 : vector<1x512x128xbf16> to vector<512x128xbf16>
    %cst_15 = arith.constant dense<0.000000e+00> : vector<64x128xf32>
    %21 = tpu.matmul %18, %20, %cst_15 {dimension_numbers = #tpu.dot_dimension_numbers<[1], [0], [0], [1], [0, 0, 1, 1], [], []>} : vector<64x512xbf16>, vector<512x128xbf16>, vector<64x128xf32> -> vector<64x128xf32>
    %22 = arith.addf %16, %21 : vector<64x128xf32>
    %23 = vector.extract_strided_slice %5 {offsets = [0, 1, 0], sizes = [8, 8, 512], strides = [1, 1, 1]} : vector<8x9x512xbf16> to vector<8x8x512xbf16>
    %24 = vector.shape_cast %23 : vector<8x8x512xbf16> to vector<64x512xbf16>
    %c3 = arith.constant 3 : index
    %c0_16 = arith.constant 0 : index
    %c0_17 = arith.constant 0 : index
    %25 = vector.load %arg4[%c3, %c0_16, %c0_17] : memref<4x512x128xbf16, #tpu.memory_space<vmem>>, vector<1x512x128xbf16>
    %26 = vector.shape_cast %25 : vector<1x512x128xbf16> to vector<512x128xbf16>
    %cst_18 = arith.constant dense<0.000000e+00> : vector<64x128xf32>
    %27 = tpu.matmul %24, %26, %cst_18 {dimension_numbers = #tpu.dot_dimension_numbers<[1], [0], [0], [1], [0, 0, 1, 1], [], []>} : vector<64x512xbf16>, vector<512x128xbf16>, vector<64x128xf32> -> vector<64x128xf32>
    %28 = arith.addf %22, %27 : vector<64x128xf32>
    %c0_19 = arith.constant 0 : index
    %c0_20 = arith.constant 0 : index
    %29 = vector.load %arg5[%c0_19, %c0_20] : memref<1x128xf32, #tpu.memory_space<vmem>>, vector<1x128xf32>
    %30 = vector.broadcast %29 : vector<1x128xf32> to vector<64x128xf32>
    %31 = arith.addf %28, %30 : vector<64x128xf32>
    %cst_21 = arith.constant 2.000000e-01 : f32
    %32 = vector.broadcast %cst_21 : f32 to vector<64x128xf32>
    %33 = arith.mulf %32, %31 : vector<64x128xf32>
    %34 = arith.maximumf %31, %33 : vector<64x128xf32>
    %35 = vector.shape_cast %34 : vector<64x128xf32> to vector<8x8x128xf32>
    %36 = arith.truncf %35 : vector<8x8x128xf32> to vector<8x8x128xbf16>
    %c0_22 = arith.constant 0 : index
    %c0_23 = arith.constant 0 : index
    %c0_24 = arith.constant 0 : index
    %c0_25 = arith.constant 0 : index
    %37 = vector.load %arg6[%c0_22, %c0_23, %c0_24, %c0_25] : memref<1x8x8x128xbf16, #tpu.memory_space<vmem>>, vector<1x8x8x128xbf16>
    %38 = vector.shape_cast %37 : vector<1x8x8x128xbf16> to vector<8x8x128xbf16>
    %39 = vector.shape_cast %36 : vector<8x8x128xbf16> to vector<1x8x8x128xbf16>
    tpu.vector_store %arg6[%c0_22, %c0_23, %c0_24, %c0_25], %39 {strides = array<i32>} : memref<1x8x8x128xbf16, #tpu.memory_space<vmem>>, vector<1x8x8x128xbf16>,
    return
  }
  func.func @transform_0(%arg0: i32, %arg1: i32) -> (i32, i32, i32, i32) {
    %c0_i32 = arith.constant 0 : i32
    %c0_i32_0 = arith.constant 0 : i32
    %c0_i32_1 = arith.constant 0 : i32
    return %arg0, %arg1, %c0_i32, %c0_i32_0 : i32, i32, i32, i32
  }
  func.func @transform_1(%arg0: i32, %arg1: i32) -> (i32, i32, i32, i32) {
    %c1_i32 = arith.constant 1 : i32
    %0 = arith.addi %arg1, %c1_i32 : i32
    %c8_i32 = arith.constant 8 : i32
    %1 = arith.muli %0, %c8_i32 : i32
    %c0_i32 = arith.constant 0 : i32
    %c0_i32_0 = arith.constant 0 : i32
    %c0_i32_1 = arith.constant 0 : i32
    return %arg0, %1, %c0_i32, %c0_i32_0 : i32, i32, i32, i32
  }
  func.func @transform_2(%arg0: i32, %arg1: i32) -> (i32, i32, i32) {
    %c0_i32 = arith.constant 0 : i32
    %c0_i32_0 = arith.constant 0 : i32
    %c0_i32_1 = arith.constant 0 : i32
    %c0_i32_2 = arith.constant 0 : i32
    return %c0_i32, %c0_i32_0, %c0_i32_1 : i32, i32, i32
  }
  func.func @transform_3(%arg0: i32, %arg1: i32) -> (i32, i32) {
    %c0_i32 = arith.constant 0 : i32
    %c0_i32_0 = arith.constant 0 : i32
    %c0_i32_1 = arith.constant 0 : i32
    return %c0_i32, %c0_i32_0 : i32, i32
  }
  func.func @transform_4(%arg0: i32, %arg1: i32) -> (i32, i32, i32, i32) {
    %c0_i32 = arith.constant 0 : i32
    %c0_i32_0 = arith.constant 0 : i32
    %c0_i32_1 = arith.constant 0 : i32
    return %arg0, %arg1, %c0_i32, %c0_i32_0 : i32, i32, i32, i32
  }
}

module attributes {stable_mosaic.version = 11 : i64} {
  func.func @_conv_sd_kernel(%arg0: i32, %arg1: i32, %arg2: memref<1x4x5x512xbf16, #tpu.memory_space<vmem>>, %arg3: memref<1x1x5x512xbf16, #tpu.memory_space<vmem>>, %arg4: memref<4x512x128xbf16, #tpu.memory_space<vmem>>, %arg5: memref<1x128xf32, #tpu.memory_space<vmem>>, %arg6: memref<1x4x4x128xbf16, #tpu.memory_space<vmem>>) attributes {dimension_semantics = [#tpu.dimension_semantics<parallel>, #tpu.dimension_semantics<parallel>], iteration_bounds = array<i64: 2, 1>, scalar_prefetch = 0 : i64, scratch_operands = 0 : i64, tpu.core_type = #tpu.core_type<tc>, window_params = [{transform_indices = @transform_0, window_bounds = array<i64: 1, 4, 5, 512>}, {transform_indices = @transform_1, window_bounds = array<i64: 1, 1, 5, 512>}, {pipeline_mode = #tpu.pipeline_mode<synchronous>, transform_indices = @transform_2, window_bounds = array<i64: 4, 512, 128>}, {pipeline_mode = #tpu.pipeline_mode<synchronous>, transform_indices = @transform_3, window_bounds = array<i64: 1, 128>}, {transform_indices = @transform_4, window_bounds = array<i64: 1, 4, 4, 128>}]} {
    %c0 = arith.constant 0 : index
    %c0_0 = arith.constant 0 : index
    %c0_1 = arith.constant 0 : index
    %c0_2 = arith.constant 0 : index
    %0 = vector.load %arg2[%c0, %c0_0, %c0_1, %c0_2] : memref<1x4x5x512xbf16, #tpu.memory_space<vmem>>, vector<1x4x5x512xbf16>
    %1 = vector.shape_cast %0 : vector<1x4x5x512xbf16> to vector<4x5x512xbf16>
    %c0_3 = arith.constant 0 : index
    %c0_4 = arith.constant 0 : index
    %c0_5 = arith.constant 0 : index
    %c0_6 = arith.constant 0 : index
    %2 = vector.load %arg3[%c0_3, %c0_4, %c0_5, %c0_6] : memref<1x1x5x512xbf16, #tpu.memory_space<vmem>>, vector<1x1x5x512xbf16>
    %3 = vector.shape_cast %2 : vector<1x1x5x512xbf16> to vector<1x5x512xbf16>
    %4 = vector.extract_strided_slice %1 {offsets = [1, 0, 0], sizes = [3, 5, 512], strides = [1, 1, 1]} : vector<4x5x512xbf16> to vector<3x5x512xbf16>
    %5 = tpu.concatenate %4, %3 in 0 : vector<3x5x512xbf16>, vector<1x5x512xbf16> -> vector<4x5x512xbf16>
    %6 = vector.extract_strided_slice %1 {offsets = [0, 0, 0], sizes = [4, 4, 512], strides = [1, 1, 1]} : vector<4x5x512xbf16> to vector<4x4x512xbf16>
    %7 = vector.shape_cast %6 : vector<4x4x512xbf16> to vector<16x512xbf16>
    %c0_7 = arith.constant 0 : index
    %c0_8 = arith.constant 0 : index
    %c0_9 = arith.constant 0 : index
    %8 = vector.load %arg4[%c0_7, %c0_8, %c0_9] : memref<4x512x128xbf16, #tpu.memory_space<vmem>>, vector<1x512x128xbf16>
    %9 = vector.shape_cast %8 : vector<1x512x128xbf16> to vector<512x128xbf16>
    %cst = arith.constant dense<0.000000e+00> : vector<16x128xf32>
    %10 = tpu.matmul %7, %9, %cst {dimension_numbers = #tpu.dot_dimension_numbers<[1], [0], [0], [1], [0, 0, 1, 1], [], []>} : vector<16x512xbf16>, vector<512x128xbf16>, vector<16x128xf32> -> vector<16x128xf32>
    %11 = vector.extract_strided_slice %1 {offsets = [0, 1, 0], sizes = [4, 4, 512], strides = [1, 1, 1]} : vector<4x5x512xbf16> to vector<4x4x512xbf16>
    %12 = vector.shape_cast %11 : vector<4x4x512xbf16> to vector<16x512xbf16>
    %c1 = arith.constant 1 : index
    %c0_10 = arith.constant 0 : index
    %c0_11 = arith.constant 0 : index
    %13 = vector.load %arg4[%c1, %c0_10, %c0_11] : memref<4x512x128xbf16, #tpu.memory_space<vmem>>, vector<1x512x128xbf16>
    %14 = vector.shape_cast %13 : vector<1x512x128xbf16> to vector<512x128xbf16>
    %cst_12 = arith.constant dense<0.000000e+00> : vector<16x128xf32>
    %15 = tpu.matmul %12, %14, %cst_12 {dimension_numbers = #tpu.dot_dimension_numbers<[1], [0], [0], [1], [0, 0, 1, 1], [], []>} : vector<16x512xbf16>, vector<512x128xbf16>, vector<16x128xf32> -> vector<16x128xf32>
    %16 = arith.addf %10, %15 : vector<16x128xf32>
    %17 = vector.extract_strided_slice %5 {offsets = [0, 0, 0], sizes = [4, 4, 512], strides = [1, 1, 1]} : vector<4x5x512xbf16> to vector<4x4x512xbf16>
    %18 = vector.shape_cast %17 : vector<4x4x512xbf16> to vector<16x512xbf16>
    %c2 = arith.constant 2 : index
    %c0_13 = arith.constant 0 : index
    %c0_14 = arith.constant 0 : index
    %19 = vector.load %arg4[%c2, %c0_13, %c0_14] : memref<4x512x128xbf16, #tpu.memory_space<vmem>>, vector<1x512x128xbf16>
    %20 = vector.shape_cast %19 : vector<1x512x128xbf16> to vector<512x128xbf16>
    %cst_15 = arith.constant dense<0.000000e+00> : vector<16x128xf32>
    %21 = tpu.matmul %18, %20, %cst_15 {dimension_numbers = #tpu.dot_dimension_numbers<[1], [0], [0], [1], [0, 0, 1, 1], [], []>} : vector<16x512xbf16>, vector<512x128xbf16>, vector<16x128xf32> -> vector<16x128xf32>
    %22 = arith.addf %16, %21 : vector<16x128xf32>
    %23 = vector.extract_strided_slice %5 {offsets = [0, 1, 0], sizes = [4, 4, 512], strides = [1, 1, 1]} : vector<4x5x512xbf16> to vector<4x4x512xbf16>
    %24 = vector.shape_cast %23 : vector<4x4x512xbf16> to vector<16x512xbf16>
    %c3 = arith.constant 3 : index
    %c0_16 = arith.constant 0 : index
    %c0_17 = arith.constant 0 : index
    %25 = vector.load %arg4[%c3, %c0_16, %c0_17] : memref<4x512x128xbf16, #tpu.memory_space<vmem>>, vector<1x512x128xbf16>
    %26 = vector.shape_cast %25 : vector<1x512x128xbf16> to vector<512x128xbf16>
    %cst_18 = arith.constant dense<0.000000e+00> : vector<16x128xf32>
    %27 = tpu.matmul %24, %26, %cst_18 {dimension_numbers = #tpu.dot_dimension_numbers<[1], [0], [0], [1], [0, 0, 1, 1], [], []>} : vector<16x512xbf16>, vector<512x128xbf16>, vector<16x128xf32> -> vector<16x128xf32>
    %28 = arith.addf %22, %27 : vector<16x128xf32>
    %c0_19 = arith.constant 0 : index
    %c0_20 = arith.constant 0 : index
    %29 = vector.load %arg5[%c0_19, %c0_20] : memref<1x128xf32, #tpu.memory_space<vmem>>, vector<1x128xf32>
    %30 = vector.broadcast %29 : vector<1x128xf32> to vector<16x128xf32>
    %31 = arith.addf %28, %30 : vector<16x128xf32>
    %cst_21 = arith.constant 2.000000e-01 : f32
    %32 = vector.broadcast %cst_21 : f32 to vector<16x128xf32>
    %33 = arith.mulf %32, %31 : vector<16x128xf32>
    %34 = arith.maximumf %31, %33 : vector<16x128xf32>
    %35 = vector.shape_cast %34 : vector<16x128xf32> to vector<4x4x128xf32>
    %36 = arith.truncf %35 : vector<4x4x128xf32> to vector<4x4x128xbf16>
    %c0_22 = arith.constant 0 : index
    %c0_23 = arith.constant 0 : index
    %c0_24 = arith.constant 0 : index
    %c0_25 = arith.constant 0 : index
    %37 = vector.load %arg6[%c0_22, %c0_23, %c0_24, %c0_25] : memref<1x4x4x128xbf16, #tpu.memory_space<vmem>>, vector<1x4x4x128xbf16>
    %38 = vector.shape_cast %37 : vector<1x4x4x128xbf16> to vector<4x4x128xbf16>
    %39 = vector.shape_cast %36 : vector<4x4x128xbf16> to vector<1x4x4x128xbf16>
    tpu.vector_store %arg6[%c0_22, %c0_23, %c0_24, %c0_25], %39 {strides = array<i32>} : memref<1x4x4x128xbf16, #tpu.memory_space<vmem>>, vector<1x4x4x128xbf16>,
    return
  }
  func.func @transform_0(%arg0: i32, %arg1: i32) -> (i32, i32, i32, i32) {
    %c0_i32 = arith.constant 0 : i32
    %c0_i32_0 = arith.constant 0 : i32
    %c0_i32_1 = arith.constant 0 : i32
    return %arg0, %arg1, %c0_i32, %c0_i32_0 : i32, i32, i32, i32
  }
  func.func @transform_1(%arg0: i32, %arg1: i32) -> (i32, i32, i32, i32) {
    %c1_i32 = arith.constant 1 : i32
    %0 = arith.addi %arg1, %c1_i32 : i32
    %c4_i32 = arith.constant 4 : i32
    %1 = arith.muli %0, %c4_i32 : i32
    %c0_i32 = arith.constant 0 : i32
    %c0_i32_0 = arith.constant 0 : i32
    %c0_i32_1 = arith.constant 0 : i32
    return %arg0, %1, %c0_i32, %c0_i32_0 : i32, i32, i32, i32
  }
  func.func @transform_2(%arg0: i32, %arg1: i32) -> (i32, i32, i32) {
    %c0_i32 = arith.constant 0 : i32
    %c0_i32_0 = arith.constant 0 : i32
    %c0_i32_1 = arith.constant 0 : i32
    %c0_i32_2 = arith.constant 0 : i32
    return %c0_i32, %c0_i32_0, %c0_i32_1 : i32, i32, i32
  }
  func.func @transform_3(%arg0: i32, %arg1: i32) -> (i32, i32) {
    %c0_i32 = arith.constant 0 : i32
    %c0_i32_0 = arith.constant 0 : i32
    %c0_i32_1 = arith.constant 0 : i32
    return %c0_i32, %c0_i32_0 : i32, i32
  }
  func.func @transform_4(%arg0: i32, %arg1: i32) -> (i32, i32, i32, i32) {
    %c0_i32 = arith.constant 0 : i32
    %c0_i32_0 = arith.constant 0 : i32
    %c0_i32_1 = arith.constant 0 : i32
    return %arg0, %arg1, %c0_i32, %c0_i32_0 : i32, i32, i32, i32
  }
}

module attributes {stable_mosaic.version = 11 : i64} {
  func.func @_conv_sd_kernel(%arg0: i32, %arg1: i32, %arg2: memref<1x2x3x512xbf16, #tpu.memory_space<vmem>>, %arg3: memref<1x1x3x512xbf16, #tpu.memory_space<vmem>>, %arg4: memref<4x512x128xbf16, #tpu.memory_space<vmem>>, %arg5: memref<1x128xf32, #tpu.memory_space<vmem>>, %arg6: memref<1x2x2x128xbf16, #tpu.memory_space<vmem>>) attributes {dimension_semantics = [#tpu.dimension_semantics<parallel>, #tpu.dimension_semantics<parallel>], iteration_bounds = array<i64: 2, 1>, scalar_prefetch = 0 : i64, scratch_operands = 0 : i64, tpu.core_type = #tpu.core_type<tc>, window_params = [{transform_indices = @transform_0, window_bounds = array<i64: 1, 2, 3, 512>}, {transform_indices = @transform_1, window_bounds = array<i64: 1, 1, 3, 512>}, {pipeline_mode = #tpu.pipeline_mode<synchronous>, transform_indices = @transform_2, window_bounds = array<i64: 4, 512, 128>}, {pipeline_mode = #tpu.pipeline_mode<synchronous>, transform_indices = @transform_3, window_bounds = array<i64: 1, 128>}, {transform_indices = @transform_4, window_bounds = array<i64: 1, 2, 2, 128>}]} {
    %c0 = arith.constant 0 : index
    %c0_0 = arith.constant 0 : index
    %c0_1 = arith.constant 0 : index
    %c0_2 = arith.constant 0 : index
    %0 = vector.load %arg2[%c0, %c0_0, %c0_1, %c0_2] : memref<1x2x3x512xbf16, #tpu.memory_space<vmem>>, vector<1x2x3x512xbf16>
    %1 = vector.shape_cast %0 : vector<1x2x3x512xbf16> to vector<2x3x512xbf16>
    %c0_3 = arith.constant 0 : index
    %c0_4 = arith.constant 0 : index
    %c0_5 = arith.constant 0 : index
    %c0_6 = arith.constant 0 : index
    %2 = vector.load %arg3[%c0_3, %c0_4, %c0_5, %c0_6] : memref<1x1x3x512xbf16, #tpu.memory_space<vmem>>, vector<1x1x3x512xbf16>
    %3 = vector.shape_cast %2 : vector<1x1x3x512xbf16> to vector<1x3x512xbf16>
    %4 = vector.extract_strided_slice %1 {offsets = [1, 0, 0], sizes = [1, 3, 512], strides = [1, 1, 1]} : vector<2x3x512xbf16> to vector<1x3x512xbf16>
    %5 = tpu.concatenate %4, %3 in 0 : vector<1x3x512xbf16>, vector<1x3x512xbf16> -> vector<2x3x512xbf16>
    %6 = vector.extract_strided_slice %1 {offsets = [0, 0, 0], sizes = [2, 2, 512], strides = [1, 1, 1]} : vector<2x3x512xbf16> to vector<2x2x512xbf16>
    %7 = vector.shape_cast %6 : vector<2x2x512xbf16> to vector<4x512xbf16>
    %c0_7 = arith.constant 0 : index
    %c0_8 = arith.constant 0 : index
    %c0_9 = arith.constant 0 : index
    %8 = vector.load %arg4[%c0_7, %c0_8, %c0_9] : memref<4x512x128xbf16, #tpu.memory_space<vmem>>, vector<1x512x128xbf16>
    %9 = vector.shape_cast %8 : vector<1x512x128xbf16> to vector<512x128xbf16>
    %cst = arith.constant dense<0.000000e+00> : vector<4x128xf32>
    %10 = tpu.matmul %7, %9, %cst {dimension_numbers = #tpu.dot_dimension_numbers<[1], [0], [0], [1], [0, 0, 1, 1], [], []>} : vector<4x512xbf16>, vector<512x128xbf16>, vector<4x128xf32> -> vector<4x128xf32>
    %11 = vector.extract_strided_slice %1 {offsets = [0, 1, 0], sizes = [2, 2, 512], strides = [1, 1, 1]} : vector<2x3x512xbf16> to vector<2x2x512xbf16>
    %12 = vector.shape_cast %11 : vector<2x2x512xbf16> to vector<4x512xbf16>
    %c1 = arith.constant 1 : index
    %c0_10 = arith.constant 0 : index
    %c0_11 = arith.constant 0 : index
    %13 = vector.load %arg4[%c1, %c0_10, %c0_11] : memref<4x512x128xbf16, #tpu.memory_space<vmem>>, vector<1x512x128xbf16>
    %14 = vector.shape_cast %13 : vector<1x512x128xbf16> to vector<512x128xbf16>
    %cst_12 = arith.constant dense<0.000000e+00> : vector<4x128xf32>
    %15 = tpu.matmul %12, %14, %cst_12 {dimension_numbers = #tpu.dot_dimension_numbers<[1], [0], [0], [1], [0, 0, 1, 1], [], []>} : vector<4x512xbf16>, vector<512x128xbf16>, vector<4x128xf32> -> vector<4x128xf32>
    %16 = arith.addf %10, %15 : vector<4x128xf32>
    %17 = vector.extract_strided_slice %5 {offsets = [0, 0, 0], sizes = [2, 2, 512], strides = [1, 1, 1]} : vector<2x3x512xbf16> to vector<2x2x512xbf16>
    %18 = vector.shape_cast %17 : vector<2x2x512xbf16> to vector<4x512xbf16>
    %c2 = arith.constant 2 : index
    %c0_13 = arith.constant 0 : index
    %c0_14 = arith.constant 0 : index
    %19 = vector.load %arg4[%c2, %c0_13, %c0_14] : memref<4x512x128xbf16, #tpu.memory_space<vmem>>, vector<1x512x128xbf16>
    %20 = vector.shape_cast %19 : vector<1x512x128xbf16> to vector<512x128xbf16>
    %cst_15 = arith.constant dense<0.000000e+00> : vector<4x128xf32>
    %21 = tpu.matmul %18, %20, %cst_15 {dimension_numbers = #tpu.dot_dimension_numbers<[1], [0], [0], [1], [0, 0, 1, 1], [], []>} : vector<4x512xbf16>, vector<512x128xbf16>, vector<4x128xf32> -> vector<4x128xf32>
    %22 = arith.addf %16, %21 : vector<4x128xf32>
    %23 = vector.extract_strided_slice %5 {offsets = [0, 1, 0], sizes = [2, 2, 512], strides = [1, 1, 1]} : vector<2x3x512xbf16> to vector<2x2x512xbf16>
    %24 = vector.shape_cast %23 : vector<2x2x512xbf16> to vector<4x512xbf16>
    %c3 = arith.constant 3 : index
    %c0_16 = arith.constant 0 : index
    %c0_17 = arith.constant 0 : index
    %25 = vector.load %arg4[%c3, %c0_16, %c0_17] : memref<4x512x128xbf16, #tpu.memory_space<vmem>>, vector<1x512x128xbf16>
    %26 = vector.shape_cast %25 : vector<1x512x128xbf16> to vector<512x128xbf16>
    %cst_18 = arith.constant dense<0.000000e+00> : vector<4x128xf32>
    %27 = tpu.matmul %24, %26, %cst_18 {dimension_numbers = #tpu.dot_dimension_numbers<[1], [0], [0], [1], [0, 0, 1, 1], [], []>} : vector<4x512xbf16>, vector<512x128xbf16>, vector<4x128xf32> -> vector<4x128xf32>
    %28 = arith.addf %22, %27 : vector<4x128xf32>
    %c0_19 = arith.constant 0 : index
    %c0_20 = arith.constant 0 : index
    %29 = vector.load %arg5[%c0_19, %c0_20] : memref<1x128xf32, #tpu.memory_space<vmem>>, vector<1x128xf32>
    %30 = vector.broadcast %29 : vector<1x128xf32> to vector<4x128xf32>
    %31 = arith.addf %28, %30 : vector<4x128xf32>
    %cst_21 = arith.constant 2.000000e-01 : f32
    %32 = vector.broadcast %cst_21 : f32 to vector<4x128xf32>
    %33 = arith.mulf %32, %31 : vector<4x128xf32>
    %34 = arith.maximumf %31, %33 : vector<4x128xf32>
    %35 = vector.shape_cast %34 : vector<4x128xf32> to vector<2x2x128xf32>
    %36 = arith.truncf %35 : vector<2x2x128xf32> to vector<2x2x128xbf16>
    %c0_22 = arith.constant 0 : index
    %c0_23 = arith.constant 0 : index
    %c0_24 = arith.constant 0 : index
    %c0_25 = arith.constant 0 : index
    %37 = vector.load %arg6[%c0_22, %c0_23, %c0_24, %c0_25] : memref<1x2x2x128xbf16, #tpu.memory_space<vmem>>, vector<1x2x2x128xbf16>
    %38 = vector.shape_cast %37 : vector<1x2x2x128xbf16> to vector<2x2x128xbf16>
    %39 = vector.shape_cast %36 : vector<2x2x128xbf16> to vector<1x2x2x128xbf16>
    tpu.vector_store %arg6[%c0_22, %c0_23, %c0_24, %c0_25], %39 {strides = array<i32>} : memref<1x2x2x128xbf16, #tpu.memory_space<vmem>>, vector<1x2x2x128xbf16>,
    return
  }
  func.func @transform_0(%arg0: i32, %arg1: i32) -> (i32, i32, i32, i32) {
    %c0_i32 = arith.constant 0 : i32
    %c0_i32_0 = arith.constant 0 : i32
    %c0_i32_1 = arith.constant 0 : i32
    return %arg0, %arg1, %c0_i32, %c0_i32_0 : i32, i32, i32, i32
  }
  func.func @transform_1(%arg0: i32, %arg1: i32) -> (i32, i32, i32, i32) {
    %c1_i32 = arith.constant 1 : i32
    %0 = arith.addi %arg1, %c1_i32 : i32
    %c2_i32 = arith.constant 2 : i32
    %1 = arith.muli %0, %c2_i32 : i32
    %c0_i32 = arith.constant 0 : i32
    %c0_i32_0 = arith.constant 0 : i32
    %c0_i32_1 = arith.constant 0 : i32
    return %arg0, %1, %c0_i32, %c0_i32_0 : i32, i32, i32, i32
  }
  func.func @transform_2(%arg0: i32, %arg1: i32) -> (i32, i32, i32) {
    %c0_i32 = arith.constant 0 : i32
    %c0_i32_0 = arith.constant 0 : i32
    %c0_i32_1 = arith.constant 0 : i32
    %c0_i32_2 = arith.constant 0 : i32
    return %c0_i32, %c0_i32_0, %c0_i32_1 : i32, i32, i32
  }
  func.func @transform_3(%arg0: i32, %arg1: i32) -> (i32, i32) {
    %c0_i32 = arith.constant 0 : i32
    %c0_i32_0 = arith.constant 0 : i32
    %c0_i32_1 = arith.constant 0 : i32
    return %c0_i32, %c0_i32_0 : i32, i32
  }
  func.func @transform_4(%arg0: i32, %arg1: i32) -> (i32, i32, i32, i32) {
    %c0_i32 = arith.constant 0 : i32
    %c0_i32_0 = arith.constant 0 : i32
    %c0_i32_1 = arith.constant 0 : i32
    return %arg0, %arg1, %c0_i32, %c0_i32_0 : i32, i32, i32, i32
  }
}

module attributes {stable_mosaic.version = 11 : i64} {
  func.func @_conv_sd_kernel(%arg0: i32, %arg1: i32, %arg2: memref<1x1x2x512xbf16, #tpu.memory_space<vmem>>, %arg3: memref<1x1x2x512xbf16, #tpu.memory_space<vmem>>, %arg4: memref<4x512x128xbf16, #tpu.memory_space<vmem>>, %arg5: memref<1x128xf32, #tpu.memory_space<vmem>>, %arg6: memref<1x1x1x128xf32, #tpu.memory_space<vmem>>) attributes {dimension_semantics = [#tpu.dimension_semantics<parallel>, #tpu.dimension_semantics<parallel>], iteration_bounds = array<i64: 2, 1>, scalar_prefetch = 0 : i64, scratch_operands = 0 : i64, tpu.core_type = #tpu.core_type<tc>, window_params = [{transform_indices = @transform_0, window_bounds = array<i64: 1, 1, 2, 512>}, {transform_indices = @transform_1, window_bounds = array<i64: 1, 1, 2, 512>}, {pipeline_mode = #tpu.pipeline_mode<synchronous>, transform_indices = @transform_2, window_bounds = array<i64: 4, 512, 128>}, {pipeline_mode = #tpu.pipeline_mode<synchronous>, transform_indices = @transform_3, window_bounds = array<i64: 1, 128>}, {transform_indices = @transform_4, window_bounds = array<i64: 1, 1, 1, 128>}]} {
    %c0 = arith.constant 0 : index
    %c0_0 = arith.constant 0 : index
    %c0_1 = arith.constant 0 : index
    %c0_2 = arith.constant 0 : index
    %0 = vector.load %arg2[%c0, %c0_0, %c0_1, %c0_2] : memref<1x1x2x512xbf16, #tpu.memory_space<vmem>>, vector<1x1x2x512xbf16>
    %1 = vector.shape_cast %0 : vector<1x1x2x512xbf16> to vector<1x2x512xbf16>
    %c0_3 = arith.constant 0 : index
    %c0_4 = arith.constant 0 : index
    %c0_5 = arith.constant 0 : index
    %c0_6 = arith.constant 0 : index
    %2 = vector.load %arg3[%c0_3, %c0_4, %c0_5, %c0_6] : memref<1x1x2x512xbf16, #tpu.memory_space<vmem>>, vector<1x1x2x512xbf16>
    %3 = vector.shape_cast %2 : vector<1x1x2x512xbf16> to vector<1x2x512xbf16>
    %4 = vector.extract_strided_slice %1 {offsets = [0, 0, 0], sizes = [1, 1, 512], strides = [1, 1, 1]} : vector<1x2x512xbf16> to vector<1x1x512xbf16>
    %5 = vector.shape_cast %4 : vector<1x1x512xbf16> to vector<1x512xbf16>
    %c0_7 = arith.constant 0 : index
    %c0_8 = arith.constant 0 : index
    %c0_9 = arith.constant 0 : index
    %6 = vector.load %arg4[%c0_7, %c0_8, %c0_9] : memref<4x512x128xbf16, #tpu.memory_space<vmem>>, vector<1x512x128xbf16>
    %7 = vector.shape_cast %6 : vector<1x512x128xbf16> to vector<512x128xbf16>
    %cst = arith.constant dense<0.000000e+00> : vector<1x128xf32>
    %8 = tpu.matmul %5, %7, %cst {dimension_numbers = #tpu.dot_dimension_numbers<[1], [0], [0], [1], [0, 0, 1, 1], [], []>} : vector<1x512xbf16>, vector<512x128xbf16>, vector<1x128xf32> -> vector<1x128xf32>
    %9 = vector.extract_strided_slice %1 {offsets = [0, 1, 0], sizes = [1, 1, 512], strides = [1, 1, 1]} : vector<1x2x512xbf16> to vector<1x1x512xbf16>
    %10 = vector.shape_cast %9 : vector<1x1x512xbf16> to vector<1x512xbf16>
    %c1 = arith.constant 1 : index
    %c0_10 = arith.constant 0 : index
    %c0_11 = arith.constant 0 : index
    %11 = vector.load %arg4[%c1, %c0_10, %c0_11] : memref<4x512x128xbf16, #tpu.memory_space<vmem>>, vector<1x512x128xbf16>
    %12 = vector.shape_cast %11 : vector<1x512x128xbf16> to vector<512x128xbf16>
    %cst_12 = arith.constant dense<0.000000e+00> : vector<1x128xf32>
    %13 = tpu.matmul %10, %12, %cst_12 {dimension_numbers = #tpu.dot_dimension_numbers<[1], [0], [0], [1], [0, 0, 1, 1], [], []>} : vector<1x512xbf16>, vector<512x128xbf16>, vector<1x128xf32> -> vector<1x128xf32>
    %14 = arith.addf %8, %13 : vector<1x128xf32>
    %15 = vector.extract_strided_slice %3 {offsets = [0, 0, 0], sizes = [1, 1, 512], strides = [1, 1, 1]} : vector<1x2x512xbf16> to vector<1x1x512xbf16>
    %16 = vector.shape_cast %15 : vector<1x1x512xbf16> to vector<1x512xbf16>
    %c2 = arith.constant 2 : index
    %c0_13 = arith.constant 0 : index
    %c0_14 = arith.constant 0 : index
    %17 = vector.load %arg4[%c2, %c0_13, %c0_14] : memref<4x512x128xbf16, #tpu.memory_space<vmem>>, vector<1x512x128xbf16>
    %18 = vector.shape_cast %17 : vector<1x512x128xbf16> to vector<512x128xbf16>
    %cst_15 = arith.constant dense<0.000000e+00> : vector<1x128xf32>
    %19 = tpu.matmul %16, %18, %cst_15 {dimension_numbers = #tpu.dot_dimension_numbers<[1], [0], [0], [1], [0, 0, 1, 1], [], []>} : vector<1x512xbf16>, vector<512x128xbf16>, vector<1x128xf32> -> vector<1x128xf32>
    %20 = arith.addf %14, %19 : vector<1x128xf32>
    %21 = vector.extract_strided_slice %3 {offsets = [0, 1, 0], sizes = [1, 1, 512], strides = [1, 1, 1]} : vector<1x2x512xbf16> to vector<1x1x512xbf16>
    %22 = vector.shape_cast %21 : vector<1x1x512xbf16> to vector<1x512xbf16>
    %c3 = arith.constant 3 : index
    %c0_16 = arith.constant 0 : index
    %c0_17 = arith.constant 0 : index
    %23 = vector.load %arg4[%c3, %c0_16, %c0_17] : memref<4x512x128xbf16, #tpu.memory_space<vmem>>, vector<1x512x128xbf16>
    %24 = vector.shape_cast %23 : vector<1x512x128xbf16> to vector<512x128xbf16>
    %cst_18 = arith.constant dense<0.000000e+00> : vector<1x128xf32>
    %25 = tpu.matmul %22, %24, %cst_18 {dimension_numbers = #tpu.dot_dimension_numbers<[1], [0], [0], [1], [0, 0, 1, 1], [], []>} : vector<1x512xbf16>, vector<512x128xbf16>, vector<1x128xf32> -> vector<1x128xf32>
    %26 = arith.addf %20, %25 : vector<1x128xf32>
    %c0_19 = arith.constant 0 : index
    %c0_20 = arith.constant 0 : index
    %27 = vector.load %arg5[%c0_19, %c0_20] : memref<1x128xf32, #tpu.memory_space<vmem>>, vector<1x128xf32>
    %28 = arith.addf %26, %27 : vector<1x128xf32>
    %29 = vector.shape_cast %28 : vector<1x128xf32> to vector<1x1x128xf32>
    %c0_21 = arith.constant 0 : index
    %c0_22 = arith.constant 0 : index
    %c0_23 = arith.constant 0 : index
    %c0_24 = arith.constant 0 : index
    %30 = vector.load %arg6[%c0_21, %c0_22, %c0_23, %c0_24] : memref<1x1x1x128xf32, #tpu.memory_space<vmem>>, vector<1x1x1x128xf32>
    %31 = vector.shape_cast %30 : vector<1x1x1x128xf32> to vector<1x1x128xf32>
    %32 = vector.shape_cast %29 : vector<1x1x128xf32> to vector<1x1x1x128xf32>
    tpu.vector_store %arg6[%c0_21, %c0_22, %c0_23, %c0_24], %32 {strides = array<i32>} : memref<1x1x1x128xf32, #tpu.memory_space<vmem>>, vector<1x1x1x128xf32>,
    return
  }
  func.func @transform_0(%arg0: i32, %arg1: i32) -> (i32, i32, i32, i32) {
    %c0_i32 = arith.constant 0 : i32
    %c0_i32_0 = arith.constant 0 : i32
    %c0_i32_1 = arith.constant 0 : i32
    return %arg0, %arg1, %c0_i32, %c0_i32_0 : i32, i32, i32, i32
  }
  func.func @transform_1(%arg0: i32, %arg1: i32) -> (i32, i32, i32, i32) {
    %c1_i32 = arith.constant 1 : i32
    %0 = arith.addi %arg1, %c1_i32 : i32
    %c1_i32_0 = arith.constant 1 : i32
    %1 = arith.muli %0, %c1_i32_0 : i32
    %c0_i32 = arith.constant 0 : i32
    %c0_i32_1 = arith.constant 0 : i32
    %c0_i32_2 = arith.constant 0 : i32
    return %arg0, %1, %c0_i32, %c0_i32_1 : i32, i32, i32, i32
  }
  func.func @transform_2(%arg0: i32, %arg1: i32) -> (i32, i32, i32) {
    %c0_i32 = arith.constant 0 : i32
    %c0_i32_0 = arith.constant 0 : i32
    %c0_i32_1 = arith.constant 0 : i32
    %c0_i32_2 = arith.constant 0 : i32
    return %c0_i32, %c0_i32_0, %c0_i32_1 : i32, i32, i32
  }
  func.func @transform_3(%arg0: i32, %arg1: i32) -> (i32, i32) {
    %c0_i32 = arith.constant 0 : i32
    %c0_i32_0 = arith.constant 0 : i32
    %c0_i32_1 = arith.constant 0 : i32
    return %c0_i32, %c0_i32_0 : i32, i32
  }
  func.func @transform_4(%arg0: i32, %arg1: i32) -> (i32, i32, i32, i32) {
    %c0_i32 = arith.constant 0 : i32
    %c0_i32_0 = arith.constant 0 : i32
    %c0_i32_1 = arith.constant 0 : i32
    return %arg0, %arg1, %c0_i32, %c0_i32_0 : i32, i32, i32, i32
  }
}

</mosaic_0001>

<bundles_post_ra>
// kernel: fc_discriminator_forward.5
= control target key start
LH: loop header
LB: loop body
LE: loop exit
PB: predicated region body
PF: predicated region fallthrough
CT: control target
= control target key end

     0   :  { %s3092_s15 = smov 0   ;;  %s3094_s16 = smov 0   ;;  %s3537_s0 = inlined_call_operand.vmem [shape: bf16[2,17,17,128], index: 0, kind: input, shape index: {}, may-alias: {0,1}]   ;;  %s3538_s1 = inlined_call_operand.vmem [shape: bf16[2,17,17,128], index: 1, kind: input, shape index: {}, may-alias: {0,1}]   ;;  %s3539_s2 = inlined_call_operand.vmem [shape: bf16[4,128,128], index: 2, kind: input, shape index: {}]   ;;  %s3540_s3 = inlined_call_operand.vmem [shape: f32[1,128], index: 3, kind: input, shape index: {}]   ;;  %s3541_s4 = inlined_call_operand.vmem [shape: bf16[2,16,16,128], index: 4, kind: output, shape index: {}]  }
   0x1   :  { %s3096_s17 = smov 0  }
   0x2 LB: > { %s26_s18 = sadd.s32 1, %s3061_s16  ;;  %p2299_p0 = scmp.ge.s32.totalorder %s3065_s17, 1  ;;  %s3065_s17 = sphi %s3096_s17, %s14_s17   ;;  %s3061_s16 = sphi %s3094_s16, %s3545_s16   ;;  %s3057_s15 = sphi %s3092_s15, %s3544_s15  }
   0x3   : > { %p28_p1 = scmp.ge.s32.totalorder %s26_s18, 2  ;;  %p218_p2 = scmp.lt.s32.totalorder %s3065_s17, 3 }
   0x5   : > { %s3547_s18 = smov (%p28_p1, %s26_s18), 0  ;;  %p219_p3 = pnand %p2299_p0, %p218_p2 }
   0x6   : > { %v2994_v0 = vld [vmem:[%s3539_s2 + $0x40] sm:$0xff] (!%p219_p3)   ;;  %p276_p4 = scmp.lt.s32.totalorder (!%p219_p3), %s3057_s15, 1  ;;  %v2996_v2 = vld [vmem:[%s3539_s2 + $0x48] sm:$0xff] (!%p219_p3)   ;;  %v2998_v4 = vld [vmem:[%s3539_s2 + $0x50] sm:$0xff] (!%p219_p3)   ;;  %vm383_vm0 = vsmask.f32 (!%p219_p3), 3328 }
   0x7   : > { %222 = sbr.rel (%p219_p3) target bundleno = 387 (0x183), region = 36  ;;  %v2995_v1 = vld [vmem:[%s3539_s2 + $0x80] sm:$0xff] (!%p219_p3)   ;;  %2679 = vmatprep.subr.bf16.mxu1 (!%p219_p3), %v2994_v0  ;;  %v2997_v3 = vld [vmem:[%s3539_s2 + $0x88] sm:$0xff] (!%p219_p3)   ;;  %v2999_v5 = vld [vmem:[%s3539_s2 + $0x90] sm:$0xff] (!%p219_p3)   ;;  %vm384_vm1 = vsmask.f32 (!%p219_p3), 7440 }
   0x8   : > { %2775 = vmatprep.subr.bf16.mxu0 (!%p219_p3), %v2995_v1  ;;  %2680 = vmatpush3.bf16.msra.mxu1 (!%p219_p3), %v2994_v0  ;;  %v3000_v6 = vld [vmem:[%s3539_s2 + $0x58] sm:$0xff] (!%p219_p3)   ;;  %v3002_v8 = vld [vmem:[%s3539_s2 + $0x60] sm:$0xff] (!%p219_p3)   ;;  %v3004_v10 = vld [vmem:[%s3539_s2 + $0x68] sm:$0xff] (!%p219_p3)  }
   0x9   : > { %2776 = vmatpush3.bf16.msra.mxu0 (!%p219_p3), %v2995_v1  ;;  %2681 = vmatprep.subr.bf16.mxu1 (!%p219_p3), %v2996_v2  ;;  %v3001_v7 = vld [vmem:[%s3539_s2 + $0x98] sm:$0xff] (!%p219_p3)   ;;  %v3003_v9 = vld [vmem:[%s3539_s2 + $0xa0] sm:$0xff] (!%p219_p3)   ;;  %v3005_v11 = vld [vmem:[%s3539_s2 + $0xa8] sm:$0xff] (!%p219_p3)  }
   0xa   : > { %2777 = vmatprep.subr.bf16.mxu0 (!%p219_p3), %v2997_v3  ;;  %v3006_v17 = vld [vmem:[%s3539_s2 + $0x70] sm:$0xff] (!%p219_p3)   ;;  %v3008_v38 = vld [vmem:[%s3539_s2 + $0x78] sm:$0xff] (!%p219_p3)   ;;  %vm3183_vm2 = vmor (!%p219_p3), %vm383_vm0, %vm384_vm1 }
   0xb   : > { %v3007_v33 = vld [vmem:[%s3539_s2 + $0xb0] sm:$0xff] (!%p219_p3)   ;;  %v3009_v45 = vld [vmem:[%s3539_s2 + $0xb8] sm:$0xff] (!%p219_p3)  }
   0xc   : > { %2682 = vmatpush3.bf16.msra.mxu1 (!%p219_p3), %v2996_v2 }
   0xd   : > { %2778 = vmatpush3.bf16.msra.mxu0 (!%p219_p3), %v2997_v3  ;;  %2683 = vmatprep.subr.bf16.mxu1 (!%p219_p3), %v2998_v4 }
   0xe   : > { %s3549_s15 = smov (!%p276_p4, %s3057_s15), 1  ;;  %2779 = vmatprep.subr.bf16.mxu0 %v2999_v5 }
   0xf   : > { %s2967_s9 = smul.u32 204, %s3549_s15  ;;  %s2455_s29 = sshll.u32 %s3549_s15, 7 }
  0x10   : > { %2684 = vmatpush3.bf16.msra.mxu1 %v2998_v4  ;;  %s3482_s6 = scalar_lea.vmem %s3541_s4, %s2455_s29 }
  0x11   : > { %2780 = vmatpush3.bf16.msra.mxu0 %v2999_v5  ;;  %2685 = vmatprep.subr.bf16.mxu1 %v3000_v6  ;;  %s3148_s20 = scalar_lea.vmem %s3537_s0, %s2967_s9  ;;  %s2454_s25 = sadd.s32 192, %s2967_s9 }
  0x12   : > { %2781 = vmatprep.subr.bf16.mxu0 %v3001_v7  ;;  %v3157_v12 = vld [vmem:[%s3148_s20] sm:$0xf]  ;;  %v3160_v13 = vld [vmem:[%s3148_s20 + $0x4] sm:$0xf]  ;;  %v318_v14 = vld [vmem:[%s3148_s20 + $0x8] sm:$0x1]  ;;  %s3413_s27 = scalar_lea.vmem %s3538_s1, %s2454_s25 }
  0x13   : > { %v387_v15 = vshrl.u32 %v3157_v12, 16  ;;  %v390_v16 = vshll.u32 %v3157_v12, 16  ;;  %v396_v18 = vshll.u32 %v3160_v13, 16  ;;  %v400_v19 = vshrl.u32 %v3160_v13, 16  ;;  %v319_v21 = vld [vmem:[%s3148_s20 + $0xc] sm:$0xf] }
  0x14   : > { %2686 = vmatpush3.bf16.msra.mxu1 %v3000_v6  ;;  %v406_v20 = vshll.u32 %v318_v14, 16  ;;  %v2344_v22 = vcombine.low %v3157_v12, %v3160_v13  ;;  %v320_v25 = vld [vmem:[%s3148_s20 + $0x10] sm:$0xf]  ;;  %v411_v26 = vshrl.u32 %v319_v21, 16  ;;  %v414_v27 = vshll.u32 %v319_v21, 16 }
  0x15   : > { %2782 = vmatpush3.bf16.msra.mxu0 %v3001_v7  ;;  %2687 = vmatprep.subr.bf16.mxu1 %v3002_v8  ;;  %v389_v23 = vrot.slane %v387_v15, 4  ;;  %v392_v24 = vrot.slane %v390_v16, 5  ;;  %v398_v28 = vrot.slane %v396_v18, 5  ;;  %v402_v29 = vrot.slane %v400_v19, 4  ;;  %v321_v32 = vld [vmem:[%s3148_s20 + $0x14] sm:$0x1] }
  0x16   : > { %2783 = vmatprep.subr.bf16.mxu0 %v3003_v9  ;;  %v408_v30 = vrot.slane %v406_v20, 5  ;;  %v420_v31 = vshll.u32 %v320_v25, 16  ;;  %v413_v35 = vrot.slane %v411_v26, 4  ;;  %v416_v36 = vrot.slane %v414_v27, 5  ;;  %v322_v44 = vld [vmem:[%s3148_s20 + $0x18] sm:$0xf] }
  0x17   : > { %v393_v34 = vor.u32 %v392_v24, %v389_v23  ;;  %v424_v37 = vshrl.u32 %v320_v25, 16  ;;  %v403_v40 = vor.u32 %v402_v29, %v398_v28  ;;  %v3187_v42 = vcombine.low %v319_v21, %v320_v25  ;;  %v323_v49 = vld [vmem:[%s3148_s20 + $0x1c] sm:$0xf]  ;;  %v324_v59 = vld [vmem:[%s3148_s20 + $0x20] sm:$0x1] }
  0x18   : > { %2688 = vmatpush3.bf16.msra.mxu1 %v3002_v8  ;;  %v422_v41 = vrot.slane %v420_v31, 5  ;;  %v430_v43 = vshll.u32 %v321_v32, 16  ;;  %v417_v47 = vor.u32 %v416_v36, %v413_v35  ;;  %v435_v50 = vshrl.u32 %v322_v44, 16  ;;  %v325_v0 = vld [vmem:[%s3148_s20 + $0x24] sm:$0xf] }
  0x19   : > { %2784 = vmatpush3.bf16.msra.mxu0 %v3003_v9  ;;  %2689 = vmatprep.subr.bf16.mxu1 %v3004_v10  ;;  %v394_v46 = vrot.slane %v393_v34, 4  ;;  %v426_v48 = vrot.slane %v424_v37, 4  ;;  %v404_v51 = vrot.slane %v403_v40, 4  ;;  %v438_v53 = vshll.u32 %v322_v44, 16  ;;  %v326_v5 = vld [vmem:[%s3148_s20 + $0x28] sm:$0xf] }
  0x1a   : > { %2785 = vmatprep.subr.bf16.mxu0 %v3005_v11  ;;  %v432_v52 = vrot.slane %v430_v43, 5  ;;  %v444_v54 = vshll.u32 %v323_v49, 16  ;;  %v418_v56 = vrot.slane %v417_v47, 4  ;;  %2791 = vmatprep.mubr.bf16.mxu0 %v3187_v42  ;;  %v437_v58 = vrot.slane %v435_v50, 4  ;;  %v327_v6 = vld [vmem:[%s3148_s20 + $0x2c] sm:$0x1] }
  0x1b   : > { %v399_v55 = vsel %vm3183_vm2, %v394_v46, %v398_v28  ;;  %v427_v57 = vor.u32 %v426_v48, %v422_v41  ;;  %v409_v60 = vsel %vm3183_vm2, %v404_v51, %v408_v30  ;;  %v440_v61 = vrot.slane %v438_v53, 5  ;;  %v3011_v7 = vld [vmem:[%s3539_s2] sm:$0xff]   ;;  %v328_v24 = vld [vmem:[%s3148_s20 + $0x30] sm:$0xf]  ;;  %v329_v25 = vld [vmem:[%s3148_s20 + $0x34] sm:$0xf] }
  0x1c   : > { %2690 = vmatpush3.bf16.msra.mxu1 %v3004_v10  ;;  %v446_v62 = vrot.slane %v444_v54, 5  ;;  %v448_v63 = vshrl.u32 %v323_v49, 16  ;;  %v2320_v1 = vcombine.low %v399_v55, %v409_v60  ;;  %v423_v3 = vsel %vm3183_vm2, %v418_v56, %v422_v41  ;;  %v3013_v15 = vld [vmem:[%s3539_s2 + $0xc0] sm:$0xff]   ;;  %v3015_v34 = vld [vmem:[%s3539_s2 + $0x8] sm:$0xff]   ;;  %v330_v40 = vld [vmem:[%s3148_s20 + $0x38] sm:$0x1] }
  0x1d   : > { %2786 = vmatpush3.bf16.msra.mxu0 %v3005_v11  ;;  %2691 = vmatprep.subr.bf16.mxu1 %v3006_v17  ;;  %v428_v2 = vrot.slane %v427_v57, 4  ;;  %v3203_v4 = vcombine.low %v322_v44, %v323_v49  ;;  %v441_v9 = vor.u32 %v440_v61, %v437_v58  ;;  %v454_v10 = vshll.u32 %v324_v59, 16  ;;  %v331_v41 = vld [vmem:[%s3148_s20 + $0x3c] sm:$0xf]  ;;  %v3017_v47 = vld [vmem:[%s3539_s2 + $0xc8] sm:$0xff]   ;;  %v3019_v53 = vld [vmem:[%s3539_s2 + $0x10] sm:$0xff]  }
  0x1e   : > { %2787 = vmatprep.subr.bf16.mxu0 %v3007_v33  ;;  %v450_v8 = vrot.slane %v448_v63, 4  ;;  %v459_v11 = vshrl.u32 %v325_v0, 16  ;;  %2695 = vmatprep.mubr.bf16.mxu1 %v2320_v1  ;;  %v462_v16 = vshll.u32 %v325_v0, 16  ;;  %v472_v18 = vshrl.u32 %v326_v5, 16  ;;  %v332_v48 = vld [vmem:[%s3148_s20 + $0x40] sm:$0xf] }
  0x1f   : > { %v433_v14 = vsel %vm3183_vm2, %v428_v2, %v432_v52  ;;  %v442_v20 = vrot.slane %v441_v9, 4  ;;  %v456_v23 = vrot.slane %v454_v10, 5  ;;  %v3221_v32 = vcombine.low %v325_v0, %v326_v5  ;;  %v3021_v58 = vld [vmem:[%s3539_s2 + $0xd0] sm:$0xff]   ;;  %v333_v63 = vld [vmem:[%s3148_s20 + $0x44] sm:$0x1] }
  0x20   : > { %2692 = vmatpush3.bf16.msra.mxu1 %v3006_v17  ;;  %v468_v17 = vshll.u32 %v326_v5, 16  ;;  %v3215_v19 = vcombine.low %v423_v3, %v433_v14  ;;  %v451_v21 = vor.u32 %v450_v8, %v446_v62  ;;  %v461_v26 = vrot.slane %v459_v11, 4  ;;  %v334_v0 = vld [vmem:[%s3148_s20 + $0x48] sm:$0xf] }
  0x21   : > { %2788 = vmatpush3.bf16.msra.mxu0 %v3007_v33  ;;  %2693 = vmatprep.subr.bf16.mxu1 %v3008_v38  ;;  %v464_v27 = vrot.slane %v462_v16, 5  ;;  %v474_v29 = vrot.slane %v472_v18, 4  ;;  %v447_v30 = vsel %vm3183_vm2, %v442_v20, %v446_v62  ;;  %v478_v33 = vshll.u32 %v327_v6, 16  ;;  %v335_v16 = vld [vmem:[%s3148_s20 + $0x4c] sm:$0xf] }
  0x22   : > { %2789 = vmatprep.subr.bf16.mxu0 %v3009_v45  ;;  %v470_v28 = vrot.slane %v468_v17, 5  ;;  %v452_v31 = vrot.slane %v451_v21, 4  ;;  %v483_v37 = vshrl.u32 %v328_v24, 16  ;;  %v496_v46 = vshrl.u32 %v329_v25, 16  ;;  %v3023_v17 = vld [vmem:[%s3539_s2 + $0x18] sm:$0xff]  }
  0x23   : > { %v465_v35 = vor.u32 %v464_v27, %v461_v26  ;;  %v480_v44 = vrot.slane %v478_v33, 5  ;;  %v3242_v57 = vcombine.low %v328_v24, %v329_v25  ;;  %v502_v61 = vshll.u32 %v330_v40, 16 }
  0x24   : > { %2694 = vmatpush3.bf16.msra.mxu1 %v3008_v38  ;;  %v475_v36 = vor.u32 %v474_v29, %v470_v28  ;;  %v486_v38 = vshll.u32 %v328_v24, 16  ;;  %v457_v43 = vsel %vm3183_vm2, %v452_v31, %v456_v23  ;;  %v485_v52 = vrot.slane %v483_v37, 4  ;;  %v336_v24 = vld [vmem:[%s3148_s20 + $0x50] sm:$0x1]  ;;  %v337_v29 = vld [vmem:[%s3148_s20 + $0x54] sm:$0xf] }
  0x25   : > { %2790 = vmatpush3.bf16.msra.mxu0 %v3009_v45  ;;  %2727 = vmatprep.subr.bf16.mxu1 %v3011_v7  ;;  %v492_v45 = vshll.u32 %v329_v25, 16  ;;  %v3236_v49 = vcombine.low %v447_v30, %v457_v43  ;;  %v466_v50 = vrot.slane %v465_v35, 4  ;;  %v498_v56 = vrot.slane %v496_v46, 4  ;;  %v3025_v30 = vld [vmem:[%s3539_s2 + $0xd8] sm:$0xff]  }
  0x26   : > { %2823 = vmatprep.subr.bf16.mxu0 %v3013_v15  ;;  %v476_v51 = vrot.slane %v475_v36, 4  ;;  %v488_v54 = vrot.slane %v486_v38, 5  ;;  %v507_v62 = vshrl.u32 %v331_v41, 16  ;;  %v510_v5 = vshll.u32 %v331_v41, 16  ;;  %v3027_v36 = vld [vmem:[%s3539_s2 + $0x20] sm:$0xff]  }
  0x27   : > { %2696 = vmatmul.mubr.bf16.vlgmr.msra.gmra.mrb[0].mxu1 %v3215_v19  ;;  %v494_v55 = vrot.slane %v492_v45, 5  ;;  %v471_v59 = vsel %vm3183_vm2, %v466_v50, %v470_v28  ;;  %v504_v6 = vrot.slane %v502_v61, 5  ;;  %v516_v8 = vshll.u32 %v332_v48, 16  ;;  %v338_v43 = vld [vmem:[%s3148_s20 + $0x58] sm:$0xf] }
  0x28   : > { %2792 = vmatmul.mubr.bf16.vlgmr.msra.gmra.mrb[0].mxu0 %v3203_v4  ;;  %2728 = vmatpush3.bf16.msra.mxu1 %v3011_v7  ;;  %v481_v60 = vsel %vm3183_vm2, %v476_v51, %v480_v44  ;;  %v489_v2 = vor.u32 %v488_v54, %v485_v52  ;;  %v509_v7 = vrot.slane %v507_v62, 4  ;;  %v520_v9 = vshrl.u32 %v332_v48, 16  ;;  %v339_v54 = vld [vmem:[%s3148_s20 + $0x5c] sm:$0x1] }
  0x29   : > { %2824 = vmatpush3.bf16.msra.mxu0 %v3013_v15  ;;  %2795 = vmatprep.mubr.bf16.mxu0 %v3221_v32  ;;  %v3254_v1 = vcombine.low %v471_v59, %v481_v60  ;;  %v499_v3 = vor.u32 %v498_v56, %v494_v55  ;;  %v512_v14 = vrot.slane %v510_v5, 5  ;;  %v3256_v15 = vcombine.low %v331_v41, %v332_v48  ;;  %v3029_v48 = vld [vmem:[%s3539_s2 + $0xe0] sm:$0xff]  }
  0x2a   : > { %2699 = vmatprep.mubr.bf16.mxu1 %v3236_v49  ;;  %2729 = vmatprep.subr.bf16.mxu1 %v3015_v34  ;;  %v490_v10 = vrot.slane %v489_v2, 4  ;;  %v518_v18 = vrot.slane %v516_v8, 5  ;;  %v522_v20 = vrot.slane %v520_v9, 4  ;;  %v526_v21 = vshll.u32 %v333_v63, 16  ;;  %v340_v60 = vld [vmem:[%s3148_s20 + $0x60] sm:$0xf] }
  0x2b   : > { %2825 = vmatprep.subr.bf16.mxu0 %v3017_v47  ;;  %v500_v11 = vrot.slane %v499_v3, 4  ;;  %v531_v23 = vshrl.u32 %v334_v0, 16  ;;  %v513_v27 = vor.u32 %v512_v14, %v509_v7  ;;  %v534_v28 = vshll.u32 %v334_v0, 16  ;;  %v341_v2 = vld [vmem:[%s3148_s20 + $0x64] sm:$0xf]  ;;  %v3031_v3 = vld [vmem:[%s3539_s2 + $0x28] sm:$0xff]  }
  0x2c   : > { %2730 = vmatpush3.bf16.msra.mxu1 %v3015_v34  ;;  %v495_v25 = vsel %vm3183_vm2, %v490_v10, %v494_v55  ;;  %v523_v33 = vor.u32 %v522_v20, %v518_v18  ;;  %v528_v34 = vrot.slane %v526_v21, 5  ;;  %v540_v40 = vshll.u32 %v335_v16, 16  ;;  %v342_v9 = vld [vmem:[%s3148_s20 + $0x68] sm:$0x1] }
  0x2d   : > { %2826 = vmatpush3.bf16.msra.mxu0 %v3017_v47  ;;  %2731 = vmatprep.subr.bf16.mxu1 %v3019_v53  ;;  %v505_v26 = vsel %vm3183_vm2, %v500_v11, %v504_v6  ;;  %v533_v35 = vrot.slane %v531_v23, 4  ;;  %v514_v37 = vrot.slane %v513_v27, 4  ;;  %v536_v38 = vrot.slane %v534_v28, 5  ;;  %v3033_v10 = vld [vmem:[%s3539_s2 + $0xe8] sm:$0xff]  }
  0x2e   : > { %2827 = vmatprep.subr.bf16.mxu0 %v3021_v58  ;;  %v3273_v31 = vcombine.low %v495_v25, %v505_v26  ;;  %v544_v41 = vshrl.u32 %v335_v16, 16  ;;  %v524_v44 = vrot.slane %v523_v33, 4  ;;  %v3281_v45 = vcombine.low %v334_v0, %v335_v16  ;;  %v3035_v25 = vld [vmem:[%s3539_s2 + $0x30] sm:$0xff]  }
  0x2f   : > { %2700 = vmatmul.mubr.bf16.gmra.mrb[4].mxu1 %v3254_v1  ;;  %v550_v46 = vshll.u32 %v336_v24, 16  ;;  %v555_v47 = vshrl.u32 %v337_v29, 16  ;;  %v519_v50 = vsel %vm3183_vm2, %v514_v37, %v518_v18  ;;  %v542_v51 = vrot.slane %v540_v40, 5  ;;  %v343_v24 = vld [vmem:[%s3148_s20 + $0x6c] sm:$0xf]  ;;  %v3037_v33 = vld [vmem:[%s3539_s2 + $0xf0] sm:$0xff]  }
  0x30   : > { %2796 = vmatmul.mubr.bf16.gmra.mrb[4].mxu0 %v3242_v57  ;;  %2732 = vmatpush3.bf16.msra.mxu1 %v3019_v53  ;;  %v546_v52 = vrot.slane %v544_v41, 4  ;;  %v537_v53 = vor.u32 %v536_v38, %v533_v35  ;;  %v529_v55 = vsel %vm3183_vm2, %v524_v44, %v528_v34  ;;  %v558_v59 = vshll.u32 %v337_v29, 16 }
  0x31   : > { %2799 = vmatprep.mubr.bf16.mxu0 %v3256_v15  ;;  %2828 = vmatpush3.bf16.msra.mxu0 %v3021_v58  ;;  %v552_v56 = vrot.slane %v550_v46, 5  ;;  %v557_v58 = vrot.slane %v555_v47, 4  ;;  %v3292_v61 = vcombine.low %v519_v50, %v529_v55  ;;  %v564_v0 = vshll.u32 %v338_v43, 16  ;;  %v345_v50 = vld [vmem:[%s3148_s20 + $0x74] sm:$0x1] }
  0x32   : > { %2703 = vmatprep.mubr.bf16.mxu1 %v3273_v31  ;;  %2733 = vmatprep.subr.bf16.mxu1 %v3023_v17  ;;  %v538_v62 = vrot.slane %v537_v53, 4  ;;  %v547_v63 = vor.u32 %v546_v52, %v542_v51  ;;  %v560_v5 = vrot.slane %v558_v59, 5  ;;  %v568_v6 = vshrl.u32 %v338_v43, 16 }
  0x33   : > { %2829 = vmatprep.subr.bf16.mxu0 %v3025_v30  ;;  %v3298_v7 = vcombine.low %v337_v29, %v338_v43  ;;  %v574_v8 = vshll.u32 %v339_v54, 16  ;;  %v566_v16 = vrot.slane %v564_v0, 5  ;;  %v582_v23 = vshll.u32 %v340_v60, 16 }
  0x34   : > { %2734 = vmatpush3.bf16.msra.mxu1 %v3023_v17  ;;  %v543_v11 = vsel %vm3183_vm2, %v538_v62, %v542_v51  ;;  %v548_v14 = vrot.slane %v547_v63, 4  ;;  %v579_v17 = vshrl.u32 %v340_v60, 16  ;;  %v570_v18 = vrot.slane %v568_v6, 4  ;;  %v346_v51 = vld [vmem:[%s3148_s20 + $0x78] sm:$0xf] }
  0x35   : > { %2830 = vmatpush3.bf16.msra.mxu0 %v3025_v30  ;;  %2735 = vmatprep.subr.bf16.mxu1 %v3027_v36  ;;  %v561_v20 = vor.u32 %v560_v5, %v557_v58  ;;  %v576_v21 = vrot.slane %v574_v8, 5  ;;  %v588_v28 = vshll.u32 %v341_v2, 16  ;;  %v592_v29 = vshrl.u32 %v341_v2, 16  ;;  %v344_v30 = vld [vmem:[%s3148_s20 + $0x70] sm:$0xf]  ;;  %v3039_v63 = vld [vmem:[%s3539_s2 + $0x38] sm:$0xff]  }
  0x36   : > { %2831 = vmatprep.subr.bf16.mxu0 %v3029_v48  ;;  %v553_v26 = vsel %vm3183_vm2, %v548_v14, %v552_v56  ;;  %v581_v27 = vrot.slane %v579_v17, 4  ;;  %v584_v37 = vrot.slane %v582_v23, 5  ;;  %v3321_v41 = vcombine.low %v340_v60, %v341_v2  ;;  %v347_v56 = vld [vmem:[%s3148_s20 + $0x7c] sm:$0xf]  ;;  %v348_v14 = vld [vmem:[%s3148_s20 + $0x80] sm:$0x1] }
  0x37   : > { %2704 = vmatmul.mubr.bf16.gmra.mrb[8].mxu1 %v3292_v61  ;;  %v3319_v34 = vcombine.low %v543_v11, %v553_v26  ;;  %v562_v35 = vrot.slane %v561_v20, 4  ;;  %v590_v38 = vrot.slane %v588_v28, 5  ;;  %v594_v40 = vrot.slane %v592_v29, 4  ;;  %v3041_v6 = vld [vmem:[%s3539_s2 + $0xf8] sm:$0xff]  }
  0x38   : > { %2800 = vmatmul.mubr.bf16.gmra.mrb[8].mxu0 %v3281_v45  ;;  %2736 = vmatpush3.bf16.msra.mxu1 %v3027_v36  ;;  %v571_v36 = vor.u32 %v570_v18, %v566_v16  ;;  %v598_v43 = vshll.u32 %v342_v9, 16  ;;  %v585_v47 = vor.u32 %v584_v37, %v581_v27  ;;  %v606_v54 = vshll.u32 %v343_v24, 16  ;;  %v349_v27 = vld [vmem:[%s3148_s20 + $0x84] sm:$0xf] }
  0x39   : > { %2803 = vmatprep.mubr.bf16.mxu0 %v3298_v7  ;;  %2832 = vmatpush3.bf16.msra.mxu0 %v3029_v48  ;;  %v567_v44 = vsel %vm3183_vm2, %v562_v35, %v566_v16  ;;  %v603_v48 = vshrl.u32 %v343_v24, 16  ;;  %v595_v52 = vor.u32 %v594_v40, %v590_v38  ;;  %v612_v55 = vshll.u32 %v344_v30, 16  ;;  %v350_v35 = vld [vmem:[%s3148_s20 + $0x88] sm:$0xf]  ;;  %v351_v40 = vld [vmem:[%s3148_s20 + $0x8c] sm:$0x1] }
  0x3a   : > { %2737 = vmatprep.subr.bf16.mxu1 %v3031_v3  ;;  %2833 = vmatprep.subr.bf16.mxu0 %v3033_v10  ;;  %v572_v46 = vrot.slane %v571_v36, 4  ;;  %v600_v53 = vrot.slane %v598_v43, 5  ;;  %v586_v59 = vrot.slane %v585_v47, 4  ;;  %v616_v62 = vshrl.u32 %v344_v30, 16 }
  0x3b   : > { %2707 = vmatprep.mubr.bf16.mxu1 %v3319_v34  ;;  %v605_v60 = vrot.slane %v603_v48, 4  ;;  %v596_v2 = vrot.slane %v595_v52, 4  ;;  %v614_v5 = vrot.slane %v612_v55, 5  ;;  %v622_v11 = vshll.u32 %v345_v50, 16 }
  0x3c   : > { %2738 = vmatpush3.bf16.msra.mxu1 %v3031_v3  ;;  %v577_v58 = vsel %vm3183_vm2, %v572_v46, %v576_v21  ;;  %v608_v3 = vrot.slane %v606_v54, 5  ;;  %v591_v8 = vsel %vm3183_vm2, %v586_v59, %v590_v38  ;;  %v618_v9 = vrot.slane %v616_v62, 4  ;;  %v352_v54 = vld [vmem:[%s3148_s20 + $0x90] sm:$0xf]  ;;  %v353_v59 = vld [vmem:[%s3148_s20 + $0x94] sm:$0xf] }
  0x3d   : > { %2834 = vmatpush3.bf16.msra.mxu0 %v3033_v10  ;;  %2739 = vmatprep.subr.bf16.mxu1 %v3035_v25  ;;  %v3334_v0 = vcombine.low %v567_v44, %v577_v58  ;;  %v3342_v10 = vcombine.low %v343_v24, %v344_v30  ;;  %v601_v16 = vsel %vm3183_vm2, %v596_v2, %v600_v53  ;;  %v627_v18 = vshrl.u32 %v346_v51, 16 }
  0x3e   : > { %2835 = vmatprep.subr.bf16.mxu0 %v3037_v33  ;;  %v609_v17 = vor.u32 %v608_v3, %v605_v60  ;;  %v630_v20 = vshll.u32 %v346_v51, 16  ;;  %v3348_v21 = vcombine.low %v591_v8, %v601_v16  ;;  %v619_v23 = vor.u32 %v618_v9, %v614_v5 }
  0x3f   : > { %2708 = vmatmul.mubr.bf16.gmra.mrb[12].mxu1 %v3334_v0  ;;  %v624_v24 = vrot.slane %v622_v11, 5  ;;  %v636_v26 = vshll.u32 %v347_v56, 16  ;;  %v629_v28 = vrot.slane %v627_v18, 4  ;;  %v640_v30 = vshrl.u32 %v347_v56, 16 }
  0x40   : > { %2804 = vmatmul.mubr.bf16.gmra.mrb[12].mxu0 %v3321_v41  ;;  %2740 = vmatpush3.bf16.msra.mxu1 %v3035_v25  ;;  %v610_v25 = vrot.slane %v609_v17, 4  ;;  %v632_v29 = vrot.slane %v630_v20, 5  ;;  %v3354_v37 = vcombine.low %v346_v51, %v347_v56  ;;  %v646_v38 = vshll.u32 %v348_v14, 16  ;;  %v354_v17 = vld [vmem:[%s3148_s20 + $0x98] sm:$0x1] }
  0x41   : > { %2836 = vmatpush3.bf16.msra.mxu0 %v3037_v33  ;;  %2807 = vmatprep.mubr.bf16.mxu0 %v3342_v10  ;;  %v620_v33 = vrot.slane %v619_v23, 4  ;;  %v638_v36 = vrot.slane %v636_v26, 5  ;;  %v642_v44 = vrot.slane %v640_v30, 4  ;;  %v651_v47 = vshrl.u32 %v349_v27, 16  ;;  %v355_v26 = vld [vmem:[%s3148_s20 + $0x9c] sm:$0xf] }
  0x42   : > { %2741 = vmatprep.subr.bf16.mxu1 %v3039_v63  ;;  %2837 = vmatprep.subr.bf16.mxu0 %v3041_v6  ;;  %v615_v43 = vsel %vm3183_vm2, %v610_v25, %v614_v5  ;;  %v633_v46 = vor.u32 %v632_v29, %v629_v28  ;;  %v648_v50 = vrot.slane %v646_v38, 5  ;;  %v654_v52 = vshll.u32 %v349_v27, 16  ;;  %v356_v30 = vld [vmem:[%s3148_s20 + $0xa0] sm:$0xf] }
  0x43   : > { %2711 = vmatprep.mubr.bf16.mxu1 %v3348_v21  ;;  %v625_v48 = vsel %vm3183_vm2, %v620_v33, %v624_v24  ;;  %v660_v53 = vshll.u32 %v350_v35, 16  ;;  %v643_v56 = vor.u32 %v642_v44, %v638_v36  ;;  %v653_v58 = vrot.slane %v651_v47, 4  ;;  %v357_v47 = vld [vmem:[%s3148_s20 + $0xa4] sm:$0x1] }
  0x44   : > { %2742 = vmatpush3.bf16.msra.mxu1 %v3039_v63  ;;  %v3362_v51 = vcombine.low %v615_v43, %v625_v48  ;;  %v634_v55 = vrot.slane %v633_v46, 4  ;;  %v656_v60 = vrot.slane %v654_v52, 5  ;;  %v664_v63 = vshrl.u32 %v350_v35, 16  ;;  %v358_v48 = vld [vmem:[%s3148_s20 + $0xa8] sm:$0xf] }
  0x45   : > { %2838 = vmatpush3.bf16.msra.mxu0 %v3041_v6  ;;  %v662_v62 = vrot.slane %v660_v53, 5  ;;  %v3366_v2 = vcombine.low %v349_v27, %v350_v35  ;;  %v644_v5 = vrot.slane %v643_v56, 4  ;;  %v670_v6 = vshll.u32 %v351_v40, 16 }
  0x46   : > { %v639_v3 = vsel %vm3183_vm2, %v634_v55, %v638_v36  ;;  %v675_v8 = vshrl.u32 %v352_v54, 16  ;;  %v666_v9 = vrot.slane %v664_v63, 4  ;;  %v657_v11 = vor.u32 %v656_v60, %v653_v58 }
  0x47   : > { %2712 = vmatmul.mubr.bf16.gmra.mrb[16].mxu1 %v3362_v51  ;;  %v678_v14 = vshll.u32 %v352_v54, 16  ;;  %v684_v16 = vshll.u32 %v353_v59, 16  ;;  %v649_v18 = vsel %vm3183_vm2, %v644_v5, %v648_v50  ;;  %v672_v20 = vrot.slane %v670_v6, 5  ;;  %v359_v5 = vld [vmem:[%s3148_s20 + $0xac] sm:$0xf] }
  0x48   : > { %2808 = vmatmul.mubr.bf16.gmra.mrb[16].mxu0 %v3354_v37  ;;  %v677_v23 = vrot.slane %v675_v8, 4  ;;  %v688_v24 = vshrl.u32 %v353_v59, 16  ;;  %v3376_v27 = vcombine.low %v639_v3, %v649_v18  ;;  %v658_v25 = vrot.slane %v657_v11, 4 }
  0x49   : > { %2811 = vmatprep.mubr.bf16.mxu0 %v3366_v2  ;;  %v667_v28 = vor.u32 %v666_v9, %v662_v62  ;;  %v680_v29 = vrot.slane %v678_v14, 5  ;;  %v686_v35 = vrot.slane %v684_v16, 5  ;;  %v3379_v36 = vcombine.low %v352_v54, %v353_v59 }
  0x4a   : > { %v690_v33 = vrot.slane %v688_v24, 4  ;;  %v694_v38 = vshll.u32 %v354_v17, 16  ;;  %2715 = vmatprep.mubr.bf16.mxu1 %v3376_v27  ;;  %v663_v40 = vsel %vm3183_vm2, %v658_v25, %v662_v62  ;;  %v699_v46 = vshrl.u32 %v355_v26, 16 }
  0x4b   : > { %v668_v43 = vrot.slane %v667_v28, 4  ;;  %v681_v44 = vor.u32 %v680_v29, %v677_v23  ;;  %v702_v53 = vshll.u32 %v355_v26, 16  ;;  %v708_v55 = vshll.u32 %v356_v30, 16  ;;  %v361_v28 = vld [vmem:[%s3148_s20 + $0xb4] sm:$0xf] }
  0x4c   : > { %v691_v50 = vor.u32 %v690_v33, %v686_v35  ;;  %v696_v52 = vrot.slane %v694_v38, 5  ;;  %v701_v58 = vrot.slane %v699_v46, 4  ;;  %v712_v59 = vshrl.u32 %v356_v30, 16  ;;  %v362_v38 = vld [vmem:[%s3148_s20 + $0xb8] sm:$0xf] }
  0x4d   : > { %v673_v54 = vsel %vm3183_vm2, %v668_v43, %v672_v20  ;;  %v682_v56 = vrot.slane %v681_v44, 4  ;;  %v704_v63 = vrot.slane %v702_v53, 5  ;;  %v710_v3 = vrot.slane %v708_v55, 5  ;;  %v360_v20 = vld [vmem:[%s3148_s20 + $0xb0] sm:$0x1] }
  0x4e   : > { %v3389_v60 = vcombine.low %v663_v40, %v673_v54  ;;  %v692_v62 = vrot.slane %v691_v50, 4  ;;  %v714_v8 = vrot.slane %v712_v59, 4  ;;  %v3394_v9 = vcombine.low %v355_v26, %v356_v30 }
  0x4f   : > { %v687_v6 = vsel %vm3183_vm2, %v682_v56, %v686_v35  ;;  %v718_v11 = vshll.u32 %v357_v47, 16  ;;  %v705_v16 = vor.u32 %v704_v63, %v701_v58  ;;  %v723_v17 = vshrl.u32 %v358_v48, 16  ;;  %v363_v58 = vld [vmem:[%s3148_s20 + $0xbc] sm:$0x1] }
  0x50   : > { %2812 = vmatmul.mubr.bf16.gmra.mrb[20].mxu0 %v3379_v36  ;;  %2716 = vmatmul.mubr.bf16.gmra.mrb[20].mxu1 %v3389_v60  ;;  %v697_v14 = vsel %vm3183_vm2, %v692_v62, %v696_v52  ;;  %v726_v18 = vshll.u32 %v358_v48, 16  ;;  %v715_v24 = vor.u32 %v714_v8, %v710_v3  ;;  %v732_v25 = vshll.u32 %v359_v5, 16  ;;  %v365_v8 = vld [vmem:[%s3413_s27 + $0x4] sm:$0xf] }
  0x51   : > { %v3402_v23 = vcombine.low %v687_v6, %v697_v14  ;;  %2815 = vmatprep.mubr.bf16.mxu0 %v3394_v9  ;;  %v720_v26 = vrot.slane %v718_v11, 5  ;;  %v706_v29 = vrot.slane %v705_v16, 4  ;;  %v725_v30 = vrot.slane %v723_v17, 4  ;;  %v364_v6 = vld [vmem:[%s3413_s27] sm:$0xf] }
  0x52   : > { %v728_v35 = vrot.slane %v726_v18, 5  ;;  %v736_v33 = vshrl.u32 %v359_v5, 16  ;;  %v716_v40 = vrot.slane %v715_v24, 4  ;;  %v734_v43 = vrot.slane %v732_v25, 5 }
  0x53   : > { %2719 = vmatprep.mubr.bf16.mxu1 %v3402_v23  ;;  %v3408_v44 = vcombine.low %v358_v48, %v359_v5  ;;  %v742_v46 = vshll.u32 %v360_v20, 16  ;;  %v711_v47 = vsel %vm3183_vm2, %v706_v29, %v710_v3  ;;  %v747_v53 = vshrl.u32 %v361_v28, 16 }
  0x54   : > { %v738_v50 = vrot.slane %v736_v33, 4  ;;  %v729_v52 = vor.u32 %v728_v35, %v725_v30  ;;  %v721_v55 = vsel %vm3183_vm2, %v716_v40, %v720_v26  ;;  %v750_v54 = vshll.u32 %v361_v28, 16 }
  0x55   : > { %v744_v48 = vrot.slane %v742_v46, 5  ;;  %v756_v56 = vshll.u32 %v362_v38, 16  ;;  %v2333_v59 = vcombine.low %v711_v47, %v721_v55  ;;  %v749_v5 = vrot.slane %v747_v53, 4 }
  0x56   : > { %v730_v62 = vrot.slane %v729_v52, 4  ;;  %v739_v63 = vor.u32 %v738_v50, %v734_v43  ;;  %v752_v11 = vrot.slane %v750_v54, 5  ;;  %v760_v14 = vshrl.u32 %v362_v38, 16 }
  0x57   : > { %v758_v3 = vrot.slane %v756_v56, 5  ;;  %v3423_v16 = vcombine.low %v361_v28, %v362_v38  ;;  %v766_v20 = vshll.u32 %v363_v58, 16  ;;  %v2384_v25 = vcombine.low %v364_v6, %v365_v8 }
  0x58   : > { %2816 = vmatmul.mubr.bf16.gmra.mrb[24].mxu0 %v3408_v44  ;;  %2720 = vmatmul.mubr.bf16.gmra.mrb[24].mxu1 %v2333_v59  ;;  %v735_v17 = vsel %vm3183_vm2, %v730_v62, %v734_v43  ;;  %v740_v18 = vrot.slane %v739_v63, 4  ;;  %v762_v24 = vrot.slane %v760_v14, 4  ;;  %v753_v26 = vor.u32 %v752_v11, %v749_v5 }
  0x59   : > { %2819 = vmatprep.mubr.bf16.mxu0 %v3423_v16  ;;  %v768_v40 = vrot.slane %v766_v20, 5  ;;  %v1630_v12 = vshrl.u32 %v364_v6, 16  ;;  %v1633_v13 = vshll.u32 %v364_v6, 16 }
  0x5a   : > { %v745_v29 = vsel %vm3183_vm2, %v740_v18, %v744_v48  ;;  %v754_v35 = vrot.slane %v753_v26, 4  ;;  %v763_v33 = vor.u32 %v762_v24, %v758_v3 }
  0x5b   : > { %v2334_v30 = vcombine.low %v735_v17, %v745_v29 }
  0x5c   : > { %v759_v28 = vsel %vm3183_vm2, %v754_v35, %v758_v3  ;;  %v764_v38 = vrot.slane %v763_v33, 4 }
  0x5d   : > { %2723 = vmatprep.mubr.bf16.mxu1 %v2334_v30 }
  0x5e   : > { %v769_v43 = vsel %vm3183_vm2, %v764_v38, %v768_v40 }
  0x5f   : > { %v2335_v46 = vcombine.low %v759_v28, %v769_v43 }
  0x60   : > { %2820 = vmatmul.mubr.bf16.gmra.mrb[28].mxu0 %v2384_v25 }
  0x61   : > { %2839 = vmatprep.mubr.bf16.mxu0 %v3215_v19  ;;  %2724 = vmatmul.mubr.bf16.gmra.mrb[28].mxu1 %v2335_v46  ;;  %v1635_v19 = vrot.slane %v1633_v13, 5 }
  0x62   : > { %2743 = vmatprep.mubr.bf16.mxu1 %v2344_v22  ;;  %v1639_v22 = vshll.u32 %v365_v8, 16 }
  0x68   : > { %2840 = vmatmul.mubr.bf16.vlgmr.msra.gmra.mrb[0].mxu0 %v3236_v49 }
  0x69   : > { %2843 = vmatprep.mubr.bf16.mxu0 %v3254_v1  ;;  %2744 = vmatmul.mubr.bf16.vlgmr.msra.gmra.mrb[0].mxu1 %v3187_v42  ;;  %v1643_v42 = vshrl.u32 %v365_v8, 16 }
  0x6a   : > { %2747 = vmatprep.mubr.bf16.mxu1 %v3203_v4  ;;  %v1632_v4 = vrot.slane %v1630_v12, 4 }
  0x6b   : > { %v1645_v49 = vrot.slane %v1643_v42, 4 }
  0x6c   : > { %v1636_v1 = vor.u32 %v1635_v19, %v1632_v4 }
  0x70   : > { %2844 = vmatmul.mubr.bf16.gmra.mrb[4].mxu0 %v3273_v31 }
  0x71   : > { %2847 = vmatprep.mubr.bf16.mxu0 %v3292_v61  ;;  %2748 = vmatmul.mubr.bf16.gmra.mrb[4].mxu1 %v3221_v32  ;;  %v1641_v32 = vrot.slane %v1639_v22, 5 }
  0x72   : > { %2751 = vmatprep.mubr.bf16.mxu1 %v3242_v57  ;;  %v366_v57 = vld [vmem:[%s3413_s27 + $0x8] sm:$0x1] }
  0x73   : > { %v1649_v31 = vshll.u32 %v366_v57, 16 }
  0x78   : > { %2848 = vmatmul.mubr.bf16.gmra.mrb[8].mxu0 %v3319_v34 }
  0x79   : > { %2851 = vmatprep.mubr.bf16.mxu0 %v3334_v0  ;;  %2752 = vmatmul.mubr.bf16.gmra.mrb[8].mxu1 %v3256_v15  ;;  %v1646_v15 = vor.u32 %v1645_v49, %v1641_v32 }
  0x7a   : > { %2755 = vmatprep.mubr.bf16.mxu1 %v3281_v45  ;;  %v1637_v45 = vrot.slane %v1636_v1, 4 }
  0x7b   : > { %v1647_v61 = vrot.slane %v1646_v15, 4 }
  0x7c   : > { %v1642_v34 = vsel %vm3183_vm2, %v1637_v45, %v1641_v32 }
  0x80   : > { %2852 = vmatmul.mubr.bf16.gmra.mrb[12].mxu0 %v3348_v21 }
  0x81   : > { %2855 = vmatprep.mubr.bf16.mxu0 %v3362_v51  ;;  %2756 = vmatmul.mubr.bf16.gmra.mrb[12].mxu1 %v3298_v7  ;;  %v1651_v7 = vrot.slane %v1649_v31, 5 }
  0x82   : > { %2759 = vmatprep.mubr.bf16.mxu1 %v3321_v41 }
  0x83   : > { %v1652_v41 = vsel %vm3183_vm2, %v1647_v61, %v1651_v7 }
  0x84   : > { %v2409_v0 = vcombine.low %v1642_v34, %v1652_v41 }
  0x88   : > { %2856 = vmatmul.mubr.bf16.gmra.mrb[16].mxu0 %v3376_v27  ;;  %v3472_v27 = vld [vmem:[%s3540_s3] ss:$0 sm:$0xff] }
  0x89   : > { %2859 = vmatprep.mubr.bf16.mxu0 %v3389_v60  ;;  %2760 = vmatmul.mubr.bf16.gmra.mrb[16].mxu1 %v3342_v10 }
  0x8a   : > { %2763 = vmatprep.mubr.bf16.mxu1 %v3354_v37 }
  0x90   : > { %2860 = vmatmul.mubr.bf16.gmra.mrb[20].mxu0 %v3402_v23 }
  0x91   : > { %2863 = vmatprep.mubr.bf16.mxu0 %v2333_v59  ;;  %2764 = vmatmul.mubr.bf16.gmra.mrb[20].mxu1 %v3366_v2 }
  0x92   : > { %2767 = vmatprep.mubr.bf16.mxu1 %v3379_v36 }
  0x98   : > { %2864 = vmatmul.mubr.bf16.gmra.mrb[24].mxu0 %v2334_v30 }
  0x99   : > { %2867 = vmatprep.mubr.bf16.mxu0 %v2335_v46  ;;  %2768 = vmatmul.mubr.bf16.gmra.mrb[24].mxu1 %v3394_v9 }
  0x9a   : > { %2771 = vmatprep.mubr.bf16.mxu1 %v3408_v44 }
  0xa0   : > { %2868 = vmatmul.mubr.bf16.gmra.mrb[28].mxu0 %v2409_v0 }
  0xa1   : > { %2772 = vmatmul.mubr.bf16.gmra.mrb[28].mxu1 %v3423_v16 }
 0x13b   : > { %v2841_v10 = vpop.f32.mrb[0].mxu0 }
 0x13c   : > { %v1756_v21 = vpop.f32.mrb[1].mxu0  ;;  %v2745_v2 = vpop.f32.mrb[0].mxu1 }
 0x13d   : > { %v2842_v37 = vpop.f32.mrb[2].mxu0  ;;  %v2871_v39 = vadd.f32 %v2841_v10, %v2745_v2  ;;  %v1238_v36 = vpop.f32.mrb[1].mxu1 }
 0x13e   : > { %v1759_v51 = vpop.f32.mrb[3].mxu0  ;;  %v2872_v60 = vadd.f32 %v1756_v21, %v1238_v36  ;;  %v2746_v9 = vpop.f32.mrb[2].mxu1 }
 0x13f   : > { %v1924_v23 = vadd.f32 %v2871_v39, %v3472_v27  ;;  %v2873_v44 = vadd.f32 %v2842_v37, %v2746_v9  ;;  %v1241_v47 = vpop.f32.mrb[3].mxu1 }
 0x140   : > { %v1922_v52 = vadd.f32 %v2872_v60, %v3472_v27  ;;  %v2874_v53 = vadd.f32 %v1759_v51, %v1241_v47 }
 0x141   : > { %v1956_v48 = vmul.f32 0.2, %v1924_v23  ;;  %v1925_v54 = vadd.f32 %v2873_v44, %v3472_v27 }
 0x142   : > { %v1954_v58 = vmul.f32 0.2, %v1922_v52  ;;  %v1923_v59 = vadd.f32 %v2874_v53, %v3472_v27 }
 0x143   : > { %v2845_v50 = vpop.f32.mrb[4].mxu0  ;;  %v1957_v63 = vmul.f32 0.2, %v1925_v54  ;;  %v1988_v8 = vmax.f32 %v1924_v23, %v1956_v48 }
 0x144   : > { %v1772_v55 = vpop.f32.mrb[5].mxu0  ;;  %v1955_v5 = vmul.f32 0.2, %v1923_v59  ;;  %v2749_v6 = vpop.f32.mrb[4].mxu1  ;;  %v1986_v16 = vmax.f32 %v1922_v52, %v1954_v58 }
 0x145   : > { %v2846_v56 = vpop.f32.mrb[6].mxu0  ;;  %v1989_v11 = vmax.f32 %v1925_v54, %v1957_v63  ;;  %v2875_v3 = vadd.f32 %v2845_v50, %v2749_v6  ;;  %v1254_v14 = vpop.f32.mrb[5].mxu1 }
 0x146   : > { %v1775_v62 = vpop.f32.mrb[7].mxu0  ;;  %v1987_v17 = vmax.f32 %v1923_v59, %v1955_v5  ;;  %v2876_v18 = vadd.f32 %v1772_v55, %v1254_v14  ;;  %v2750_v20 = vpop.f32.mrb[6].mxu1 }
 0x147   : > { %v2496_v24 = vpack.c.bf16 %v1989_v11, %v1988_v8  ;;  %v1928_v26 = vadd.f32 %v2875_v3, %v3472_v27  ;;  %v2877_v25 = vadd.f32 %v2846_v56, %v2750_v20  ;;  %v1257_v29 = vpop.f32.mrb[7].mxu1 }
 0x148   : > { %v2491_v35 = vpack.c.bf16 %v1987_v17, %v1986_v16  ;;  %v1926_v33 = vadd.f32 %v2876_v18, %v3472_v27  ;;  %v2878_v40 = vadd.f32 %v1775_v62, %v1257_v29 }
 0x149   : > { %2568 = vst [vmem:[%s3482_s6 + $0x8] sm:$0xff] %v2496_v24   ;;  %v1960_v38 = vmul.f32 0.2, %v1928_v26  ;;  %v1929_v43 = vadd.f32 %v2877_v25, %v3472_v27 }
 0x14a   : > { %2492 = vst [vmem:[%s3482_s6] sm:$0xff] %v2491_v35   ;;  %v1958_v12 = vmul.f32 0.2, %v1926_v33  ;;  %v1927_v13 = vadd.f32 %v2878_v40, %v3472_v27 }
 0x14b   : > { %v2849_v30 = vpop.f32.mrb[8].mxu0  ;;  %v1961_v42 = vmul.f32 0.2, %v1929_v43  ;;  %v1992_v32 = vmax.f32 %v1928_v26, %v1960_v38 }
 0x14c   : > { %v1788_v28 = vpop.f32.mrb[9].mxu0  ;;  %v1959_v4 = vmul.f32 0.2, %v1927_v13  ;;  %v2753_v19 = vpop.f32.mrb[8].mxu1  ;;  %v1990_v15 = vmax.f32 %v1926_v33, %v1958_v12 }
 0x14d   : > { %v2850_v46 = vpop.f32.mrb[10].mxu0  ;;  %v1993_v49 = vmax.f32 %v1929_v43, %v1961_v42  ;;  %v2879_v57 = vadd.f32 %v2849_v30, %v2753_v19  ;;  %v1270_v1 = vpop.f32.mrb[9].mxu1 }
 0x14e   : > { %v1791_v22 = vpop.f32.mrb[11].mxu0  ;;  %v1991_v31 = vmax.f32 %v1927_v13, %v1959_v4  ;;  %v2880_v45 = vadd.f32 %v1788_v28, %v1270_v1  ;;  %v2754_v61 = vpop.f32.mrb[10].mxu1 }
 0x14f   : > { %v2506_v7 = vpack.c.bf16 %v1993_v49, %v1992_v32  ;;  %v1932_v34 = vadd.f32 %v2879_v57, %v3472_v27  ;;  %v2881_v41 = vadd.f32 %v2850_v46, %v2754_v61  ;;  %v1273_v0 = vpop.f32.mrb[11].mxu1 }
 0x150   : > { %v2501_v21 = vpack.c.bf16 %v1991_v31, %v1990_v15  ;;  %v1930_v37 = vadd.f32 %v2880_v45, %v3472_v27  ;;  %v2882_v51 = vadd.f32 %v1791_v22, %v1273_v0 }
 0x151   : > { %2570 = vst [vmem:[%s3482_s6 + $0x18] sm:$0xff] %v2506_v7   ;;  %v1964_v39 = vmul.f32 0.2, %v1932_v34  ;;  %v1933_v36 = vadd.f32 %v2881_v41, %v3472_v27 }
 0x152   : > { %2569 = vst [vmem:[%s3482_s6 + $0x10] sm:$0xff] %v2501_v21   ;;  %v1962_v9 = vmul.f32 0.2, %v1930_v37  ;;  %v1931_v23 = vadd.f32 %v2882_v51, %v3472_v27 }
 0x153   : > { %v2853_v10 = vpop.f32.mrb[12].mxu0  ;;  %v1965_v47 = vmul.f32 0.2, %v1933_v36  ;;  %v1996_v53 = vmax.f32 %v1932_v34, %v1964_v39 }
 0x154   : > { %v1804_v2 = vpop.f32.mrb[13].mxu0  ;;  %v1963_v50 = vmul.f32 0.2, %v1931_v23  ;;  %v2757_v52 = vpop.f32.mrb[12].mxu1  ;;  %v1994_v56 = vmax.f32 %v1930_v37, %v1962_v9 }
 0x155   : > { %v2854_v60 = vpop.f32.mrb[14].mxu0  ;;  %v1997_v55 = vmax.f32 %v1933_v36, %v1965_v47  ;;  %v2883_v48 = vadd.f32 %v2853_v10, %v2757_v52  ;;  %v1286_v54 = vpop.f32.mrb[13].mxu1 }
 0x156   : > { %v1807_v44 = vpop.f32.mrb[15].mxu0  ;;  %v1995_v58 = vmax.f32 %v1931_v23, %v1963_v50  ;;  %v2884_v59 = vadd.f32 %v1804_v2, %v1286_v54  ;;  %v2758_v62 = vpop.f32.mrb[14].mxu1 }
 0x157   : > { %v2516_v63 = vpack.c.bf16 %v1997_v55, %v1996_v53  ;;  %v1936_v5 = vadd.f32 %v2883_v48, %v3472_v27  ;;  %v2885_v6 = vadd.f32 %v2854_v60, %v2758_v62  ;;  %v1289_v8 = vpop.f32.mrb[15].mxu1 }
 0x158   : > { %v2511_v3 = vpack.c.bf16 %v1995_v58, %v1994_v56  ;;  %v1934_v14 = vadd.f32 %v2884_v59, %v3472_v27  ;;  %v2886_v16 = vadd.f32 %v1807_v44, %v1289_v8 }
 0x159   : > { %2572 = vst [vmem:[%s3482_s6 + $0x28] sm:$0xff] %v2516_v63   ;;  %v1968_v18 = vmul.f32 0.2, %v1936_v5  ;;  %v1937_v20 = vadd.f32 %v2885_v6, %v3472_v27 }
 0x15a   : > { %2571 = vst [vmem:[%s3482_s6 + $0x20] sm:$0xff] %v2511_v3   ;;  %v1966_v26 = vmul.f32 0.2, %v1934_v14  ;;  %v1935_v25 = vadd.f32 %v2886_v16, %v3472_v27 }
 0x15b   : > { %v2857_v11 = vpop.f32.mrb[16].mxu0  ;;  %v1969_v30 = vmul.f32 0.2, %v1937_v20  ;;  %v2000_v40 = vmax.f32 %v1936_v5, %v1968_v18 }
 0x15c   : > { %v1820_v17 = vpop.f32.mrb[17].mxu0  ;;  %v1967_v35 = vmul.f32 0.2, %v1935_v25  ;;  %v2761_v33 = vpop.f32.mrb[16].mxu1  ;;  %v1998_v46 = vmax.f32 %v1934_v14, %v1966_v26 }
 0x15d   : > { %v2858_v24 = vpop.f32.mrb[18].mxu0  ;;  %v2001_v28 = vmax.f32 %v1937_v20, %v1969_v30  ;;  %v2887_v38 = vadd.f32 %v2857_v11, %v2761_v33  ;;  %v1302_v43 = vpop.f32.mrb[17].mxu1 }
 0x15e   : > { %v1823_v29 = vpop.f32.mrb[19].mxu0  ;;  %v1999_v12 = vmax.f32 %v1935_v25, %v1967_v35  ;;  %v2888_v13 = vadd.f32 %v1820_v17, %v1302_v43  ;;  %v2762_v22 = vpop.f32.mrb[18].mxu1 }
 0x15f   : > { %v2526_v42 = vpack.c.bf16 %v2001_v28, %v2000_v40  ;;  %v1940_v4 = vadd.f32 %v2887_v38, %v3472_v27  ;;  %v2889_v19 = vadd.f32 %v2858_v24, %v2762_v22  ;;  %v1305_v32 = vpop.f32.mrb[19].mxu1 }
 0x160   : > { %v2521_v57 = vpack.c.bf16 %v1999_v12, %v1998_v46  ;;  %v1938_v1 = vadd.f32 %v2888_v13, %v3472_v27  ;;  %v2890_v15 = vadd.f32 %v1823_v29, %v1305_v32 }
 0x161   : > { %2574 = vst [vmem:[%s3482_s6 + $0x38] sm:$0xff] %v2526_v42   ;;  %v1972_v45 = vmul.f32 0.2, %v1940_v4  ;;  %v1941_v61 = vadd.f32 %v2889_v19, %v3472_v27 }
 0x162   : > { %2573 = vst [vmem:[%s3482_s6 + $0x30] sm:$0xff] %v2521_v57   ;;  %v1970_v34 = vmul.f32 0.2, %v1938_v1  ;;  %v1939_v41 = vadd.f32 %v2890_v15, %v3472_v27 }
 0x163   : > { %v2861_v49 = vpop.f32.mrb[20].mxu0  ;;  %v1973_v10 = vmul.f32 0.2, %v1941_v61  ;;  %v2004_v51 = vmax.f32 %v1940_v4, %v1972_v45 }
 0x164   : > { %v1836_v31 = vpop.f32.mrb[21].mxu0  ;;  %v1971_v21 = vmul.f32 0.2, %v1939_v41  ;;  %v2765_v37 = vpop.f32.mrb[20].mxu1  ;;  %v2002_v60 = vmax.f32 %v1938_v1, %v1970_v34 }
 0x165   : > { %v2862_v7 = vpop.f32.mrb[22].mxu0  ;;  %v2005_v2 = vmax.f32 %v1941_v61, %v1973_v10  ;;  %v2891_v39 = vadd.f32 %v2861_v49, %v2765_v37  ;;  %v1318_v36 = vpop.f32.mrb[21].mxu1 }
 0x166   : > { %v1839_v0 = vpop.f32.mrb[23].mxu0  ;;  %v2003_v9 = vmax.f32 %v1939_v41, %v1971_v21  ;;  %v2892_v23 = vadd.f32 %v1836_v31, %v1318_v36  ;;  %v2766_v44 = vpop.f32.mrb[22].mxu1 }
 0x167   : > { %v2536_v47 = vpack.c.bf16 %v2005_v2, %v2004_v51  ;;  %v1944_v50 = vadd.f32 %v2891_v39, %v3472_v27  ;;  %v2893_v52 = vadd.f32 %v2862_v7, %v2766_v44  ;;  %v1321_v53 = vpop.f32.mrb[23].mxu1 }
 0x168   : > { %v2531_v48 = vpack.c.bf16 %v2003_v9, %v2002_v60  ;;  %v1942_v54 = vadd.f32 %v2892_v23, %v3472_v27  ;;  %v2894_v56 = vadd.f32 %v1839_v0, %v1321_v53 }
 0x169   : > { %2576 = vst [vmem:[%s3482_s6 + $0x48] sm:$0xff] %v2536_v47   ;;  %v1976_v59 = vmul.f32 0.2, %v1944_v50  ;;  %v1945_v62 = vadd.f32 %v2893_v52, %v3472_v27 }
 0x16a   : > { %2575 = vst [vmem:[%s3482_s6 + $0x40] sm:$0xff] %v2531_v48   ;;  %v1974_v5 = vmul.f32 0.2, %v1942_v54  ;;  %v1943_v6 = vadd.f32 %v2894_v56, %v3472_v27 }
 0x16b   : > { %v2865_v55 = vpop.f32.mrb[24].mxu0  ;;  %v1977_v11 = vmul.f32 0.2, %v1945_v62  ;;  %v2008_v16 = vmax.f32 %v1944_v50, %v1976_v59 }
 0x16c   : > { %v1852_v58 = vpop.f32.mrb[25].mxu0  ;;  %v1975_v3 = vmul.f32 0.2, %v1943_v6  ;;  %v2769_v14 = vpop.f32.mrb[24].mxu1  ;;  %v2006_v24 = vmax.f32 %v1942_v54, %v1974_v5 }
 0x16d   : > { %v2866_v63 = vpop.f32.mrb[26].mxu0  ;;  %v2009_v17 = vmax.f32 %v1945_v62, %v1977_v11  ;;  %v2895_v18 = vadd.f32 %v2865_v55, %v2769_v14  ;;  %v1334_v20 = vpop.f32.mrb[25].mxu1 }
 0x16e   : > { %v1855_v8 = vpop.f32.mrb[27].mxu0  ;;  %v2007_v26 = vmax.f32 %v1943_v6, %v1975_v3  ;;  %v2896_v25 = vadd.f32 %v1852_v58, %v1334_v20  ;;  %v2770_v29 = vpop.f32.mrb[26].mxu1 }
 0x16f   : > { %v2546_v30 = vpack.c.bf16 %v2009_v17, %v2008_v16  ;;  %v1948_v35 = vadd.f32 %v2895_v18, %v3472_v27  ;;  %v2897_v33 = vadd.f32 %v2866_v63, %v2770_v29  ;;  %v1337_v40 = vpop.f32.mrb[27].mxu1 }
 0x170   : > { %v2541_v38 = vpack.c.bf16 %v2007_v26, %v2006_v24  ;;  %v1946_v43 = vadd.f32 %v2896_v25, %v3472_v27  ;;  %v2898_v46 = vadd.f32 %v1855_v8, %v1337_v40 }
 0x171   : > { %2578 = vst [vmem:[%s3482_s6 + $0x58] sm:$0xff] %v2546_v30   ;;  %v1980_v13 = vmul.f32 0.2, %v1948_v35  ;;  %v1949_v22 = vadd.f32 %v2897_v33, %v3472_v27 }
 0x172   : > { %2577 = vst [vmem:[%s3482_s6 + $0x50] sm:$0xff] %v2541_v38   ;;  %v1978_v4 = vmul.f32 0.2, %v1946_v43  ;;  %v1947_v19 = vadd.f32 %v2898_v46, %v3472_v27 }
 0x173   : > { %v2869_v28 = vpop.f32.mrb[28].mxu0  ;;  %v1981_v49 = vmul.f32 0.2, %v1949_v22  ;;  %v2012_v15 = vmax.f32 %v1948_v35, %v1980_v13 }
 0x174   : > { %v1868_v12 = vpop.f32.mrb[29].mxu0  ;;  %v1979_v57 = vmul.f32 0.2, %v1947_v19  ;;  %v2773_v1 = vpop.f32.mrb[28].mxu1  ;;  %v2010_v7 = vmax.f32 %v1946_v43, %v1978_v4 }
 0x175   : > { %v2870_v42 = vpop.f32.mrb[30].mxu0  ;;  %v2013_v31 = vmax.f32 %v1949_v22, %v1981_v49  ;;  %v2899_v45 = vadd.f32 %v2869_v28, %v2773_v1  ;;  %v1350_v61 = vpop.f32.mrb[29].mxu1 }
 0x176   : > { %v1871_v32 = vpop.f32.mrb[31].mxu0  ;;  %v2011_v34 = vmax.f32 %v1947_v19, %v1979_v57  ;;  %v2900_v41 = vadd.f32 %v1868_v12, %v1350_v61  ;;  %v2774_v0 = vpop.f32.mrb[30].mxu1 }
 0x177   : > { %v2556_v10 = vpack.c.bf16 %v2013_v31, %v2012_v15  ;;  %v1952_v21 = vadd.f32 %v2899_v45, %v3472_v27  ;;  %v2901_v37 = vadd.f32 %v2870_v42, %v2774_v0  ;;  %v1353_v51 = vpop.f32.mrb[31].mxu1 }
 0x178   : > { %v2551_v2 = vpack.c.bf16 %v2011_v34, %v2010_v7  ;;  %v1950_v39 = vadd.f32 %v2900_v41, %v3472_v27  ;;  %v2902_v36 = vadd.f32 %v1871_v32, %v1353_v51 }
 0x179   : > { %2580 = vst [vmem:[%s3482_s6 + $0x68] sm:$0xff] %v2556_v10   ;;  %v1984_v60 = vmul.f32 0.2, %v1952_v21  ;;  %v1953_v9 = vadd.f32 %v2901_v37, %v3472_v27 }
 0x17a   : > { %2579 = vst [vmem:[%s3482_s6 + $0x60] sm:$0xff] %v2551_v2   ;;  %v1982_v23 = vmul.f32 0.2, %v1950_v39  ;;  %v1951_v44 = vadd.f32 %v2902_v36, %v3472_v27 }
 0x17b   : > { %v1985_v47 = vmul.f32 0.2, %v1953_v9  ;;  %v2016_v52 = vmax.f32 %v1952_v21, %v1984_v60 }
 0x17c   : > { %v1983_v50 = vmul.f32 0.2, %v1951_v44  ;;  %v2014_v55 = vmax.f32 %v1950_v39, %v1982_v23 }
 0x17d   : > { %v2017_v53 = vmax.f32 %v1953_v9, %v1985_v47 }
 0x17e   : > { %v2015_v48 = vmax.f32 %v1951_v44, %v1983_v50 }
 0x17f   : > { %v2566_v54 = vpack.c.bf16 %v2017_v53, %v2016_v52 }
 0x180   : > { %v2561_v56 = vpack.c.bf16 %v2015_v48, %v2014_v55 }
 0x181   : > { %2582 = vst [vmem:[%s3482_s6 + $0x78] sm:$0xff] %v2566_v54  }
 0x182   : > { %2581 = vst [vmem:[%s3482_s6 + $0x70] sm:$0xff] %v2561_v56  }
 0x183 PF: > { %s14_s17 = sadd.s32 1, %s3065_s17   ;;  %s3544_s15 = smov %s3061_s16 }
 0x184   : > { %p11_p5 = scmp.ge.s32.totalorder %s14_s17, 4   ;;  %s3545_s16 = smov %s3547_s18 }
 0x186   :  { %13 = sbr.rel (!%p11_p5) target bundleno = 2 (0x2), region = 72 }

// kernel: fc_discriminator_forward.6
= control target key start
LH: loop header
LB: loop body
LE: loop exit
PB: predicated region body
PF: predicated region fallthrough
CT: control target
= control target key end

     0   :  { %s3495_s15 = smov 0   ;;  %s3497_s16 = smov 0   ;;  %s4346_s0 = inlined_call_operand.vmem [shape: bf16[2,9,9,512], index: 0, kind: input, shape index: {}, may-alias: {0,1}]   ;;  %s4347_s1 = inlined_call_operand.vmem [shape: bf16[2,9,9,512], index: 1, kind: input, shape index: {}, may-alias: {0,1}]   ;;  %s4348_s2 = inlined_call_operand.vmem [shape: bf16[4,512,128], index: 2, kind: input, shape index: {}]   ;;  %s4349_s3 = inlined_call_operand.vmem [shape: f32[1,128], index: 3, kind: input, shape index: {}]   ;;  %s4350_s4 = inlined_call_operand.vmem [shape: bf16[2,8,8,128], index: 4, kind: output, shape index: {}]  }
   0x1   :  { %s3499_s17 = smov 0  }
   0x2 LB: > { %s26_s18 = sadd.s32 1, %s3464_s16  ;;  %p2553_p0 = scmp.ge.s32.totalorder %s3468_s17, 1  ;;  %s3468_s17 = sphi %s3499_s17, %s14_s17   ;;  %s3464_s16 = sphi %s3497_s16, %s4356_s16   ;;  %s3460_s15 = sphi %s3495_s15, %s4355_s15  }
   0x3   : > { %p28_p1 = scmp.ge.s32.totalorder %s26_s18, 2  ;;  %p220_p2 = scmp.lt.s32.totalorder %s3468_s17, 3 }
   0x5   : > { %s4358_s18 = smov (%p28_p1, %s26_s18), 0  ;;  %p221_p3 = pnand %p2553_p0, %p220_p2 }
   0x6   : > { %v3318_v0 = vld [vmem:[%s4348_s2 + $0x140] sm:$0xff] (!%p221_p3)   ;;  %p279_p4 = scmp.lt.s32.totalorder (!%p221_p3), %s3460_s15, 1  ;;  %v3322_v4 = vld [vmem:[%s4348_s2 + $0x148] sm:$0xff] (!%p221_p3)   ;;  %v3326_v8 = vld [vmem:[%s4348_s2 + $0x150] sm:$0xff] (!%p221_p3)   ;;  %vm419_vm0 = vsmask.f32 (!%p221_p3), 3328 }
   0x7   : > { %224 = sbr.rel (%p221_p3) target bundleno = 402 (0x192), region = 36  ;;  %v3319_v1 = vld [vmem:[%s4348_s2 + $0x1c0] sm:$0xff] (!%p221_p3)   ;;  %2971 = vmatprep.subr.bf16.mxu0 (!%p221_p3), %v3318_v0  ;;  %v3323_v5 = vld [vmem:[%s4348_s2 + $0x1c8] sm:$0xff] (!%p221_p3)   ;;  %v3327_v9 = vld [vmem:[%s4348_s2 + $0x1d0] sm:$0xff] (!%p221_p3)   ;;  %vm420_vm1 = vsmask.f32 (!%p221_p3), 7440 }
   0x8   : > { %v3320_v2 = vld [vmem:[%s4348_s2 + $0x100] sm:$0xff] (!%p221_p3)   ;;  %3011 = vmatprep.subr.bf16.mxu1 (!%p221_p3), %v3319_v1  ;;  %v3324_v6 = vld [vmem:[%s4348_s2 + $0x108] sm:$0xff] (!%p221_p3)   ;;  %v3328_v10 = vld [vmem:[%s4348_s2 + $0x110] sm:$0xff] (!%p221_p3)  }
   0x9   : > { %v3321_v3 = vld [vmem:[%s4348_s2 + $0x180] sm:$0xff] (!%p221_p3)   ;;  %2972 = vmatpush3.bf16.msra.mxu0 (!%p221_p3), %v3320_v2  ;;  %v3325_v7 = vld [vmem:[%s4348_s2 + $0x188] sm:$0xff] (!%p221_p3)   ;;  %v3329_v11 = vld [vmem:[%s4348_s2 + $0x190] sm:$0xff] (!%p221_p3)  }
   0xa   : > { %3012 = vmatpush3.bf16.msra.mxu1 (!%p221_p3), %v3321_v3  ;;  %2973 = vmatprep.subr.bf16.mxu0 (!%p221_p3), %v3322_v4  ;;  %v3330_v12 = vld [vmem:[%s4348_s2 + $0x158] sm:$0xff] (!%p221_p3)   ;;  %v3334_v16 = vld [vmem:[%s4348_s2 + $0x160] sm:$0xff] (!%p221_p3)   ;;  %v3338_v20 = vld [vmem:[%s4348_s2 + $0x168] sm:$0xff] (!%p221_p3)  }
   0xb   : > { %3013 = vmatprep.subr.bf16.mxu1 (!%p221_p3), %v3323_v5  ;;  %v3331_v13 = vld [vmem:[%s4348_s2 + $0x1d8] sm:$0xff] (!%p221_p3)   ;;  %v3335_v17 = vld [vmem:[%s4348_s2 + $0x1e0] sm:$0xff] (!%p221_p3)   ;;  %v3339_v21 = vld [vmem:[%s4348_s2 + $0x1e8] sm:$0xff] (!%p221_p3)  }
   0xc   : > { %v3332_v14 = vld [vmem:[%s4348_s2 + $0x118] sm:$0xff] (!%p221_p3)   ;;  %v3336_v18 = vld [vmem:[%s4348_s2 + $0x120] sm:$0xff] (!%p221_p3)   ;;  %v3340_v22 = vld [vmem:[%s4348_s2 + $0x128] sm:$0xff] (!%p221_p3)  }
   0xd   : > { %2974 = vmatpush3.bf16.msra.mxu0 (!%p221_p3), %v3324_v6  ;;  %v3333_v15 = vld [vmem:[%s4348_s2 + $0x198] sm:$0xff] (!%p221_p3)   ;;  %v3337_v19 = vld [vmem:[%s4348_s2 + $0x1a0] sm:$0xff] (!%p221_p3)   ;;  %v3341_v23 = vld [vmem:[%s4348_s2 + $0x1a8] sm:$0xff] (!%p221_p3)  }
   0xe   : > { %s4360_s15 = smov (!%p279_p4, %s3460_s15), 1  ;;  %3014 = vmatpush3.bf16.msra.mxu1 %v3325_v7  ;;  %2975 = vmatprep.subr.bf16.mxu0 %v3326_v8  ;;  %v3342_v24 = vld [vmem:[%s4348_s2 + $0x170] sm:$0xff]   ;;  %v3346_v28 = vld [vmem:[%s4348_s2 + $0x178] sm:$0xff]   ;;  %v3350_v62 = vld [vmem:[%s4348_s2 + $0x40] sm:$0xff]  }
   0xf   : > { %3015 = vmatprep.subr.bf16.mxu1 %v3327_v9  ;;  %v3343_v25 = vld [vmem:[%s4348_s2 + $0x1f0] sm:$0xff]   ;;  %s3291_s27 = smul.u32 288, %s4360_s15  ;;  %v3347_v29 = vld [vmem:[%s4348_s2 + $0x1f8] sm:$0xff]   ;;  %vm3652_vm2 = vmor %vm419_vm0, %vm420_vm1  ;;  %s2947_s5 = sshll.u32 %s4360_s15, 5 }
  0x10   : > { %v3344_v26 = vld [vmem:[%s4348_s2 + $0x130] sm:$0xff]   ;;  %v3348_v30 = vld [vmem:[%s4348_s2 + $0x138] sm:$0xff]   ;;  %v3351_v4 = vld [vmem:[%s4348_s2 + $0xc0] sm:$0xff]   ;;  %s4320_s7 = scalar_lea.vmem %s4350_s4, %s2947_s5 }
  0x11   : > { %2976 = vmatpush3.bf16.msra.mxu0 %v3328_v10  ;;  %v3345_v27 = vld [vmem:[%s4348_s2 + $0x1b0] sm:$0xff]   ;;  %s3611_s12 = scalar_lea.vmem %s4346_s0, %s3291_s27  ;;  %v3349_v31 = vld [vmem:[%s4348_s2 + $0x1b8] sm:$0xff]   ;;  %s2946_s8 = sadd.s32 256, %s3291_s27 }
  0x12   : > { %3016 = vmatpush3.bf16.msra.mxu1 %v3329_v11  ;;  %2977 = vmatprep.subr.bf16.mxu0 %v3330_v12  ;;  %v3620_v32 = vld [vmem:[%s3611_s12] sm:$0xff]  ;;  %v321_v33 = vld [vmem:[%s3611_s12 + $0x10] sm:$0x11]  ;;  %v3635_v42 = vld [vmem:[%s3611_s12 + $0x8] sm:$0xff]  ;;  %s4167_s23 = scalar_lea.vmem %s4347_s1, %s2946_s8 }
  0x13   : > { %3017 = vmatprep.subr.bf16.mxu1 %v3331_v13  ;;  %v3624_v34 = vld [vmem:[%s3611_s12 + $0x20] sm:$0xff]  ;;  %v325_v35 = vld [vmem:[%s3611_s12 + $0x30] sm:$0x11]  ;;  %v423_v38 = vshrl.u32 %v3620_v32, 16  ;;  %v426_v39 = vshll.u32 %v3620_v32, 16  ;;  %v432_v40 = vshll.u32 %v321_v33, 16 }
  0x14   : > { %v3628_v36 = vld [vmem:[%s3611_s12 + $0x40] sm:$0xff]  ;;  %v329_v37 = vld [vmem:[%s3611_s12 + $0x50] sm:$0x11]  ;;  %v451_v41 = vshrl.u32 %v3624_v34, 16  ;;  %v454_v44 = vshll.u32 %v3624_v34, 16  ;;  %v460_v45 = vshll.u32 %v325_v35, 16 }
  0x15   : > { %2978 = vmatpush3.bf16.msra.mxu0 %v3332_v14  ;;  %v425_v43 = vrot.slane %v423_v38, 4  ;;  %v479_v46 = vshrl.u32 %v3628_v36, 16  ;;  %v322_v47 = vld [vmem:[%s3611_s12 + $0x18] sm:$0x11]  ;;  %v428_v48 = vrot.slane %v426_v39, 5  ;;  %v434_v49 = vrot.slane %v432_v40, 5 }
  0x16   : > { %3018 = vmatpush3.bf16.msra.mxu1 %v3333_v15  ;;  %2979 = vmatprep.subr.bf16.mxu0 %v3334_v16  ;;  %v453_v50 = vrot.slane %v451_v41, 4  ;;  %v482_v51 = vshll.u32 %v3628_v36, 16  ;;  %v3642_v52 = vld [vmem:[%s3611_s12 + $0x28] sm:$0xff]  ;;  %v456_v53 = vrot.slane %v454_v44, 5  ;;  %v462_v54 = vrot.slane %v460_v45, 5  ;;  %v3353_v45 = vld [vmem:[%s4348_s2 + $0x80] sm:$0xff]  }
  0x17   : > { %3019 = vmatprep.subr.bf16.mxu1 %v3335_v17  ;;  %v481_v55 = vrot.slane %v479_v46, 4  ;;  %v488_v56 = vshll.u32 %v329_v37, 16  ;;  %v429_v57 = vor.u32 %v428_v48, %v425_v43  ;;  %v326_v59 = vld [vmem:[%s3611_s12 + $0x38] sm:$0x11]  ;;  %v437_v60 = vshrl.u32 %v3635_v42, 16  ;;  %v3661_v7 = vld [vmem:[%s3611_s12 + $0x48] sm:$0xff] }
  0x18   : > { %v484_v58 = vrot.slane %v482_v51, 5  ;;  %v440_v61 = vshll.u32 %v3635_v42, 16  ;;  %v457_v0 = vor.u32 %v456_v53, %v453_v50  ;;  %v446_v2 = vshll.u32 %v322_v47, 16  ;;  %v330_v11 = vld [vmem:[%s3611_s12 + $0x58] sm:$0x11]  ;;  %v3356_v46 = vld [vmem:[%s4348_s2 + $0x8] sm:$0xff]  }
  0x19   : > { %2980 = vmatpush3.bf16.msra.mxu0 %v3336_v18  ;;  %v490_v1 = vrot.slane %v488_v56, 5  ;;  %v465_v3 = vshrl.u32 %v3642_v52, 16  ;;  %v430_v5 = vrot.slane %v429_v57, 4  ;;  %v439_v8 = vrot.slane %v437_v60, 4  ;;  %v3355_v50 = vld [vmem:[%s4348_s2 + $0xc8] sm:$0xff]   ;;  %v3711_v51 = vld [vmem:[%s3611_s12 + $0x60] sm:$0xff] }
  0x1a   : > { %3020 = vmatpush3.bf16.msra.mxu1 %v3337_v19  ;;  %2981 = vmatprep.subr.bf16.mxu0 %v3338_v20  ;;  %v485_v6 = vor.u32 %v484_v58, %v481_v55  ;;  %v442_v9 = vrot.slane %v440_v61, 5  ;;  %v458_v10 = vrot.slane %v457_v0, 4  ;;  %v448_v12 = vrot.slane %v446_v2, 5  ;;  %v333_v53 = vld [vmem:[%s3611_s12 + $0x70] sm:$0x11] }
  0x1b   : > { %3021 = vmatprep.subr.bf16.mxu1 %v3339_v21  ;;  %v467_v13 = vrot.slane %v465_v3, 4  ;;  %v468_v14 = vshll.u32 %v3642_v52, 16  ;;  %v435_v15 = vsel %vm3652_vm2, %v430_v5, %v434_v49  ;;  %v474_v18 = vshll.u32 %v326_v59, 16  ;;  %v3720_v59 = vld [vmem:[%s3611_s12 + $0x68] sm:$0xff]  ;;  %v334_v60 = vld [vmem:[%s3611_s12 + $0x78] sm:$0x11] }
  0x1c   : > { %v486_v16 = vrot.slane %v485_v6, 4  ;;  %v443_v17 = vor.u32 %v442_v9, %v439_v8  ;;  %v3669_v19 = vsel %vm3652_vm2, %v458_v10, %v462_v54  ;;  %v493_v21 = vshrl.u32 %v3661_v7, 16  ;;  %v3358_v61 = vld [vmem:[%s4348_s2 + $0x50] sm:$0xff]   ;;  %v3357_v8 = vld [vmem:[%s4348_s2 + $0x88] sm:$0xff]  }
  0x1d   : > { %2982 = vmatpush3.bf16.msra.mxu0 %v3340_v22  ;;  %v470_v20 = vrot.slane %v468_v14, 5  ;;  %v496_v22 = vshll.u32 %v3661_v7, 16  ;;  %v502_v37 = vshll.u32 %v330_v11, 16  ;;  %v2783_v40 = vcombine.high %v3624_v34, %v3628_v36 }
  0x1e   : > { %3022 = vmatpush3.bf16.msra.mxu1 %v3341_v23  ;;  %2983 = vmatprep.subr.bf16.mxu0 %v3342_v24  ;;  %v3352_v23 = vld [vmem:[%s4348_s2] sm:$0xff]   ;;  %v3678_v24 = vsel %vm3652_vm2, %v486_v16, %v490_v1  ;;  %v495_v33 = vrot.slane %v493_v21, 4  ;;  %v2785_v41 = vcombine.high %v3642_v52, %v3661_v7  ;;  %v2782_v47 = vcombine.low %v3624_v34, %v3628_v36 }
  0x1f   : > { %3023 = vmatprep.subr.bf16.mxu1 %v3343_v25  ;;  %v2622_v25 = vcombine.low %v435_v15, %v3669_v19  ;;  %v498_v35 = vrot.slane %v496_v22, 5  ;;  %v504_v44 = vrot.slane %v502_v37, 5  ;;  %v2784_v48 = vcombine.low %v3642_v52, %v3661_v7  ;;  %v3362_v22 = vld [vmem:[%s4348_s2 + $0x58] sm:$0xff]   ;;  %v337_v37 = vld [vmem:[%s3611_s12 + $0x90] sm:$0x11] }
  0x20   : > { %v2895_v54 = vcombine.high %v3669_v19, %v3678_v24  ;;  %v507_v58 = vshrl.u32 %v3711_v51, 16  ;;  %v516_v0 = vshll.u32 %v333_v53, 16  ;;  %v521_v1 = vshrl.u32 %v3720_v59, 16 }
  0x21   : > { %2984 = vmatpush3.bf16.msra.mxu0 %v3344_v26  ;;  %v2623_v26 = vcombine.high %v435_v15, %v3669_v19  ;;  %v499_v43 = vor.u32 %v498_v35, %v495_v33  ;;  %v524_v2 = vshll.u32 %v3720_v59, 16  ;;  %v530_v5 = vshll.u32 %v334_v60, 16  ;;  %v3360_v15 = vld [vmem:[%s4348_s2 + $0x10] sm:$0xff]   ;;  %v3365_v33 = vld [vmem:[%s4348_s2 + $0x98] sm:$0xff]   ;;  %v3774_v35 = vld [vmem:[%s3611_s12 + $0x80] sm:$0xff] }
  0x22   : > { %3024 = vmatpush3.bf16.msra.mxu1 %v3345_v27  ;;  %2985 = vmatprep.subr.bf16.mxu0 %v3346_v28  ;;  %v444_v27 = vrot.slane %v443_v17, 4  ;;  %v3354_v28 = vld [vmem:[%s4348_s2 + $0x48] sm:$0xff]   ;;  %v523_v10 = vrot.slane %v521_v1, 4  ;;  %v518_v14 = vrot.slane %v516_v0, 5  ;;  %v544_v53 = vshll.u32 %v337_v37, 16 }
  0x23   : > { %3025 = vmatprep.subr.bf16.mxu1 %v3347_v29  ;;  %v2894_v29 = vcombine.low %v3669_v19, %v3678_v24  ;;  %999 = vmatprep.mubr.bf16.mxu0 %v2623_v26  ;;  %v500_v55 = vrot.slane %v499_v43, 4  ;;  %v526_v11 = vrot.slane %v524_v2, 5  ;;  %v3782_v43 = vld [vmem:[%s3611_s12 + $0xa0] sm:$0xff]  ;;  %v342_v0 = vld [vmem:[%s3611_s12 + $0xb8] sm:$0x11] }
  0x24   : > { %v449_v38 = vsel %vm3652_vm2, %v444_v27, %v448_v12  ;;  %v3359_v12 = vld [vmem:[%s4348_s2 + $0xd0] sm:$0xff]   ;;  %v3364_v27 = vld [vmem:[%s4348_s2 + $0x18] sm:$0xff]   ;;  %v546_v2 = vrot.slane %v544_v53, 5 }
  0x25   : > { %2986 = vmatpush3.bf16.msra.mxu0 %v3348_v30  ;;  %v471_v30 = vor.u32 %v470_v20, %v467_v13  ;;  %v3731_v3 = vsel %vm3652_vm2, %v500_v55, %v504_v44  ;;  %v527_v17 = vor.u32 %v526_v11, %v523_v10  ;;  %v3361_v20 = vld [vmem:[%s4348_s2 + $0x90] sm:$0xff]   ;;  %v563_v55 = vshrl.u32 %v3782_v43, 16 }
  0x26   : > { %3026 = vmatpush3.bf16.msra.mxu1 %v3349_v31  ;;  %3051 = vmatprep.subr.bf16.mxu0 %v3350_v62  ;;  %v476_v31 = vrot.slane %v474_v18, 5  ;;  %v510_v62 = vshll.u32 %v3711_v51, 16  ;;  %v532_v18 = vrot.slane %v530_v5, 5  ;;  %v341_v44 = vld [vmem:[%s3611_s12 + $0xb0] sm:$0x11] }
  0x27   : > { %3091 = vmatprep.subr.bf16.mxu1 %v3351_v4  ;;  %v472_v39 = vrot.slane %v471_v30, 4  ;;  %v509_v4 = vrot.slane %v507_v58, 4  ;;  %v338_v58 = vld [vmem:[%s3611_s12 + $0x98] sm:$0x11] }
  0x28   : > { %1000 = vmatmul.mubr.bf16.vlgmr.msra.gmra.mrb[0].mxu0 %v2622_v25  ;;  %v512_v9 = vrot.slane %v510_v62, 5  ;;  %v3363_v25 = vld [vmem:[%s4348_s2 + $0xd8] sm:$0xff]   ;;  %v3794_v62 = vld [vmem:[%s3611_s12 + $0xa8] sm:$0xff] }
  0x29   : > { %3052 = vmatpush3.bf16.msra.mxu0 %v3352_v23  ;;  %v3705_v49 = vsel %vm3652_vm2, %v472_v39, %v476_v31  ;;  %v528_v23 = vrot.slane %v527_v17, 4  ;;  %v580_v17 = vshll.u32 %v3794_v62, 16 }
  0x2a   : > { %3053 = vmatprep.subr.bf16.mxu0 %v3354_v28  ;;  %v2624_v56 = vcombine.low %v449_v38, %v3705_v49  ;;  %v2625_v57 = vcombine.high %v449_v38, %v3705_v49  ;;  %v2896_v6 = vcombine.low %v3705_v49, %v3731_v3  ;;  %v513_v13 = vor.u32 %v512_v9, %v509_v4 }
  0x2b   : > { %v2897_v16 = vcombine.high %v3705_v49, %v3731_v3  ;;  %v3766_v30 = vsel %vm3652_vm2, %v528_v23, %v532_v18  ;;  %v565_v4 = vrot.slane %v563_v55, 4  ;;  %v586_v18 = vshll.u32 %v342_v0, 16  ;;  %v3371_v0 = vld [vmem:[%s4348_s2 + $0xe8] sm:$0xff]  }
  0x2c   : > { %1064 = vmatprep.mubr.bf16.mxu1 %v2625_v57  ;;  %v514_v21 = vrot.slane %v513_v13, 4  ;;  %v2629_v38 = vcombine.high %v3731_v3, %v3766_v30  ;;  %v2628_v39 = vcombine.low %v3731_v3, %v3766_v30  ;;  %v572_v57 = vshll.u32 %v341_v44, 16  ;;  %v3366_v13 = vld [vmem:[%s4348_s2 + $0x60] sm:$0xff]  }
  0x2d   : > { %3054 = vmatpush3.bf16.msra.mxu0 %v3356_v46  ;;  %1065 = vmatmul.mubr.bf16.vlgmr.msra.gmra.mrb[0].mxu1 %v2624_v56  ;;  %v538_v46 = vshll.u32 %v3774_v35, 16  ;;  %v566_v56 = vshll.u32 %v3782_v43, 16 }
  0x2e   : > { %3055 = vmatprep.subr.bf16.mxu0 %v3358_v61  ;;  %3092 = vmatpush3.bf16.msra.mxu1 %v3353_v45  ;;  %v3757_v26 = vsel %vm3652_vm2, %v514_v21, %v518_v14  ;;  %v535_v45 = vshrl.u32 %v3774_v35, 16 }
  0x2f   : > { %3093 = vmatprep.subr.bf16.mxu1 %v3355_v50  ;;  %v2627_v28 = vcombine.high %v3678_v24, %v3757_v26  ;;  %v2626_v31 = vcombine.low %v3678_v24, %v3757_v26  ;;  %v3788_v50 = vld [vmem:[%s3611_s12 + $0x88] sm:$0xff]  ;;  %1072 = vmatprep.mubr.bf16.mxu1 %v2629_v38  ;;  %v540_v61 = vrot.slane %v538_v46, 5  ;;  %v568_v5 = vrot.slane %v566_v56, 5 }
  0x30   : > { %v537_v60 = vrot.slane %v535_v45, 4  ;;  %v549_v1 = vshrl.u32 %v3788_v50, 16  ;;  %v552_v11 = vshll.u32 %v3788_v50, 16  ;;  %v3369_v45 = vld [vmem:[%s4348_s2 + $0xa0] sm:$0xff]   ;;  %v2787_v46 = vcombine.high %v3711_v51, %v3774_v35 }
  0x31   : > { %3056 = vmatpush3.bf16.msra.mxu0 %v3360_v15  ;;  %1007 = vmatprep.mubr.bf16.mxu0 %v2627_v28  ;;  %v569_v14 = vor.u32 %v568_v5, %v565_v4  ;;  %v577_v15 = vshrl.u32 %v3794_v62, 16  ;;  %v2789_v53 = vcombine.high %v3720_v59, %v3788_v50 }
  0x32   : > { %3094 = vmatpush3.bf16.msra.mxu1 %v3357_v8  ;;  %3057 = vmatprep.subr.bf16.mxu0 %v3362_v22  ;;  %v574_v8 = vrot.slane %v572_v57, 5  ;;  %v541_v9 = vor.u32 %v540_v61, %v537_v60  ;;  %v551_v10 = vrot.slane %v549_v1, 4  ;;  %v554_v22 = vrot.slane %v552_v11, 5  ;;  %v3858_v11 = vld [vmem:[%s3611_s12 + $0xc0] sm:$0xff] }
  0x33   : > { %3095 = vmatprep.subr.bf16.mxu1 %v3359_v12  ;;  %1008 = vmatmul.mubr.bf16.gmra.mrb[4].mxu0 %v2626_v31  ;;  %v558_v12 = vshll.u32 %v338_v58, 16  ;;  %v579_v28 = vrot.slane %v577_v15, 4  ;;  %v582_v31 = vrot.slane %v580_v17, 5  ;;  %v3370_v58 = vld [vmem:[%s4348_s2 + $0x68] sm:$0xff]   ;;  %v2786_v60 = vcombine.low %v3711_v51, %v3774_v35 }
  0x34   : > { %v542_v21 = vrot.slane %v541_v9, 4  ;;  %v555_v38 = vor.u32 %v554_v22, %v551_v10  ;;  %v2788_v1 = vcombine.low %v3720_v59, %v3788_v50  ;;  %v3373_v10 = vld [vmem:[%s4348_s2 + $0xa8] sm:$0xff]   ;;  %v594_v22 = vshll.u32 %v3858_v11, 16 }
  0x35   : > { %3058 = vmatpush3.bf16.msra.mxu0 %v3364_v27  ;;  %1073 = vmatmul.mubr.bf16.gmra.mrb[4].mxu1 %v2628_v39  ;;  %v560_v23 = vrot.slane %v558_v12, 5  ;;  %v570_v27 = vrot.slane %v569_v14, 4  ;;  %v583_v44 = vor.u32 %v582_v31, %v579_v28  ;;  %v345_v12 = vld [vmem:[%s3611_s12 + $0xd0] sm:$0x11] }
  0x36   : > { %3096 = vmatpush3.bf16.msra.mxu1 %v3361_v20  ;;  %v3367_v20 = vld [vmem:[%s4348_s2 + $0xe0] sm:$0xff]   ;;  %3059 = vmatprep.subr.bf16.mxu0 %v3366_v13  ;;  %v3812_v37 = vsel %vm3652_vm2, %v542_v21, %v546_v2  ;;  %v556_v56 = vrot.slane %v555_v38, 4  ;;  %v591_v21 = vshrl.u32 %v3858_v11, 16 }
  0x37   : > { %3097 = vmatprep.subr.bf16.mxu1 %v3363_v25  ;;  %v3368_v25 = vld [vmem:[%s4348_s2 + $0x20] sm:$0xff]   ;;  %v3816_v39 = vsel %vm3652_vm2, %v570_v27, %v574_v8  ;;  %v584_v61 = vrot.slane %v583_v44, 4  ;;  %v2899_v2 = vcombine.high %v3757_v26, %v3812_v37  ;;  %v3372_v8 = vld [vmem:[%s4348_s2 + $0x28] sm:$0xff]   ;;  %v596_v44 = vrot.slane %v594_v22, 5 }
  0x38   : > { %v2631_v55 = vcombine.high %v3812_v37, %v3816_v39  ;;  %v2630_v57 = vcombine.low %v3812_v37, %v3816_v39  ;;  %v3845_v5 = vsel %vm3652_vm2, %v556_v56, %v560_v23  ;;  %v3876_v23 = vld [vmem:[%s3611_s12 + $0xc8] sm:$0xff]  ;;  %v593_v38 = vrot.slane %v591_v21, 4 }
  0x39   : > { %3060 = vmatpush3.bf16.msra.mxu0 %v3368_v25  ;;  %v2901_v13 = vcombine.high %v3766_v30, %v3845_v5  ;;  %v600_v25 = vshll.u32 %v345_v12, 16  ;;  %v605_v56 = vshrl.u32 %v3876_v23, 16  ;;  %v608_v12 = vshll.u32 %v3876_v23, 16 }
  0x3a   : > { %3098 = vmatpush3.bf16.msra.mxu1 %v3365_v33  ;;  %v588_v33 = vrot.slane %v586_v18, 5  ;;  %1015 = vmatprep.mubr.bf16.mxu0 %v2631_v55  ;;  %v3870_v18 = vld [vmem:[%s3611_s12 + $0xe0] sm:$0xff]  ;;  %v350_v55 = vld [vmem:[%s3611_s12 + $0xf8] sm:$0x11] }
  0x3b   : > { %3099 = vmatprep.subr.bf16.mxu1 %v3367_v20  ;;  %3061 = vmatprep.subr.bf16.mxu0 %v3370_v58  ;;  %v349_v20 = vld [vmem:[%s3611_s12 + $0xf0] sm:$0x11]  ;;  %v619_v27 = vshrl.u32 %v3870_v18, 16  ;;  %v622_v28 = vshll.u32 %v3870_v18, 16  ;;  %v642_v4 = vshll.u32 %v350_v55, 16 }
  0x3c   : > { %v3852_v9 = vsel %vm3652_vm2, %v584_v61, %v588_v33  ;;  %1016 = vmatmul.mubr.bf16.gmra.mrb[8].mxu0 %v2630_v57  ;;  %v628_v31 = vshll.u32 %v349_v20, 16  ;;  %v346_v33 = vld [vmem:[%s3611_s12 + $0xd8] sm:$0x11]  ;;  %v602_v57 = vrot.slane %v600_v25, 5 }
  0x3d   : > { %v2633_v15 = vcombine.high %v3845_v5, %v3852_v9  ;;  %v2632_v17 = vcombine.low %v3845_v5, %v3852_v9  ;;  %3062 = vmatpush3.bf16.msra.mxu0 %v3372_v8  ;;  %v621_v58 = vrot.slane %v619_v27, 4  ;;  %v624_v61 = vrot.slane %v622_v28, 5  ;;  %v3376_v28 = vld [vmem:[%s4348_s2 + $0x30] sm:$0xff]  }
  0x3e   : > { %3100 = vmatpush3.bf16.msra.mxu1 %v3369_v45  ;;  %v3882_v45 = vld [vmem:[%s3611_s12 + $0xe8] sm:$0xff]  ;;  %v597_v8 = vor.u32 %v596_v44, %v593_v38  ;;  %v614_v14 = vshll.u32 %v346_v33, 16  ;;  %v610_v27 = vrot.slane %v608_v12, 5  ;;  %v3377_v12 = vld [vmem:[%s4348_s2 + $0xb0] sm:$0xff]  }
  0x3f   : > { %3101 = vmatprep.subr.bf16.mxu1 %v3371_v0  ;;  %1080 = vmatprep.mubr.bf16.mxu1 %v2633_v15  ;;  %v630_v0 = vrot.slane %v628_v31, 5  ;;  %v3374_v15 = vld [vmem:[%s4348_s2 + $0x70] sm:$0xff]   ;;  %v625_v20 = vor.u32 %v624_v61, %v621_v58  ;;  %v633_v21 = vshrl.u32 %v3882_v45, 16  ;;  %v636_v22 = vshll.u32 %v3882_v45, 16 }
  0x40   : > { %1081 = vmatmul.mubr.bf16.gmra.mrb[8].mxu1 %v2632_v17  ;;  %v3375_v17 = vld [vmem:[%s4348_s2 + $0xf0] sm:$0xff]   ;;  %v598_v25 = vrot.slane %v597_v8, 4  ;;  %3063 = vmatprep.subr.bf16.mxu0 %v3374_v15  ;;  %v616_v33 = vrot.slane %v614_v14, 5  ;;  %v644_v8 = vrot.slane %v642_v4, 5  ;;  %v2671_v14 = vcombine.high %v3620_v32, %v3624_v34 }
  0x41   : > { %v626_v31 = vrot.slane %v625_v20, 4  ;;  %v635_v38 = vrot.slane %v633_v21, 4  ;;  %v638_v44 = vrot.slane %v636_v22, 5  ;;  %3064 = vmatpush3.bf16.msra.mxu0 %v3376_v28  ;;  %v2790_v4 = vcombine.low %v3782_v43, %v3858_v11  ;;  %v3379_v21 = vld [vmem:[%s4348_s2 + $0xf8] sm:$0xff]  }
  0x42   : > { %3102 = vmatpush3.bf16.msra.mxu1 %v3373_v10  ;;  %v607_v10 = vrot.slane %v605_v56, 4  ;;  %v3900_v56 = vsel %vm3652_vm2, %v598_v25, %v602_v57  ;;  %v2792_v22 = vcombine.low %v3794_v62, %v3876_v23  ;;  %v3380_v28 = vld [vmem:[%s4348_s2 + $0x38] sm:$0xff]  }
  0x43   : > { %3103 = vmatprep.subr.bf16.mxu1 %v3375_v17  ;;  %v3904_v58 = vsel %vm3652_vm2, %v626_v31, %v630_v0  ;;  %v639_v61 = vor.u32 %v638_v44, %v635_v38  ;;  %v3378_v0 = vld [vmem:[%s4348_s2 + $0x78] sm:$0xff]   ;;  %v2903_v17 = vcombine.high %v3816_v39, %v3900_v56  ;;  %v2902_v25 = vcombine.low %v3816_v39, %v3900_v56 }
  0x44   : > { %v611_v55 = vor.u32 %v610_v27, %v607_v10  ;;  %v2635_v15 = vcombine.high %v3900_v56, %v3904_v58  ;;  %v2634_v10 = vcombine.low %v3900_v56, %v3904_v58  ;;  %3065 = vmatprep.subr.bf16.mxu0 %v3378_v0  ;;  %v3381_v38 = vld [vmem:[%s4348_s2 + $0xb8] sm:$0xff]   ;;  %v3386_v0 = vld [vmem:[%s4348_s2 + $0x248] sm:$0xff]  }
  0x45   : > { %v640_v20 = vrot.slane %v639_v61, 4  ;;  %3066 = vmatpush3.bf16.msra.mxu0 %v3380_v28  ;;  %v3387_v28 = vld [vmem:[%s4348_s2 + $0x2c8] sm:$0xff]  }
  0x46   : > { %v612_v57 = vrot.slane %v611_v55, 4  ;;  %3104 = vmatpush3.bf16.msra.mxu1 %v3377_v12  ;;  %1023 = vmatprep.mubr.bf16.mxu0 %v2635_v15  ;;  %v3382_v12 = vld [vmem:[%s4348_s2 + $0x240] sm:$0xff]  }
  0x47   : > { %v3938_v31 = vsel %vm3652_vm2, %v640_v20, %v644_v8  ;;  %1024 = vmatmul.mubr.bf16.gmra.mrb[12].mxu0 %v2634_v10  ;;  %3105 = vmatprep.subr.bf16.mxu1 %v3379_v21  ;;  %v2673_v8 = vcombine.high %v3635_v42, %v3642_v52  ;;  %v3383_v15 = vld [vmem:[%s4348_s2 + $0x2c0] sm:$0xff]   ;;  %v2675_v10 = vcombine.high %v3628_v36, %v3711_v51  ;;  %v3388_v21 = vld [vmem:[%s4348_s2 + $0x208] sm:$0xff]  }
  0x48   : > { %v3931_v27 = vsel %vm3652_vm2, %v612_v57, %v616_v33  ;;  %1401 = vmatprep.mubr.bf16.mxu0 %v2671_v14  ;;  %3131 = vmatprep.subr.bf16.mxu0 %v3382_v12  ;;  %v2670_v57 = vcombine.low %v3620_v32, %v3624_v34  ;;  %v3384_v14 = vld [vmem:[%s4348_s2 + $0x200] sm:$0xff]   ;;  %v2672_v20 = vcombine.low %v3635_v42, %v3642_v52  ;;  %v3389_v42 = vld [vmem:[%s4348_s2 + $0x288] sm:$0xff]   ;;  %v3392_v12 = vld [vmem:[%s4348_s2 + $0x210] sm:$0xff]  }
  0x49   : > { %v2905_v44 = vcombine.high %v3852_v9, %v3931_v27  ;;  %v2904_v33 = vcombine.low %v3852_v9, %v3931_v27  ;;  %v2637_v55 = vcombine.high %v3931_v27, %v3938_v31  ;;  %v2636_v61 = vcombine.low %v3931_v27, %v3938_v31  ;;  %v3385_v32 = vld [vmem:[%s4348_s2 + $0x280] sm:$0xff]   ;;  %v3421_v34 = vld [vmem:[%s4348_s2 + $0x388] sm:$0xff]   ;;  %v3426_v52 = vld [vmem:[%s4348_s2 + $0x358] sm:$0xff]  }
  0x4a   : > { %3106 = vmatpush3.bf16.msra.mxu1 %v3381_v38  ;;  %v2677_v38 = vcombine.high %v3661_v7, %v3720_v59 }
  0x4b   : > { %1088 = vmatprep.mubr.bf16.mxu1 %v2637_v55  ;;  %3171 = vmatprep.subr.bf16.mxu1 %v3383_v15  ;;  %v3390_v55 = vld [vmem:[%s4348_s2 + $0x250] sm:$0xff]   ;;  %v3394_v15 = vld [vmem:[%s4348_s2 + $0x258] sm:$0xff]  }
  0x4c   : > { %1089 = vmatmul.mubr.bf16.gmra.mrb[12].mxu1 %v2636_v61  ;;  %v2674_v61 = vcombine.low %v3628_v36, %v3711_v51  ;;  %v3422_v36 = vld [vmem:[%s4348_s2 + $0x350] sm:$0xff]   ;;  %v2793_v51 = vcombine.high %v3794_v62, %v3876_v23 }
  0x4d   : > { %1466 = vmatprep.mubr.bf16.mxu1 %v2673_v8  ;;  %v3391_v8 = vld [vmem:[%s4348_s2 + $0x2d0] sm:$0xff]  }
  0x4f   : > { %1402 = vmatmul.mubr.bf16.vlgmr.msra.gmra.mrb[16].mxu0 %v2670_v57  ;;  %v2679_v57 = vcombine.high %v3774_v35, %v3782_v43 }
  0x50   : > { %3132 = vmatpush3.bf16.msra.mxu0 %v3384_v14  ;;  %1409 = vmatprep.mubr.bf16.mxu0 %v2675_v10  ;;  %v2676_v14 = vcombine.low %v3661_v7, %v3720_v59  ;;  %v3393_v10 = vld [vmem:[%s4348_s2 + $0x290] sm:$0xff]   ;;  %v2791_v7 = vcombine.high %v3782_v43, %v3858_v11  ;;  %v3434_v59 = vld [vmem:[%s4348_s2 + $0x368] sm:$0xff]  }
  0x51   : > { %3133 = vmatprep.subr.bf16.mxu0 %v3386_v0  ;;  %v3396_v0 = vld [vmem:[%s4348_s2 + $0x218] sm:$0xff]  }
  0x54   : > { %1467 = vmatmul.mubr.bf16.vlgmr.msra.gmra.mrb[16].mxu1 %v2672_v20  ;;  %3134 = vmatpush3.bf16.msra.mxu0 %v3388_v21  ;;  %v3395_v20 = vld [vmem:[%s4348_s2 + $0x2d8] sm:$0xff]  }
  0x55   : > { %3172 = vmatpush3.bf16.msra.mxu1 %v3385_v32  ;;  %1474 = vmatprep.mubr.bf16.mxu1 %v2677_v38  ;;  %v2681_v32 = vcombine.high %v3788_v50, %v3794_v62  ;;  %v3397_v21 = vld [vmem:[%s4348_s2 + $0x298] sm:$0xff]   ;;  %v2678_v38 = vcombine.low %v3774_v35, %v3782_v43  ;;  %v3435_v43 = vld [vmem:[%s4348_s2 + $0x3e8] sm:$0xff]  }
  0x56   : > { %3173 = vmatprep.subr.bf16.mxu1 %v3387_v28  ;;  %3135 = vmatprep.subr.bf16.mxu0 %v3390_v55  ;;  %v3398_v28 = vld [vmem:[%s4348_s2 + $0x260] sm:$0xff]   ;;  %v3429_v35 = vld [vmem:[%s4348_s2 + $0x398] sm:$0xff]  }
  0x57   : > { %1410 = vmatmul.mubr.bf16.gmra.mrb[20].mxu0 %v2674_v61  ;;  %v3400_v55 = vld [vmem:[%s4348_s2 + $0x220] sm:$0xff]   ;;  %v3402_v61 = vld [vmem:[%s4348_s2 + $0x268] sm:$0xff]  }
  0x58   : > { %3136 = vmatpush3.bf16.msra.mxu0 %v3392_v12  ;;  %1417 = vmatprep.mubr.bf16.mxu0 %v2679_v57  ;;  %v2680_v12 = vcombine.low %v3788_v50, %v3794_v62  ;;  %v3404_v57 = vld [vmem:[%s4348_s2 + $0x228] sm:$0xff]   ;;  %v3433_v50 = vld [vmem:[%s4348_s2 + $0x3a0] sm:$0xff]  }
  0x59   : > { %3174 = vmatpush3.bf16.msra.mxu1 %v3389_v42  ;;  %3137 = vmatprep.subr.bf16.mxu0 %v3394_v15  ;;  %v3399_v42 = vld [vmem:[%s4348_s2 + $0x2e0] sm:$0xff]  }
  0x5a   : > { %3175 = vmatprep.subr.bf16.mxu1 %v3391_v8  ;;  %v2683_v8 = vcombine.high %v3858_v11, %v3870_v18  ;;  %v3401_v15 = vld [vmem:[%s4348_s2 + $0x2a0] sm:$0xff]  }
  0x5c   : > { %1475 = vmatmul.mubr.bf16.gmra.mrb[20].mxu1 %v2676_v14  ;;  %3138 = vmatpush3.bf16.msra.mxu0 %v3396_v0  ;;  %v3403_v14 = vld [vmem:[%s4348_s2 + $0x2e8] sm:$0xff]  }
  0x5d   : > { %3176 = vmatpush3.bf16.msra.mxu1 %v3393_v10  ;;  %1482 = vmatprep.mubr.bf16.mxu1 %v2681_v32  ;;  %v2685_v10 = vcombine.high %v3876_v23, %v3882_v45  ;;  %v3405_v0 = vld [vmem:[%s4348_s2 + $0x2a8] sm:$0xff]   ;;  %v2682_v32 = vcombine.low %v3858_v11, %v3870_v18 }
  0x5e   : > { %3177 = vmatprep.subr.bf16.mxu1 %v3395_v20  ;;  %3139 = vmatprep.subr.bf16.mxu0 %v3398_v28  ;;  %v3406_v20 = vld [vmem:[%s4348_s2 + $0x270] sm:$0xff]  }
  0x5f   : > { %1418 = vmatmul.mubr.bf16.gmra.mrb[24].mxu0 %v2678_v38  ;;  %v3408_v28 = vld [vmem:[%s4348_s2 + $0x230] sm:$0xff]   ;;  %v3410_v38 = vld [vmem:[%s4348_s2 + $0x278] sm:$0xff]  }
  0x60   : > { %3140 = vmatpush3.bf16.msra.mxu0 %v3400_v55  ;;  %1425 = vmatprep.mubr.bf16.mxu0 %v2683_v8  ;;  %v3409_v55 = vld [vmem:[%s4348_s2 + $0x2b0] sm:$0xff]   ;;  %v3411_v8 = vld [vmem:[%s4348_s2 + $0x2f8] sm:$0xff]  }
  0x61   : > { %3178 = vmatpush3.bf16.msra.mxu1 %v3397_v21  ;;  %3141 = vmatprep.subr.bf16.mxu0 %v3402_v61  ;;  %v3407_v21 = vld [vmem:[%s4348_s2 + $0x2f0] sm:$0xff]   ;;  %v3412_v61 = vld [vmem:[%s4348_s2 + $0x238] sm:$0xff]  }
  0x62   : > { %3179 = vmatprep.subr.bf16.mxu1 %v3399_v42  ;;  %v2684_v42 = vcombine.low %v3876_v23, %v3882_v45  ;;  %v3444_v23 = vld [vmem:[%s4348_s2 + $0x338] sm:$0xff]  }
  0x64   : > { %1483 = vmatmul.mubr.bf16.gmra.mrb[24].mxu1 %v2680_v12  ;;  %3142 = vmatpush3.bf16.msra.mxu0 %v3404_v57  ;;  %v3413_v12 = vld [vmem:[%s4348_s2 + $0x2b8] sm:$0xff]   ;;  %v3415_v57 = vld [vmem:[%s4348_s2 + $0x3c0] sm:$0xff]  }
  0x65   : > { %3180 = vmatpush3.bf16.msra.mxu1 %v3401_v15  ;;  %1490 = vmatprep.mubr.bf16.mxu1 %v2685_v10  ;;  %v3414_v15 = vld [vmem:[%s4348_s2 + $0x340] sm:$0xff]  }
  0x66   : > { %3181 = vmatprep.subr.bf16.mxu1 %v3403_v14  ;;  %3143 = vmatprep.subr.bf16.mxu0 %v3406_v20  ;;  %v3416_v14 = vld [vmem:[%s4348_s2 + $0x300] sm:$0xff]   ;;  %v3424_v20 = vld [vmem:[%s4348_s2 + $0x310] sm:$0xff]  }
  0x67   : > { %1426 = vmatmul.mubr.bf16.gmra.mrb[28].mxu0 %v2682_v32  ;;  %v3417_v10 = vld [vmem:[%s4348_s2 + $0x380] sm:$0xff]  }
  0x68   : > { %3144 = vmatpush3.bf16.msra.mxu0 %v3408_v28  ;;  %1826 = vmatprep.mubr.bf16.mxu0 %v2783_v40  ;;  %v3418_v40 = vld [vmem:[%s4348_s2 + $0x348] sm:$0xff]   ;;  %v3431_v32 = vld [vmem:[%s4348_s2 + $0x3e0] sm:$0xff]  }
  0x69   : > { %3182 = vmatpush3.bf16.msra.mxu1 %v3405_v0  ;;  %3145 = vmatprep.subr.bf16.mxu0 %v3410_v38  ;;  %v3420_v0 = vld [vmem:[%s4348_s2 + $0x308] sm:$0xff]  }
  0x6a   : > { %3183 = vmatprep.subr.bf16.mxu1 %v3407_v21  ;;  %v3432_v21 = vld [vmem:[%s4348_s2 + $0x320] sm:$0xff]   ;;  %v352_v28 = vld [vmem:[%s4167_s23 + $0x8] sm:$0xff] }
  0x6b   : > { %v3436_v38 = vld [vmem:[%s4348_s2 + $0x328] sm:$0xff]   ;;  %v2797_v11 = vcombine.high %v3882_v45, %v352_v28  ;;  %v2796_v62 = vcombine.low %v3882_v45, %v352_v28  ;;  %v3445_v45 = vld [vmem:[%s4348_s2 + $0x3b8] sm:$0xff]  }
  0x6c   : > { %1491 = vmatmul.mubr.bf16.gmra.mrb[28].mxu1 %v2684_v42  ;;  %3146 = vmatpush3.bf16.msra.mxu0 %v3412_v61 }
  0x6d   : > { %3184 = vmatpush3.bf16.msra.mxu1 %v3409_v55  ;;  %1891 = vmatprep.mubr.bf16.mxu1 %v2785_v41  ;;  %v3419_v41 = vld [vmem:[%s4348_s2 + $0x3c8] sm:$0xff]  }
  0x6e   : > { %3185 = vmatprep.subr.bf16.mxu1 %v3411_v8  ;;  %3211 = vmatprep.subr.bf16.mxu0 %v3414_v15  ;;  %v3437_v55 = vld [vmem:[%s4348_s2 + $0x3a8] sm:$0xff]   ;;  %v3439_v8 = vld [vmem:[%s4348_s2 + $0x3f0] sm:$0xff]   ;;  %v3442_v15 = vld [vmem:[%s4348_s2 + $0x378] sm:$0xff]  }
  0x6f   : > { %1827 = vmatmul.mubr.bf16.vlgmr.msra.gmra.mrb[32].mxu0 %v2782_v47  ;;  %v3423_v47 = vld [vmem:[%s4348_s2 + $0x3d0] sm:$0xff]  }
  0x70   : > { %3212 = vmatpush3.bf16.msra.mxu0 %v3416_v14  ;;  %1834 = vmatprep.mubr.bf16.mxu0 %v2787_v46  ;;  %v3428_v46 = vld [vmem:[%s4348_s2 + $0x318] sm:$0xff]  }
  0x71   : > { %3186 = vmatpush3.bf16.msra.mxu1 %v3413_v12  ;;  %3213 = vmatprep.subr.bf16.mxu0 %v3418_v40  ;;  %v3440_v12 = vld [vmem:[%s4348_s2 + $0x330] sm:$0xff]   ;;  %v3443_v14 = vld [vmem:[%s4348_s2 + $0x3f8] sm:$0xff]   ;;  %v1947_v40 = vshrl.u32 %v352_v28, 16 }
  0x72   : > { %3251 = vmatprep.subr.bf16.mxu1 %v3415_v57 }
  0x74   : > { %1892 = vmatmul.mubr.bf16.vlgmr.msra.gmra.mrb[32].mxu1 %v2784_v48  ;;  %3214 = vmatpush3.bf16.msra.mxu0 %v3420_v0  ;;  %v3425_v48 = vld [vmem:[%s4348_s2 + $0x390] sm:$0xff]  }
  0x75   : > { %3252 = vmatpush3.bf16.msra.mxu1 %v3417_v10  ;;  %1899 = vmatprep.mubr.bf16.mxu1 %v2789_v53  ;;  %v3427_v53 = vld [vmem:[%s4348_s2 + $0x3d8] sm:$0xff]   ;;  %v1950_v10 = vshll.u32 %v352_v28, 16 }
  0x76   : > { %3253 = vmatprep.subr.bf16.mxu1 %v3419_v41  ;;  %3215 = vmatprep.subr.bf16.mxu0 %v3422_v36 }
  0x77   : > { %1835 = vmatmul.mubr.bf16.gmra.mrb[36].mxu0 %v2786_v60  ;;  %v3430_v60 = vld [vmem:[%s4348_s2 + $0x360] sm:$0xff]  }
  0x78   : > { %3216 = vmatpush3.bf16.msra.mxu0 %v3424_v20  ;;  %1842 = vmatprep.mubr.bf16.mxu0 %v2791_v7  ;;  %v1952_v20 = vrot.slane %v1950_v10, 5 }
  0x79   : > { %3254 = vmatpush3.bf16.msra.mxu1 %v3421_v34  ;;  %3217 = vmatprep.subr.bf16.mxu0 %v3426_v52  ;;  %v353_v34 = vld [vmem:[%s4167_s23 + $0x10] sm:$0x11]  ;;  %v354_v52 = vld [vmem:[%s4167_s23 + $0x18] sm:$0x11] }
  0x7a   : > { %3255 = vmatprep.subr.bf16.mxu1 %v3423_v47  ;;  %v1942_v36 = vshll.u32 %v353_v34, 16  ;;  %v1949_v47 = vrot.slane %v1947_v40, 4 }
  0x7c   : > { %1900 = vmatmul.mubr.bf16.gmra.mrb[36].mxu1 %v2788_v1  ;;  %3218 = vmatpush3.bf16.msra.mxu0 %v3428_v46  ;;  %v351_v1 = vld [vmem:[%s4167_s23] sm:$0xff]  ;;  %v1944_v24 = vrot.slane %v1942_v36, 5 }
  0x7d   : > { %3256 = vmatpush3.bf16.msra.mxu1 %v3425_v48  ;;  %1907 = vmatprep.mubr.bf16.mxu1 %v2793_v51  ;;  %v2795_v42 = vcombine.high %v3870_v18, %v351_v1  ;;  %v2794_v61 = vcombine.low %v3870_v18, %v351_v1  ;;  %v3441_v18 = vld [vmem:[%s4348_s2 + $0x3b0] sm:$0xff]   ;;  %v1936_v57 = vshll.u32 %v351_v1, 16 }
  0x7e   : > { %3257 = vmatprep.subr.bf16.mxu1 %v3427_v53  ;;  %3219 = vmatprep.subr.bf16.mxu0 %v3430_v60 }
  0x7f   : > { %1843 = vmatmul.mubr.bf16.gmra.mrb[40].mxu0 %v2790_v4  ;;  %v3438_v4 = vld [vmem:[%s4348_s2 + $0x370] sm:$0xff]   ;;  %v1938_v41 = vrot.slane %v1936_v57, 5 }
  0x80   : > { %3220 = vmatpush3.bf16.msra.mxu0 %v3432_v21  ;;  %1850 = vmatprep.mubr.bf16.mxu0 %v2795_v42 }
  0x81   : > { %3258 = vmatpush3.bf16.msra.mxu1 %v3429_v35  ;;  %3221 = vmatprep.subr.bf16.mxu0 %v3434_v59 }
  0x82   : > { %3259 = vmatprep.subr.bf16.mxu1 %v3431_v32 }
  0x84   : > { %1908 = vmatmul.mubr.bf16.gmra.mrb[40].mxu1 %v2792_v22  ;;  %3222 = vmatpush3.bf16.msra.mxu0 %v3436_v38  ;;  %v1933_v22 = vshrl.u32 %v351_v1, 16 }
  0x85   : > { %3260 = vmatpush3.bf16.msra.mxu1 %v3433_v50  ;;  %1915 = vmatprep.mubr.bf16.mxu1 %v2797_v11 }
  0x86   : > { %3261 = vmatprep.subr.bf16.mxu1 %v3435_v43  ;;  %3223 = vmatprep.subr.bf16.mxu0 %v3438_v4  ;;  %v1935_v0 = vrot.slane %v1933_v22, 4 }
  0x87   : > { %1851 = vmatmul.mubr.bf16.gmra.mrb[44].mxu0 %v2794_v61 }
  0x88   : > { %3224 = vmatpush3.bf16.msra.mxu0 %v3440_v12  ;;  %2285 = vmatprep.mubr.bf16.mxu0 %v2895_v54  ;;  %v1939_v54 = vor.u32 %v1938_v41, %v1935_v0 }
  0x89   : > { %3262 = vmatpush3.bf16.msra.mxu1 %v3437_v55  ;;  %3225 = vmatprep.subr.bf16.mxu0 %v3442_v15 }
  0x8a   : > { %3263 = vmatprep.subr.bf16.mxu1 %v3439_v8  ;;  %v1940_v19 = vrot.slane %v1939_v54, 4 }
  0x8c   : > { %1916 = vmatmul.mubr.bf16.gmra.mrb[44].mxu1 %v2796_v62  ;;  %3226 = vmatpush3.bf16.msra.mxu0 %v3444_v23  ;;  %v1945_v49 = vsel %vm3652_vm2, %v1940_v19, %v1944_v24 }
  0x8d   : > { %3264 = vmatpush3.bf16.msra.mxu1 %v3441_v18  ;;  %2350 = vmatprep.mubr.bf16.mxu1 %v2897_v16  ;;  %v1956_v16 = vshll.u32 %v354_v52, 16 }
  0x8e   : > { %3265 = vmatprep.subr.bf16.mxu1 %v3443_v14 }
  0x8f   : > { %2286 = vmatmul.mubr.bf16.vlgmr.msra.gmra.mrb[48].mxu0 %v2894_v29  ;;  %v1953_v29 = vor.u32 %v1952_v20, %v1949_v47 }
  0x90   : > { %2293 = vmatprep.mubr.bf16.mxu0 %v2899_v2  ;;  %v4353_v2 = vcombine.low %v3757_v26, %v3812_v37  ;;  %v2907_v26 = vcombine.high %v3904_v58, %v1945_v49 }
  0x91   : > { %3266 = vmatpush3.bf16.msra.mxu1 %v3445_v45  ;;  %v1954_v3 = vrot.slane %v1953_v29, 4 }
  0x94   : > { %2351 = vmatmul.mubr.bf16.vlgmr.msra.gmra.mrb[48].mxu1 %v2896_v6  ;;  %v1958_v6 = vrot.slane %v1956_v16, 5 }
  0x95   : > { %2358 = vmatprep.mubr.bf16.mxu1 %v2901_v13  ;;  %v4354_v13 = vcombine.low %v3766_v30, %v3845_v5  ;;  %v2906_v30 = vcombine.low %v3904_v58, %v1945_v49 }
  0x96   : > { %v1959_v37 = vsel %vm3652_vm2, %v1954_v3, %v1958_v6 }
  0x97   : > { %2294 = vmatmul.mubr.bf16.gmra.mrb[52].mxu0 %v4353_v2  ;;  %v2908_v5 = vcombine.low %v3938_v31, %v1959_v37 }
  0x98   : > { %2301 = vmatprep.mubr.bf16.mxu0 %v2903_v17  ;;  %v2909_v17 = vcombine.high %v3938_v31, %v1959_v37 }
  0x9c   : > { %2359 = vmatmul.mubr.bf16.gmra.mrb[52].mxu1 %v4354_v13 }
  0x9d   : > { %2366 = vmatprep.mubr.bf16.mxu1 %v2905_v44 }
  0x9f   : > { %2302 = vmatmul.mubr.bf16.gmra.mrb[56].mxu0 %v2902_v25 }
  0xa0   : > { %2309 = vmatprep.mubr.bf16.mxu0 %v2907_v26 }
  0xa4   : > { %2367 = vmatmul.mubr.bf16.gmra.mrb[56].mxu1 %v2904_v33 }
  0xa5   : > { %2374 = vmatprep.mubr.bf16.mxu1 %v2909_v17 }
  0xa7   : > { %2310 = vmatmul.mubr.bf16.gmra.mrb[60].mxu0 %v2906_v30 }
  0xac   : > { %2375 = vmatmul.mubr.bf16.gmra.mrb[60].mxu1 %v2908_v5 }
  0xfb   : > { %v2987_v63 = vpop.f32.mrb[0].mxu0 }
  0xfc   : > { %v2988_v44 = vpop.f32.mrb[1].mxu0 }
  0xfd   : > { %v2989_v7 = vadd.f32 %v2988_v44, %v2987_v63  ;;  %v2990_v48 = vpop.f32.mrb[2].mxu0 }
  0xfe   : > { %v2991_v39 = vpop.f32.mrb[3].mxu0 }
  0xff   : > { %v2992_v56 = vadd.f32 %v2991_v39, %v2990_v48 }
 0x100   : > { %v3027_v25 = vpop.f32.mrb[0].mxu1 }
 0x101   : > { %v3028_v46 = vpop.f32.mrb[1].mxu1 }
 0x102   : > { %v3029_v53 = vadd.f32 %v3028_v46, %v3027_v25  ;;  %v3030_v51 = vpop.f32.mrb[2].mxu1 }
 0x103   : > { %v3031_v35 = vpop.f32.mrb[3].mxu1 }
 0x104   : > { %v1067_v9 = vadd.f32 %v3029_v53, %v2989_v7  ;;  %v3032_v27 = vadd.f32 %v3031_v35, %v3030_v51 }
 0x106   : > { %v1070_v33 = vadd.f32 %v3032_v27, %v2992_v56  ;;  %v2993_v58 = vpop.f32.mrb[4].mxu0 }
 0x107   : > { %v2994_v32 = vpop.f32.mrb[5].mxu0 }
 0x108   : > { %v3033_v60 = vpop.f32.mrb[4].mxu1  ;;  %v2995_v21 = vadd.f32 %v2994_v32, %v2993_v58  ;;  %v2996_v59 = vpop.f32.mrb[6].mxu0 }
 0x109   : > { %v3034_v31 = vpop.f32.mrb[5].mxu1  ;;  %v2997_v28 = vpop.f32.mrb[7].mxu0 }
 0x10a   : > { %v3035_v50 = vadd.f32 %v3034_v31, %v3033_v60  ;;  %v3036_v1 = vpop.f32.mrb[6].mxu1  ;;  %v2998_v38 = vadd.f32 %v2997_v28, %v2996_v59 }
 0x10b   : > { %v3037_v42 = vpop.f32.mrb[7].mxu1 }
 0x10c   : > { %v1075_v43 = vadd.f32 %v3035_v50, %v2995_v21  ;;  %v3038_v11 = vadd.f32 %v3037_v42, %v3036_v1 }
 0x10e   : > { %v1078_v4 = vadd.f32 %v3038_v11, %v2998_v38 }
 0x10f   : > { %v2999_v55 = vpop.f32.mrb[8].mxu0 }
 0x110   : > { %v3000_v61 = vpop.f32.mrb[9].mxu0 }
 0x111   : > { %v3001_v8 = vadd.f32 %v3000_v61, %v2999_v55  ;;  %v3002_v12 = vpop.f32.mrb[10].mxu0 }
 0x112   : > { %v3003_v15 = vpop.f32.mrb[11].mxu0 }
 0x113   : > { %v3039_v62 = vpop.f32.mrb[8].mxu1  ;;  %v3004_v18 = vadd.f32 %v3003_v15, %v3002_v12 }
 0x114   : > { %v3040_v23 = vpop.f32.mrb[9].mxu1 }
 0x115   : > { %v3041_v22 = vadd.f32 %v3040_v23, %v3039_v62  ;;  %v3042_v57 = vpop.f32.mrb[10].mxu1 }
 0x116   : > { %v3043_v14 = vpop.f32.mrb[11].mxu1 }
 0x117   : > { %v1083_v45 = vadd.f32 %v3041_v22, %v3001_v8  ;;  %v3044_v40 = vadd.f32 %v3043_v14, %v3042_v57 }
 0x119   : > { %v1086_v10 = vadd.f32 %v3044_v40, %v3004_v18 }
 0x11a   : > { %v3005_v0 = vpop.f32.mrb[12].mxu0 }
 0x11b   : > { %v3006_v41 = vpop.f32.mrb[13].mxu0 }
 0x11c   : > { %v3007_v34 = vadd.f32 %v3006_v41, %v3005_v0  ;;  %v3008_v54 = vpop.f32.mrb[14].mxu0 }
 0x11d   : > { %v3009_v36 = vpop.f32.mrb[15].mxu0 }
 0x11e   : > { %v3010_v20 = vadd.f32 %v3009_v36, %v3008_v54 }
 0x11f   : > { %v3045_v47 = vpop.f32.mrb[12].mxu1 }
 0x120   : > { %v3046_v52 = vpop.f32.mrb[13].mxu1 }
 0x121   : > { %v3047_v19 = vadd.f32 %v3046_v52, %v3045_v47  ;;  %v3048_v24 = vpop.f32.mrb[14].mxu1 }
 0x122   : > { %v3049_v29 = vpop.f32.mrb[15].mxu1  ;;  %v3067_v49 = vpop.f32.mrb[16].mxu0 }
 0x123   : > { %v1091_v16 = vadd.f32 %v3047_v19, %v3007_v34  ;;  %v3050_v2 = vadd.f32 %v3049_v29, %v3048_v24  ;;  %v3068_v3 = vpop.f32.mrb[17].mxu0 }
 0x124   : > { %v3069_v13 = vadd.f32 %v3068_v3, %v3067_v49  ;;  %v3070_v26 = vpop.f32.mrb[18].mxu0 }
 0x125   : > { %v1094_v6 = vadd.f32 %v3050_v2, %v3010_v20  ;;  %v3071_v37 = vpop.f32.mrb[19].mxu0 }
 0x126   : > { %v1404_v30 = vadd.f32 %v3069_v13, %v1067_v9  ;;  %v3072_v5 = vadd.f32 %v3071_v37, %v3070_v26 }
 0x127   : > { %v3107_v17 = vpop.f32.mrb[16].mxu1 }
 0x128   : > { %v3108_v63 = vpop.f32.mrb[17].mxu1  ;;  %v1407_v48 = vadd.f32 %v3072_v5, %v1070_v33 }
 0x129   : > { %v3109_v44 = vadd.f32 %v3108_v63, %v3107_v17  ;;  %v3110_v7 = vpop.f32.mrb[18].mxu1 }
 0x12a   : > { %v3111_v39 = vpop.f32.mrb[19].mxu1  ;;  %v3073_v46 = vpop.f32.mrb[20].mxu0 }
 0x12b   : > { %v4266_v56 = vadd.f32 %v3109_v44, %v1404_v30  ;;  %v3112_v25 = vadd.f32 %v3111_v39, %v3110_v7  ;;  %v3074_v53 = vpop.f32.mrb[21].mxu0 }
 0x12c   : > { %v3075_v35 = vadd.f32 %v3074_v53, %v3073_v46  ;;  %v3076_v27 = vpop.f32.mrb[22].mxu0 }
 0x12d   : > { %v4268_v51 = vadd.f32 %v3112_v25, %v1407_v48  ;;  %v3077_v58 = vpop.f32.mrb[23].mxu0 }
 0x12e   : > { %v1412_v32 = vadd.f32 %v3075_v35, %v1075_v43  ;;  %v3078_v21 = vadd.f32 %v3077_v58, %v3076_v27 }
 0x12f   : > { %v3113_v60 = vpop.f32.mrb[20].mxu1 }
 0x130   : > { %v3114_v9 = vpop.f32.mrb[21].mxu1  ;;  %v1415_v50 = vadd.f32 %v3078_v21, %v1078_v4 }
 0x131   : > { %v3115_v31 = vadd.f32 %v3114_v9, %v3113_v60  ;;  %v3116_v59 = vpop.f32.mrb[22].mxu1 }
 0x132   : > { %v3117_v1 = vpop.f32.mrb[23].mxu1  ;;  %v3079_v38 = vpop.f32.mrb[24].mxu0 }
 0x133   : > { %v4270_v33 = vadd.f32 %v3115_v31, %v1412_v32  ;;  %v3118_v28 = vadd.f32 %v3117_v1, %v3116_v59  ;;  %v3080_v42 = vpop.f32.mrb[25].mxu0 }
 0x134   : > { %v3081_v55 = vadd.f32 %v3080_v42, %v3079_v38  ;;  %v3082_v61 = vpop.f32.mrb[26].mxu0 }
 0x135   : > { %v4272_v11 = vadd.f32 %v3118_v28, %v1415_v50  ;;  %v3083_v8 = vpop.f32.mrb[27].mxu0 }
 0x136   : > { %v1420_v15 = vadd.f32 %v3081_v55, %v1083_v45  ;;  %v3084_v62 = vadd.f32 %v3083_v8, %v3082_v61 }
 0x137   : > { %v3119_v12 = vpop.f32.mrb[24].mxu1 }
 0x138   : > { %v3120_v43 = vpop.f32.mrb[25].mxu1  ;;  %v1423_v22 = vadd.f32 %v3084_v62, %v1086_v10 }
 0x139   : > { %v3121_v18 = vadd.f32 %v3120_v43, %v3119_v12  ;;  %v3122_v23 = vpop.f32.mrb[26].mxu1 }
 0x13a   : > { %v3123_v57 = vpop.f32.mrb[27].mxu1  ;;  %v3085_v40 = vpop.f32.mrb[28].mxu0 }
 0x13b   : > { %v4274_v4 = vadd.f32 %v3121_v18, %v1420_v15  ;;  %v3124_v14 = vadd.f32 %v3123_v57, %v3122_v23  ;;  %v3086_v0 = vpop.f32.mrb[29].mxu0 }
 0x13c   : > { %v3087_v34 = vadd.f32 %v3086_v0, %v3085_v40  ;;  %v3088_v54 = vpop.f32.mrb[30].mxu0 }
 0x13d   : > { %v4276_v41 = vadd.f32 %v3124_v14, %v1423_v22  ;;  %v3089_v36 = vpop.f32.mrb[31].mxu0 }
 0x13e   : > { %v1428_v20 = vadd.f32 %v3087_v34, %v1091_v16  ;;  %v3090_v52 = vadd.f32 %v3089_v36, %v3088_v54 }
 0x13f   : > { %v3125_v47 = vpop.f32.mrb[28].mxu1 }
 0x140   : > { %v3126_v45 = vpop.f32.mrb[29].mxu1  ;;  %v1431_v29 = vadd.f32 %v3090_v52, %v1094_v6 }
 0x141   : > { %v3127_v19 = vadd.f32 %v3126_v45, %v3125_v47  ;;  %v3128_v24 = vpop.f32.mrb[30].mxu1 }
 0x142   : > { %v3129_v2 = vpop.f32.mrb[31].mxu1  ;;  %v3147_v3 = vpop.f32.mrb[32].mxu0 }
 0x143   : > { %v4278_v10 = vadd.f32 %v3127_v19, %v1428_v20  ;;  %v3130_v49 = vadd.f32 %v3129_v2, %v3128_v24  ;;  %v3148_v13 = vpop.f32.mrb[33].mxu0 }
 0x144   : > { %v3149_v37 = vadd.f32 %v3148_v13, %v3147_v3  ;;  %v3150_v17 = vpop.f32.mrb[34].mxu0 }
 0x145   : > { %v4280_v26 = vadd.f32 %v3130_v49, %v1431_v29  ;;  %v3151_v30 = vpop.f32.mrb[35].mxu0 }
 0x146   : > { %v3152_v63 = vadd.f32 %v3151_v30, %v3150_v17 }
 0x147   : > { %v3187_v5 = vpop.f32.mrb[32].mxu1 }
 0x148   : > { %v3188_v44 = vpop.f32.mrb[33].mxu1 }
 0x149   : > { %v3189_v16 = vadd.f32 %v3188_v44, %v3187_v5  ;;  %v3190_v7 = vpop.f32.mrb[34].mxu1 }
 0x14a   : > { %v3191_v48 = vpop.f32.mrb[35].mxu1  ;;  %v3153_v6 = vpop.f32.mrb[36].mxu0 }
 0x14b   : > { %v1894_v39 = vadd.f32 %v3189_v16, %v3149_v37  ;;  %v3192_v25 = vadd.f32 %v3191_v48, %v3190_v7  ;;  %v3154_v46 = vpop.f32.mrb[37].mxu0 }
 0x14c   : > { %v3155_v27 = vadd.f32 %v3154_v46, %v3153_v6  ;;  %v3156_v58 = vpop.f32.mrb[38].mxu0 }
 0x14d   : > { %v4283_v53 = vadd.f32 %v1894_v39, %v4266_v56  ;;  %v1897_v35 = vadd.f32 %v3192_v25, %v3152_v63  ;;  %v3157_v60 = vpop.f32.mrb[39].mxu0 }
 0x14e   : > { %v3158_v9 = vadd.f32 %v3157_v60, %v3156_v58 }
 0x14f   : > { %v4286_v32 = vadd.f32 %v1897_v35, %v4268_v51  ;;  %v3193_v21 = vpop.f32.mrb[36].mxu1 }
 0x150   : > { %v3194_v31 = vpop.f32.mrb[37].mxu1 }
 0x151   : > { %v3195_v59 = vadd.f32 %v3194_v31, %v3193_v21  ;;  %v3196_v50 = vpop.f32.mrb[38].mxu1 }
 0x152   : > { %v3197_v1 = vpop.f32.mrb[39].mxu1  ;;  %v3159_v42 = vpop.f32.mrb[40].mxu0 }
 0x153   : > { %v1902_v28 = vadd.f32 %v3195_v59, %v3155_v27  ;;  %v3198_v38 = vadd.f32 %v3197_v1, %v3196_v50  ;;  %v3160_v55 = vpop.f32.mrb[41].mxu0 }
 0x154   : > { %v3161_v8 = vadd.f32 %v3160_v55, %v3159_v42  ;;  %v3162_v12 = vpop.f32.mrb[42].mxu0 }
 0x155   : > { %v4289_v56 = vadd.f32 %v1902_v28, %v4270_v33  ;;  %v1905_v61 = vadd.f32 %v3198_v38, %v3158_v9  ;;  %v3163_v15 = vpop.f32.mrb[43].mxu0 }
 0x156   : > { %v3164_v43 = vadd.f32 %v3163_v15, %v3162_v12 }
 0x157   : > { %v4292_v51 = vadd.f32 %v1905_v61, %v4272_v11  ;;  %v3199_v62 = vpop.f32.mrb[40].mxu1 }
 0x158   : > { %v3200_v18 = vpop.f32.mrb[41].mxu1 }
 0x159   : > { %v3201_v23 = vadd.f32 %v3200_v18, %v3199_v62  ;;  %v3202_v22 = vpop.f32.mrb[42].mxu1 }
 0x15a   : > { %v3203_v57 = vpop.f32.mrb[43].mxu1  ;;  %v3165_v0 = vpop.f32.mrb[44].mxu0 }
 0x15b   : > { %v1910_v14 = vadd.f32 %v3201_v23, %v3161_v8  ;;  %v3204_v40 = vadd.f32 %v3203_v57, %v3202_v22  ;;  %v3166_v34 = vpop.f32.mrb[45].mxu0 }
 0x15c   : > { %v3167_v36 = vadd.f32 %v3166_v34, %v3165_v0  ;;  %v3168_v47 = vpop.f32.mrb[46].mxu0 }
 0x15d   : > { %v4295_v33 = vadd.f32 %v1910_v14, %v4274_v4  ;;  %v1913_v54 = vadd.f32 %v3204_v40, %v3164_v43  ;;  %v3169_v20 = vpop.f32.mrb[47].mxu0 }
 0x15e   : > { %v3170_v45 = vadd.f32 %v3169_v20, %v3168_v47 }
 0x15f   : > { %v4298_v11 = vadd.f32 %v1913_v54, %v4276_v41  ;;  %v3205_v52 = vpop.f32.mrb[44].mxu1 }
 0x160   : > { %v3206_v19 = vpop.f32.mrb[45].mxu1 }
 0x161   : > { %v3207_v24 = vadd.f32 %v3206_v19, %v3205_v52  ;;  %v3208_v29 = vpop.f32.mrb[46].mxu1 }
 0x162   : > { %v3209_v2 = vpop.f32.mrb[47].mxu1  ;;  %v3227_v13 = vpop.f32.mrb[48].mxu0 }
 0x163   : > { %v1918_v49 = vadd.f32 %v3207_v24, %v3167_v36  ;;  %v3210_v3 = vadd.f32 %v3209_v2, %v3208_v29  ;;  %v3228_v37 = vpop.f32.mrb[49].mxu0 }
 0x164   : > { %v3229_v30 = vadd.f32 %v3228_v37, %v3227_v13  ;;  %v3230_v5 = vpop.f32.mrb[50].mxu0 }
 0x165   : > { %v4301_v4 = vadd.f32 %v1918_v49, %v4278_v10  ;;  %v1921_v17 = vadd.f32 %v3210_v3, %v3170_v45  ;;  %v3231_v63 = vpop.f32.mrb[51].mxu0  ;;  %v4309_v10 = vld [vmem:[%s4349_s3] ss:$0 sm:$0xff] }
 0x166   : > { %v3232_v16 = vadd.f32 %v3231_v63, %v3230_v5 }
 0x167   : > { %v4304_v41 = vadd.f32 %v1921_v17, %v4280_v26  ;;  %v3267_v44 = vpop.f32.mrb[48].mxu1 }
 0x168   : > { %v3268_v7 = vpop.f32.mrb[49].mxu1 }
 0x169   : > { %v3269_v48 = vadd.f32 %v3268_v7, %v3267_v44  ;;  %v3270_v39 = vpop.f32.mrb[50].mxu1 }
 0x16a   : > { %v3271_v25 = vpop.f32.mrb[51].mxu1  ;;  %v3233_v35 = vpop.f32.mrb[52].mxu0 }
 0x16b   : > { %v2353_v6 = vadd.f32 %v3269_v48, %v3229_v30  ;;  %v3272_v46 = vadd.f32 %v3271_v25, %v3270_v39  ;;  %v3234_v27 = vpop.f32.mrb[53].mxu0 }
 0x16c   : > { %v3235_v60 = vadd.f32 %v3234_v27, %v3233_v35  ;;  %v3236_v21 = vpop.f32.mrb[54].mxu0 }
 0x16d   : > { %v2383_v58 = vadd.f32 %v2353_v6, %v4283_v53  ;;  %v2356_v26 = vadd.f32 %v3272_v46, %v3232_v16  ;;  %v3237_v9 = vpop.f32.mrb[55].mxu0 }
 0x16e   : > { %v3238_v1 = vadd.f32 %v3237_v9, %v3236_v21 }
 0x16f   : > { %v2398_v31 = vadd.f32 %v4309_v10, %v2383_v58  ;;  %v2384_v59 = vadd.f32 %v2356_v26, %v4286_v32  ;;  %v3273_v50 = vpop.f32.mrb[52].mxu1 }
 0x170   : > { %v3274_v28 = vpop.f32.mrb[53].mxu1 }
 0x171   : > { %v2406_v38 = vmul.f32 0.2, %v2398_v31  ;;  %v2399_v42 = vadd.f32 %v4309_v10, %v2384_v59  ;;  %v3275_v55 = vadd.f32 %v3274_v28, %v3273_v50  ;;  %v3276_v61 = vpop.f32.mrb[54].mxu1 }
 0x172   : > { %v3277_v8 = vpop.f32.mrb[55].mxu1  ;;  %v3239_v62 = vpop.f32.mrb[56].mxu0 }
 0x173   : > { %v2407_v12 = vmul.f32 0.2, %v2399_v42  ;;  %v2361_v53 = vadd.f32 %v3275_v55, %v3235_v60  ;;  %v3278_v15 = vadd.f32 %v3277_v8, %v3276_v61  ;;  %v2414_v43 = vmax.f32 %v2398_v31, %v2406_v38  ;;  %v3240_v18 = vpop.f32.mrb[57].mxu0 }
 0x174   : > { %v3241_v57 = vadd.f32 %v3240_v18, %v3239_v62  ;;  %v3242_v14 = vpop.f32.mrb[58].mxu0 }
 0x175   : > { %v2415_v23 = vmax.f32 %v2399_v42, %v2407_v12  ;;  %v2385_v22 = vadd.f32 %v2361_v53, %v4289_v56  ;;  %v2364_v32 = vadd.f32 %v3278_v15, %v3238_v1  ;;  %v3243_v40 = vpop.f32.mrb[59].mxu0 }
 0x176   : > { %v3244_v47 = vadd.f32 %v3243_v40, %v3242_v14 }
 0x177   : > { %v2951_v0 = vpack.c.bf16 %v2415_v23, %v2414_v43  ;;  %v2400_v34 = vadd.f32 %v4309_v10, %v2385_v22  ;;  %v2386_v54 = vadd.f32 %v2364_v32, %v4292_v51  ;;  %v3279_v36 = vpop.f32.mrb[56].mxu1 }
 0x178   : > { %v3280_v20 = vpop.f32.mrb[57].mxu1 }
 0x179   : > { %2952 = vst [vmem:[%s4320_s7] sm:$0xff] %v2951_v0   ;;  %v2408_v56 = vmul.f32 0.2, %v2400_v34  ;;  %v2401_v52 = vadd.f32 %v4309_v10, %v2386_v54  ;;  %v3281_v45 = vadd.f32 %v3280_v20, %v3279_v36  ;;  %v3282_v19 = vpop.f32.mrb[58].mxu1 }
 0x17a   : > { %v3283_v24 = vpop.f32.mrb[59].mxu1  ;;  %v3245_v3 = vpop.f32.mrb[60].mxu0 }
 0x17b   : > { %v2409_v29 = vmul.f32 0.2, %v2401_v52  ;;  %v2369_v2 = vadd.f32 %v3281_v45, %v3241_v57  ;;  %v3284_v49 = vadd.f32 %v3283_v24, %v3282_v19  ;;  %v2416_v13 = vmax.f32 %v2400_v34, %v2408_v56  ;;  %v3246_v37 = vpop.f32.mrb[61].mxu0 }
 0x17c   : > { %v3247_v5 = vadd.f32 %v3246_v37, %v3245_v3  ;;  %v3248_v63 = vpop.f32.mrb[62].mxu0 }
 0x17d   : > { %v2417_v17 = vmax.f32 %v2401_v52, %v2409_v29  ;;  %v2387_v51 = vadd.f32 %v2369_v2, %v4295_v33  ;;  %v2372_v30 = vadd.f32 %v3284_v49, %v3244_v47  ;;  %v3249_v44 = vpop.f32.mrb[63].mxu0 }
 0x17e   : > { %v3250_v25 = vadd.f32 %v3249_v44, %v3248_v63 }
 0x17f   : > { %v2956_v16 = vpack.c.bf16 %v2417_v17, %v2416_v13  ;;  %v2402_v7 = vadd.f32 %v4309_v10, %v2387_v51  ;;  %v2388_v48 = vadd.f32 %v2372_v30, %v4298_v11  ;;  %v3285_v39 = vpop.f32.mrb[60].mxu1 }
 0x180   : > { %v3286_v6 = vpop.f32.mrb[61].mxu1 }
 0x181   : > { %2968 = vst [vmem:[%s4320_s7 + $0x8] sm:$0xff] %v2956_v16   ;;  %v2410_v46 = vmul.f32 0.2, %v2402_v7  ;;  %v2403_v35 = vadd.f32 %v4309_v10, %v2388_v48  ;;  %v3287_v27 = vadd.f32 %v3286_v6, %v3285_v39  ;;  %v3288_v58 = vpop.f32.mrb[62].mxu1 }
 0x182   : > { %v3289_v33 = vpop.f32.mrb[63].mxu1 }
 0x183   : > { %v2411_v26 = vmul.f32 0.2, %v2403_v35  ;;  %v2377_v60 = vadd.f32 %v3287_v27, %v3247_v5  ;;  %v3290_v21 = vadd.f32 %v3289_v33, %v3288_v58  ;;  %v2418_v9 = vmax.f32 %v2402_v7, %v2410_v46 }
 0x185   : > { %v2419_v31 = vmax.f32 %v2403_v35, %v2411_v26  ;;  %v2389_v59 = vadd.f32 %v2377_v60, %v4301_v4  ;;  %v2380_v11 = vadd.f32 %v3290_v21, %v3250_v25 }
 0x187   : > { %v2961_v50 = vpack.c.bf16 %v2419_v31, %v2418_v9  ;;  %v2404_v1 = vadd.f32 %v4309_v10, %v2389_v59  ;;  %v2390_v28 = vadd.f32 %v2380_v11, %v4304_v41 }
 0x189   : > { %2969 = vst [vmem:[%s4320_s7 + $0x10] sm:$0xff] %v2961_v50   ;;  %v2412_v38 = vmul.f32 0.2, %v2404_v1  ;;  %v2405_v42 = vadd.f32 %v4309_v10, %v2390_v28 }
 0x18b   : > { %v2413_v55 = vmul.f32 0.2, %v2405_v42  ;;  %v2420_v61 = vmax.f32 %v2404_v1, %v2412_v38 }
 0x18d   : > { %v2421_v8 = vmax.f32 %v2405_v42, %v2413_v55 }
 0x18f   : > { %v2966_v12 = vpack.c.bf16 %v2421_v8, %v2420_v61 }
 0x191   : > { %2970 = vst [vmem:[%s4320_s7 + $0x18] sm:$0xff] %v2966_v12  }
 0x192 PF: > { %s14_s17 = sadd.s32 1, %s3468_s17   ;;  %s4355_s15 = smov %s3464_s16 }
 0x193   : > { %p11_p5 = scmp.ge.s32.totalorder %s14_s17, 4   ;;  %s4356_s16 = smov %s4358_s18 }
 0x195   :  { %13 = sbr.rel (!%p11_p5) target bundleno = 2 (0x2), region = 72 }

// kernel: fc_discriminator_forward.7
= control target key start
LH: loop header
LB: loop body
LE: loop exit
PB: predicated region body
PF: predicated region fallthrough
CT: control target
= control target key end

     0   :  { %s2883_s15 = smov 0   ;;  %s2885_s16 = smov 0   ;;  %s3472_s0 = inlined_call_operand.vmem [shape: bf16[2,5,5,512], index: 0, kind: input, shape index: {}, may-alias: {0,1}]   ;;  %s3473_s1 = inlined_call_operand.vmem [shape: bf16[2,5,5,512], index: 1, kind: input, shape index: {}, may-alias: {0,1}]   ;;  %s3474_s2 = inlined_call_operand.vmem [shape: bf16[4,512,128], index: 2, kind: input, shape index: {}]   ;;  %s3475_s3 = inlined_call_operand.vmem [shape: f32[1,128], index: 3, kind: input, shape index: {}]   ;;  %s3476_s4 = inlined_call_operand.vmem [shape: bf16[2,4,4,128], index: 4, kind: output, shape index: {}]  }
   0x1   :  { %s2887_s17 = smov 0  }
   0x2 LB: > { %s26_s18 = sadd.s32 1, %s2851_s16  ;;  %p2152_p0 = scmp.ge.s32.totalorder %s2855_s17, 1  ;;  %s2855_s17 = sphi %s2887_s17, %s14_s17   ;;  %s2851_s16 = sphi %s2885_s16, %s3482_s16   ;;  %s2847_s15 = sphi %s2883_s15, %s3481_s15  }
   0x3   : > { %p28_p1 = scmp.ge.s32.totalorder %s26_s18, 2  ;;  %p218_p2 = scmp.lt.s32.totalorder %s2855_s17, 3 }
   0x5   : > { %s3484_s18 = smov (%p28_p1, %s26_s18), 0  ;;  %p219_p3 = pnand %p2152_p0, %p218_p2 }
   0x6   : > { %v2705_v0 = vld [vmem:[%s3474_s2 + $0x140] sm:$0xff] (!%p219_p3)   ;;  %p275_p4 = scmp.lt.s32.totalorder (!%p219_p3), %s2847_s15, 1  ;;  %v2709_v4 = vld [vmem:[%s3474_s2 + $0x148] sm:$0xff] (!%p219_p3)   ;;  %v2713_v8 = vld [vmem:[%s3474_s2 + $0x150] sm:$0xff] (!%p219_p3)   ;;  %vm460_vm0 = vsmask.f32 (!%p219_p3), 1280  ;;  %v595_v56 = vlaneseq (!%p219_p3) }
   0x7   : > { %222 = sbr.rel (%p219_p3) target bundleno = 374 (0x176), region = 36  ;;  %v2706_v1 = vld [vmem:[%s3474_s2 + $0x1c0] sm:$0xff] (!%p219_p3)   ;;  %2501 = vmatprep.subr.bf16.mxu0 (!%p219_p3), %v2705_v0  ;;  %v2710_v5 = vld [vmem:[%s3474_s2 + $0x1c8] sm:$0xff] (!%p219_p3)   ;;  %v2714_v9 = vld [vmem:[%s3474_s2 + $0x1d0] sm:$0xff] (!%p219_p3)   ;;  %vm461_vm1 = vsmask.f32 (!%p219_p3), 3336 }
   0x8   : > { %v2707_v2 = vld [vmem:[%s3474_s2 + $0x100] sm:$0xff] (!%p219_p3)   ;;  %2523 = vmatprep.subr.bf16.mxu1 (!%p219_p3), %v2706_v1  ;;  %v2711_v6 = vld [vmem:[%s3474_s2 + $0x108] sm:$0xff] (!%p219_p3)   ;;  %v2715_v10 = vld [vmem:[%s3474_s2 + $0x110] sm:$0xff] (!%p219_p3)   ;;  %vm463_vm2 = vsmask.f32 (!%p219_p3), 5392 }
   0x9   : > { %v2708_v3 = vld [vmem:[%s3474_s2 + $0x180] sm:$0xff] (!%p219_p3)   ;;  %2502 = vmatpush3.bf16.msra.mxu0 (!%p219_p3), %v2707_v2  ;;  %v2712_v7 = vld [vmem:[%s3474_s2 + $0x188] sm:$0xff] (!%p219_p3)   ;;  %v2716_v11 = vld [vmem:[%s3474_s2 + $0x190] sm:$0xff] (!%p219_p3)   ;;  %vm465_vm3 = vsmask.f32 (!%p219_p3), 7448 }
   0xa   : > { %2524 = vmatpush3.bf16.msra.mxu1 (!%p219_p3), %v2708_v3  ;;  %2503 = vmatprep.subr.bf16.mxu0 (!%p219_p3), %v2709_v4  ;;  %v2717_v12 = vld [vmem:[%s3474_s2 + $0x158] sm:$0xff] (!%p219_p3)   ;;  %v2721_v16 = vld [vmem:[%s3474_s2 + $0x160] sm:$0xff] (!%p219_p3)   ;;  %v2725_v20 = vld [vmem:[%s3474_s2 + $0x168] sm:$0xff] (!%p219_p3)  }
   0xb   : > { %2525 = vmatprep.subr.bf16.mxu1 (!%p219_p3), %v2710_v5  ;;  %v2718_v13 = vld [vmem:[%s3474_s2 + $0x1d8] sm:$0xff] (!%p219_p3)   ;;  %v2722_v17 = vld [vmem:[%s3474_s2 + $0x1e0] sm:$0xff] (!%p219_p3)   ;;  %v2726_v21 = vld [vmem:[%s3474_s2 + $0x1e8] sm:$0xff] (!%p219_p3)  }
   0xc   : > { %v2719_v14 = vld [vmem:[%s3474_s2 + $0x118] sm:$0xff] (!%p219_p3)   ;;  %v2723_v18 = vld [vmem:[%s3474_s2 + $0x120] sm:$0xff] (!%p219_p3)   ;;  %v2727_v22 = vld [vmem:[%s3474_s2 + $0x128] sm:$0xff] (!%p219_p3)  }
   0xd   : > { %2504 = vmatpush3.bf16.msra.mxu0 (!%p219_p3), %v2711_v6  ;;  %v2720_v15 = vld [vmem:[%s3474_s2 + $0x198] sm:$0xff] (!%p219_p3)   ;;  %v2724_v19 = vld [vmem:[%s3474_s2 + $0x1a0] sm:$0xff] (!%p219_p3)   ;;  %v2728_v23 = vld [vmem:[%s3474_s2 + $0x1a8] sm:$0xff] (!%p219_p3)  }
   0xe   : > { %s3486_s15 = smov (!%p275_p4, %s2847_s15), 1  ;;  %2526 = vmatpush3.bf16.msra.mxu1 %v2712_v7  ;;  %2505 = vmatprep.subr.bf16.mxu0 %v2713_v8  ;;  %v2729_v24 = vld [vmem:[%s3474_s2 + $0x170] sm:$0xff]   ;;  %v2733_v28 = vld [vmem:[%s3474_s2 + $0x178] sm:$0xff]   ;;  %vm462_vm4 = vmor %vm460_vm0, %vm461_vm1 }
   0xf   : > { %2527 = vmatprep.subr.bf16.mxu1 %v2714_v9  ;;  %v2730_v25 = vld [vmem:[%s3474_s2 + $0x1f0] sm:$0xff]   ;;  %s2677_s27 = smul.u32 80, %s3486_s15  ;;  %v2734_v29 = vld [vmem:[%s3474_s2 + $0x1f8] sm:$0xff]   ;;  %v2737_v45 = vld [vmem:[%s3474_s2 + $0x40] sm:$0xff]  }
  0x10   : > { %v2731_v26 = vld [vmem:[%s3474_s2 + $0x130] sm:$0xff]   ;;  %v2735_v30 = vld [vmem:[%s3474_s2 + $0x138] sm:$0xff]   ;;  %vm3049_vm5 = vmor %vm462_vm4, %vm463_vm2 }
  0x11   : > { %2506 = vmatpush3.bf16.msra.mxu0 %v2715_v10  ;;  %v2732_v27 = vld [vmem:[%s3474_s2 + $0x1b0] sm:$0xff]   ;;  %s2999_s12 = scalar_lea.vmem %s3472_s0, %s2677_s27  ;;  %v2736_v31 = vld [vmem:[%s3474_s2 + $0x1b8] sm:$0xff]   ;;  %v2738_v62 = vld [vmem:[%s3474_s2 + $0xc0] sm:$0xff]  }
  0x12   : > { %2528 = vmatpush3.bf16.msra.mxu1 %v2716_v11  ;;  %2507 = vmatprep.subr.bf16.mxu0 %v2717_v12  ;;  %v3008_v32 = vld.sshfl [vmem:[%s2999_s12] sm:$0x5f pattern:$0x76325410]  ;;  %vm3065_vm6 = vmor %vm3049_vm5, %vm465_vm3 }
  0x13   : > { %2529 = vmatprep.subr.bf16.mxu1 %v2718_v13  ;;  %v3011_v33 = vld.sshfl [vmem:[%s2999_s12 + $0x8] sm:$0x5f pattern:$0x76325410] }
  0x14   : > { %v3014_v34 = vld.sshfl [vmem:[%s2999_s12 + $0x10] sm:$0x5f pattern:$0x76325410]  ;;  %v346_v35 = vcombine.low %v3008_v32, %v3011_v33  ;;  %v456_v36 = vcombine.high %v3008_v32, %v3011_v33 }
  0x15   : > { %2508 = vmatpush3.bf16.msra.mxu0 %v2719_v14  ;;  %v3021_v37 = vld.sshfl [vmem:[%s2999_s12 + $0x18] sm:$0x5f pattern:$0x76325410] }
  0x16   : > { %2530 = vmatpush3.bf16.msra.mxu1 %v2720_v15  ;;  %2509 = vmatprep.subr.bf16.mxu0 %v2721_v16  ;;  %v3024_v38 = vld.sshfl [vmem:[%s2999_s12 + $0x20] sm:$0x5f pattern:$0x76325410]  ;;  %v361_v39 = vcombine.low %v3014_v34, %v3021_v37  ;;  %v468_v40 = vshrl.u32 %v346_v35, 16  ;;  %v471_v41 = vshll.u32 %v346_v35, 16  ;;  %v457_v43 = vcombine.high %v3014_v34, %v3021_v37 }
  0x17   : > { %2531 = vmatprep.subr.bf16.mxu1 %v2722_v17  ;;  %v3029_v42 = vld.sshfl [vmem:[%s2999_s12 + $0x28] sm:$0x5f pattern:$0x76325410]  ;;  %v477_v44 = vshll.u32 %v456_v36, 16  ;;  %v2363_v46 = vcombine.low %v3014_v34, %v3024_v38 }
  0x18   : > { %v3039_v47 = vld.sshfl [vmem:[%s2999_s12 + $0x30] sm:$0x5f pattern:$0x76325410]  ;;  %v376_v48 = vcombine.low %v3024_v38, %v3029_v42  ;;  %v458_v49 = vcombine.high %v3024_v38, %v3029_v42  ;;  %v470_v50 = vrot.slane %v468_v40, 6  ;;  %v473_v51 = vrot.slane %v471_v41, 7 }
  0x19   : > { %2510 = vmatpush3.bf16.msra.mxu0 %v2723_v18  ;;  %v3046_v52 = vld.sshfl [vmem:[%s2999_s12 + $0x38] sm:$0x5f pattern:$0x76325410]  ;;  %v479_v54 = vrot.slane %v477_v44, 7  ;;  %v482_v55 = vshrl.u32 %v361_v39, 16  ;;  %v2364_v57 = vcombine.low %v3021_v37, %v3029_v42 }
  0x1a   : > { %2532 = vmatpush3.bf16.msra.mxu1 %v2724_v19  ;;  %2511 = vmatprep.subr.bf16.mxu0 %v2725_v20  ;;  %v391_v58 = vcombine.low %v3039_v47, %v3046_v52  ;;  %v459_v59 = vcombine.high %v3039_v47, %v3046_v52  ;;  %v474_v60 = vor.u32 %v473_v51, %v470_v50  ;;  %v485_v61 = vshll.u32 %v361_v39, 16  ;;  %s2499_s12 = sadd.s32 64, %s2677_s27  ;;  %s2500_s27 = sshll.u32 %s3486_s15, 3 }
  0x1b   : > { %2533 = vmatprep.subr.bf16.mxu1 %v2726_v21  ;;  %v484_v63 = vrot.slane %v482_v55, 6  ;;  %v491_v0 = vshll.u32 %v457_v43, 16  ;;  %v496_v1 = vshrl.u32 %v376_v48, 16  ;;  %v499_v2 = vshll.u32 %v376_v48, 16  ;;  %v2739_v55 = vld [vmem:[%s3474_s2] sm:$0xff]   ;;  %s300_s25 = scalar_lea.vmem %s3473_s1, %s2499_s12  ;;  %s311_s29 = scalar_lea.vmem %s3476_s4, %s2500_s27 }
  0x1c   : > { %v475_v3 = vrot.slane %v474_v60, 2  ;;  %v487_v4 = vrot.slane %v485_v61, 7  ;;  %v505_v5 = vshll.u32 %v458_v49, 16  ;;  %v510_v6 = vshrl.u32 %v391_v58, 16 }
  0x1d   : > { %2512 = vmatpush3.bf16.msra.mxu0 %v2727_v22  ;;  %v498_v8 = vrot.slane %v496_v1, 6  ;;  %v501_v9 = vrot.slane %v499_v2, 7  ;;  %v513_v10 = vshll.u32 %v391_v58, 16  ;;  %v493_v12 = vrot.slane %v491_v0, 7  ;;  %v2741_v0 = vld [vmem:[%s3474_s2 + $0x48] sm:$0xff]  }
  0x1e   : > { %2534 = vmatpush3.bf16.msra.mxu1 %v2728_v23  ;;  %2513 = vmatprep.subr.bf16.mxu0 %v2729_v24  ;;  %v488_v11 = vor.u32 %v487_v4, %v484_v63  ;;  %v507_v13 = vrot.slane %v505_v5, 7  ;;  %v512_v14 = vrot.slane %v510_v6, 6  ;;  %v519_v17 = vshll.u32 %v459_v59, 16  ;;  %v2740_v59 = vld [vmem:[%s3474_s2 + $0x80] sm:$0xff]   ;;  %v2742_v1 = vld [vmem:[%s3474_s2 + $0xc8] sm:$0xff]   ;;  %v2745_v6 = vld [vmem:[%s3474_s2 + $0x50] sm:$0xff]  }
  0x1f   : > { %2535 = vmatprep.subr.bf16.mxu1 %v2730_v25  ;;  %v502_v15 = vor.u32 %v501_v9, %v498_v8  ;;  %v515_v16 = vrot.slane %v513_v10, 7  ;;  %v480_v18 = vsel %vm3065_vm6, %v475_v3, %v479_v54  ;;  %v2857_v20 = vmov 1983009808   ;;  %v2743_v2 = vld [vmem:[%s3474_s2 + $0x8] sm:$0xff]   ;;  %v2746_v8 = vld [vmem:[%s3474_s2 + $0xd0] sm:$0xff]  }
  0x20   : > { %v489_v19 = vrot.slane %v488_v11, 2  ;;  %v593_v21 = vunpack.c.l.s4 %v2857_v20  ;;  %v596_v22 = vshrl.u32 %v595_v56, 7  ;;  %v521_v25 = vrot.slane %v519_v17, 7  ;;  %v2744_v5 = vld [vmem:[%s3474_s2 + $0x88] sm:$0xff]   ;;  %v2747_v9 = vld [vmem:[%s3474_s2 + $0x10] sm:$0xff]   ;;  %v2749_v11 = vld [vmem:[%s3474_s2 + $0x58] sm:$0xff]  }
  0x21   : > { %2514 = vmatpush3.bf16.msra.mxu0 %v2731_v26  ;;  %v503_v23 = vrot.slane %v502_v15, 2  ;;  %v516_v24 = vor.u32 %v515_v16, %v512_v14  ;;  %v2261_v26 = vcombine.low %v3008_v32, %v3014_v34  ;;  %v2264_v40 = vcombine.low %v3029_v42, %v3046_v52  ;;  %v2748_v10 = vld [vmem:[%s3474_s2 + $0x90] sm:$0xff]   ;;  %v2752_v14 = vld [vmem:[%s3474_s2 + $0x98] sm:$0xff]   ;;  %v2753_v15 = vld [vmem:[%s3474_s2 + $0x60] sm:$0xff]  }
  0x22   : > { %2536 = vmatpush3.bf16.msra.mxu1 %v2732_v27  ;;  %2515 = vmatprep.subr.bf16.mxu0 %v2733_v28  ;;  %v3075_v27 = vsel %vm3065_vm6, %v489_v19, %v493_v12  ;;  %v594_v28 = vunpack.c.0.s8 %v593_v21  ;;  %v2750_v12 = vld [vmem:[%s3474_s2 + $0xd8] sm:$0xff]   ;;  %v2754_v16 = vld [vmem:[%s3474_s2 + $0xe0] sm:$0xff]   ;;  %v2757_v19 = vld [vmem:[%s3474_s2 + $0x68] sm:$0xff]  }
  0x23   : > { %2537 = vmatprep.subr.bf16.mxu1 %v2734_v29  ;;  %v2263_v29 = vcombine.low %v3024_v38, %v3039_v47  ;;  %v517_v35 = vrot.slane %v516_v24, 2  ;;  %v588_v36 = vcombine.low %v480_v18, %v3075_v27  ;;  %v589_v32 = vcombine.high %v480_v18, %v3075_v27  ;;  %v2755_v17 = vld [vmem:[%s3474_s2 + $0x20] sm:$0xff]   ;;  %v2758_v20 = vld [vmem:[%s3474_s2 + $0xe8] sm:$0xff]   ;;  %v2762_v24 = vld [vmem:[%s3474_s2 + $0xf0] sm:$0xff]  }
  0x24   : > { %v3087_v39 = vsub.s32 %v594_v28, %v596_v22  ;;  %v2756_v18 = vld [vmem:[%s3474_s2 + $0xa0] sm:$0xff]   ;;  %v2759_v21 = vld [vmem:[%s3474_s2 + $0x28] sm:$0xff]   ;;  %v2765_v28 = vld [vmem:[%s3474_s2 + $0x78] sm:$0xff]  }
  0x25   : > { %2516 = vmatpush3.bf16.msra.mxu0 %v2735_v30  ;;  %v2262_v30 = vcombine.low %v3011_v33, %v3021_v37  ;;  %v3097_v43 = vsel %vm3065_vm6, %v517_v35, %v521_v25  ;;  %v2760_v22 = vld [vmem:[%s3474_s2 + $0xa8] sm:$0xff]   ;;  %v2763_v25 = vld [vmem:[%s3474_s2 + $0x30] sm:$0xff]   ;;  %v2768_v35 = vld [vmem:[%s3474_s2 + $0xb8] sm:$0xff]  }
  0x26   : > { %2538 = vmatpush3.bf16.msra.mxu1 %v2736_v31  ;;  %2545 = vmatprep.subr.bf16.mxu0 %v2737_v45  ;;  %v3083_v31 = vsel %vm3065_vm6, %v503_v23, %v507_v13  ;;  %v598_v45 = vrot.slane %v588_v36, %v3087_v39  ;;  %v605_v49 = vrot.slane %v589_v32, %v3087_v39  ;;  %v2751_v13 = vld [vmem:[%s3474_s2 + $0x18] sm:$0xff]   ;;  %v2761_v23 = vld [vmem:[%s3474_s2 + $0x70] sm:$0xff]   ;;  %v2769_v36 = vld [vmem:[%s3474_s2 + $0x240] sm:$0xff]  }
  0x27   : > { %2567 = vmatprep.subr.bf16.mxu1 %v2738_v62  ;;  %v1694_v41 = vcombine.low %v3075_v27, %v3083_v31  ;;  %v1695_v33 = vcombine.high %v3075_v27, %v3083_v31  ;;  %v590_v44 = vcombine.low %v3083_v31, %v3097_v43  ;;  %v591_v48 = vcombine.high %v3083_v31, %v3097_v43  ;;  %v2770_v32 = vld [vmem:[%s3474_s2 + $0x2c0] sm:$0xff]   ;;  %v2796_v34 = vld [vmem:[%s3474_s2 + $0x2b0] sm:$0xff]   ;;  %v2797_v37 = vld [vmem:[%s3474_s2 + $0x278] sm:$0xff]  }
  0x28   : > { %v3106_v50 = vrot.slane %v2261_v26, %v3087_v39  ;;  %v3109_v51 = vrot.slane %v2263_v29, %v3087_v39  ;;  %v3117_v56 = vrot.slane %v2262_v30, %v3087_v39  ;;  %v3120_v58 = vrot.slane %v2264_v40, %v3087_v39  ;;  %v2764_v26 = vld [vmem:[%s3474_s2 + $0xb0] sm:$0xff]   ;;  %v2766_v29 = vld [vmem:[%s3474_s2 + $0xf8] sm:$0xff]   ;;  %v2771_v40 = vld [vmem:[%s3474_s2 + $0x200] sm:$0xff]  }
  0x29   : > { %v612_v53 = vrot.slane %v590_v44, %v3087_v39  ;;  %v619_v54 = vrot.slane %v591_v48, %v3087_v39  ;;  %v2767_v30 = vld [vmem:[%s3474_s2 + $0x38] sm:$0xff]   ;;  %v2772_v48 = vld [vmem:[%s3474_s2 + $0x280] sm:$0xff]   ;;  %v3359_v7 = vrot.slane %v1695_v33, %v3087_v39  ;;  %v2808_v27 = vld [vmem:[%s3474_s2 + $0x388] sm:$0xff]  }
  0x2a   : > { %v935_v3 = vcombine.high %v3106_v50, %v3109_v51  ;;  %v937_v4 = vcombine.high %v3117_v56, %v3120_v58  ;;  %v934_v44 = vcombine.low %v3106_v50, %v3109_v51  ;;  %v2775_v50 = vld [vmem:[%s3474_s2 + $0x208] sm:$0xff]   ;;  %v2809_v31 = vld [vmem:[%s3474_s2 + $0x350] sm:$0xff]  }
  0x2b   : > { %v621_v60 = vcombine.high %v598_v45, %v612_v53  ;;  %v623_v61 = vcombine.high %v605_v49, %v619_v54  ;;  %v620_v62 = vcombine.low %v598_v45, %v612_v53  ;;  %v622_v63 = vcombine.low %v605_v49, %v619_v54  ;;  %v2773_v49 = vld [vmem:[%s3474_s2 + $0x248] sm:$0xff]   ;;  %v2777_v54 = vld [vmem:[%s3474_s2 + $0x250] sm:$0xff]  }
  0x2c   : > { %v936_v45 = vcombine.low %v3117_v56, %v3120_v58  ;;  %v2774_v53 = vld [vmem:[%s3474_s2 + $0x2c8] sm:$0xff]   ;;  %v2779_v56 = vld [vmem:[%s3474_s2 + $0x210] sm:$0xff]  }
  0x2d   : > { %852 = vmatprep.mubr.bf16.mxu0 %v621_v60  ;;  %893 = vmatprep.mubr.bf16.mxu1 %v623_v61  ;;  %v2776_v51 = vld [vmem:[%s3474_s2 + $0x288] sm:$0xff]   ;;  %v2780_v58 = vld [vmem:[%s3474_s2 + $0x290] sm:$0xff]   ;;  %v2782_v60 = vld [vmem:[%s3474_s2 + $0x2d8] sm:$0xff]  }
  0x2e   : > { %853 = vmatmul.mubr.bf16.vlgmr.msra.gmra.mrb[0].mxu0 %v620_v62  ;;  %894 = vmatmul.mubr.bf16.vlgmr.msra.gmra.mrb[0].mxu1 %v622_v63  ;;  %v2783_v61 = vld [vmem:[%s3474_s2 + $0x218] sm:$0xff]   ;;  %v2785_v63 = vld [vmem:[%s3474_s2 + $0x260] sm:$0xff]  }
  0x2f   : > { %2546 = vmatpush3.bf16.msra.mxu0 %v2739_v55  ;;  %2568 = vmatpush3.bf16.msra.mxu1 %v2740_v59  ;;  %v2778_v55 = vld [vmem:[%s3474_s2 + $0x2d0] sm:$0xff]   ;;  %v2781_v59 = vld [vmem:[%s3474_s2 + $0x258] sm:$0xff]  }
  0x30   : > { %2547 = vmatprep.subr.bf16.mxu0 %v2741_v0  ;;  %2569 = vmatprep.subr.bf16.mxu1 %v2742_v1  ;;  %v2784_v62 = vld [vmem:[%s3474_s2 + $0x298] sm:$0xff]   ;;  %v2786_v0 = vld [vmem:[%s3474_s2 + $0x2e0] sm:$0xff]  }
  0x31   : > { %1166 = vmatprep.mubr.bf16.mxu0 %v935_v3  ;;  %1207 = vmatprep.mubr.bf16.mxu1 %v937_v4  ;;  %v2787_v1 = vld [vmem:[%s3474_s2 + $0x220] sm:$0xff]   ;;  %v2789_v3 = vld [vmem:[%s3474_s2 + $0x268] sm:$0xff]  }
  0x32   : > { %v2790_v4 = vld [vmem:[%s3474_s2 + $0x2e8] sm:$0xff]  }
  0x33   : > { %2548 = vmatpush3.bf16.msra.mxu0 %v2743_v2  ;;  %2570 = vmatpush3.bf16.msra.mxu1 %v2744_v5  ;;  %v2788_v2 = vld [vmem:[%s3474_s2 + $0x2a0] sm:$0xff]   ;;  %v2791_v5 = vld [vmem:[%s3474_s2 + $0x228] sm:$0xff]  }
  0x34   : > { %2549 = vmatprep.subr.bf16.mxu0 %v2745_v6  ;;  %2571 = vmatprep.subr.bf16.mxu1 %v2746_v8  ;;  %v2792_v6 = vld [vmem:[%s3474_s2 + $0x2a8] sm:$0xff]   ;;  %v2297_v8 = vld.sshfl [vmem:[%s300_s25] sm:$0x5f pattern:$0x76325410] }
  0x37   : > { %2550 = vmatpush3.bf16.msra.mxu0 %v2747_v9  ;;  %2572 = vmatpush3.bf16.msra.mxu1 %v2748_v10  ;;  %v2793_v9 = vld [vmem:[%s3474_s2 + $0x270] sm:$0xff]  }
  0x38   : > { %2551 = vmatprep.subr.bf16.mxu0 %v2749_v11  ;;  %2573 = vmatprep.subr.bf16.mxu1 %v2750_v12  ;;  %v2794_v10 = vld [vmem:[%s3474_s2 + $0x2f0] sm:$0xff]   ;;  %v2365_v11 = vcombine.low %v3039_v47, %v2297_v8  ;;  %v1308_v12 = vrot.slane %v2363_v46, %v3087_v39 }
  0x39   : > { %v2795_v47 = vld [vmem:[%s3474_s2 + $0x230] sm:$0xff]  }
  0x3a   : > { %v1322_v38 = vrot.slane %v2365_v11, %v3087_v39  ;;  %v2827_v11 = vld [vmem:[%s3474_s2 + $0x330] sm:$0xff]  }
  0x3b   : > { %2552 = vmatpush3.bf16.msra.mxu0 %v2751_v13  ;;  %2574 = vmatpush3.bf16.msra.mxu1 %v2752_v14  ;;  %v2298_v13 = vld.sshfl [vmem:[%s300_s25 + $0x8] sm:$0x5f pattern:$0x76325410]  ;;  %v1315_v14 = vrot.slane %v2364_v57, %v3087_v39 }
  0x3c   : > { %2553 = vmatprep.subr.bf16.mxu0 %v2753_v15  ;;  %2575 = vmatprep.subr.bf16.mxu1 %v2754_v16  ;;  %v1232_v15 = vcombine.low %v2297_v8, %v2298_v13  ;;  %v2366_v16 = vcombine.low %v3046_v52, %v2298_v13 }
  0x3e   : > { %v1329_v42 = vrot.slane %v2366_v16, %v3087_v39  ;;  %v1616_v46 = vshrl.u32 %v1232_v15, 16  ;;  %v1619_v57 = vshll.u32 %v1232_v15, 16  ;;  %v2831_v15 = vld [vmem:[%s3474_s2 + $0x338] sm:$0xff]  }
  0x3f   : > { %2554 = vmatpush3.bf16.msra.mxu0 %v2755_v17  ;;  %2576 = vmatpush3.bf16.msra.mxu1 %v2756_v18  ;;  %v1614_v17 = vcombine.high %v2297_v8, %v2298_v13  ;;  %v2798_v18 = vld [vmem:[%s3474_s2 + $0x2f8] sm:$0xff]   ;;  %v2824_v8 = vld [vmem:[%s3474_s2 + $0x3a8] sm:$0xff]  }
  0x40   : > { %2555 = vmatprep.subr.bf16.mxu0 %v2757_v19  ;;  %2577 = vmatprep.subr.bf16.mxu1 %v2758_v20  ;;  %v1331_v19 = vcombine.high %v1308_v12, %v1322_v38  ;;  %v1330_v20 = vcombine.low %v1308_v12, %v1322_v38  ;;  %v2828_v12 = vld [vmem:[%s3474_s2 + $0x3b0] sm:$0xff]   ;;  %v2829_v13 = vld [vmem:[%s3474_s2 + $0x378] sm:$0xff]  }
  0x41   : > { %v1625_v52 = vshll.u32 %v1614_v17, 16  ;;  %v2832_v16 = vld [vmem:[%s3474_s2 + $0x3b8] sm:$0xff]  }
  0x43   : > { %2556 = vmatpush3.bf16.msra.mxu0 %v2759_v21  ;;  %2578 = vmatpush3.bf16.msra.mxu1 %v2760_v22  ;;  %v1333_v21 = vcombine.high %v1315_v14, %v1329_v42  ;;  %v1618_v22 = vrot.slane %v1616_v46, 6 }
  0x44   : > { %2557 = vmatprep.subr.bf16.mxu0 %v2761_v23  ;;  %2579 = vmatprep.subr.bf16.mxu1 %v2762_v24  ;;  %v1621_v23 = vrot.slane %v1619_v57, 7  ;;  %v1332_v24 = vcombine.low %v1315_v14, %v1329_v42  ;;  %v2830_v14 = vld [vmem:[%s3474_s2 + $0x3f8] sm:$0xff]  }
  0x47   : > { %2558 = vmatpush3.bf16.msra.mxu0 %v2763_v25  ;;  %2580 = vmatpush3.bf16.msra.mxu1 %v2764_v26  ;;  %v2799_v25 = vld [vmem:[%s3474_s2 + $0x238] sm:$0xff]  }
  0x48   : > { %2559 = vmatprep.subr.bf16.mxu0 %v2765_v28  ;;  %2581 = vmatprep.subr.bf16.mxu1 %v2766_v29  ;;  %v2800_v26 = vld [vmem:[%s3474_s2 + $0x2b8] sm:$0xff]   ;;  %v1622_v28 = vor.u32 %v1621_v23, %v1618_v22  ;;  %v1627_v29 = vrot.slane %v1625_v52, 7 }
  0x4b   : > { %2560 = vmatpush3.bf16.msra.mxu0 %v2767_v30  ;;  %2582 = vmatpush3.bf16.msra.mxu1 %v2768_v35  ;;  %v2801_v30 = vld [vmem:[%s3474_s2 + $0x340] sm:$0xff]  }
  0x4c   : > { %2589 = vmatprep.subr.bf16.mxu0 %v2769_v36  ;;  %2611 = vmatprep.subr.bf16.mxu1 %v2770_v32  ;;  %v2802_v35 = vld [vmem:[%s3474_s2 + $0x3c0] sm:$0xff]   ;;  %v1623_v36 = vrot.slane %v1622_v28, 2 }
  0x4d   : > { %v2803_v32 = vld [vmem:[%s3474_s2 + $0x300] sm:$0xff]  }
  0x4e   : > { %1167 = vmatmul.mubr.bf16.vlgmr.msra.gmra.mrb[4].mxu0 %v934_v44  ;;  %1208 = vmatmul.mubr.bf16.vlgmr.msra.gmra.mrb[4].mxu1 %v936_v45  ;;  %v1628_v44 = vsel %vm3065_vm6, %v1623_v36, %v1627_v29  ;;  %v3348_v45 = vrot.slane %v1694_v41, %v3087_v39  ;;  %v2806_v41 = vld [vmem:[%s3474_s2 + $0x3c8] sm:$0xff]  }
  0x4f   : > { %2590 = vmatpush3.bf16.msra.mxu0 %v2771_v40  ;;  %2612 = vmatpush3.bf16.msra.mxu1 %v2772_v48  ;;  %v2804_v40 = vld [vmem:[%s3474_s2 + $0x380] sm:$0xff]   ;;  %v2805_v48 = vld [vmem:[%s3474_s2 + $0x348] sm:$0xff]  }
  0x50   : > { %2591 = vmatprep.subr.bf16.mxu0 %v2773_v49  ;;  %2613 = vmatprep.subr.bf16.mxu1 %v2774_v53  ;;  %v1696_v49 = vcombine.low %v3097_v43, %v1628_v44  ;;  %v1697_v53 = vcombine.high %v3097_v43, %v1628_v44 }
  0x51   : > { %1562 = vmatprep.mubr.bf16.mxu0 %v1331_v19  ;;  %1603 = vmatprep.mubr.bf16.mxu1 %v1333_v21 }
  0x52   : > { %v3371_v43 = vrot.slane %v1697_v53, %v3087_v39 }
  0x53   : > { %2592 = vmatpush3.bf16.msra.mxu0 %v2775_v50  ;;  %2614 = vmatpush3.bf16.msra.mxu1 %v2776_v51  ;;  %v2807_v50 = vld [vmem:[%s3474_s2 + $0x308] sm:$0xff]   ;;  %v3368_v51 = vrot.slane %v1696_v49, %v3087_v39 }
  0x54   : > { %2593 = vmatprep.subr.bf16.mxu0 %v2777_v54  ;;  %2615 = vmatprep.subr.bf16.mxu1 %v2778_v55  ;;  %v1729_v54 = vcombine.high %v3359_v7, %v3371_v43  ;;  %v2810_v55 = vld [vmem:[%s3474_s2 + $0x3d0] sm:$0xff]  }
  0x55   : > { %v1727_v33 = vcombine.high %v3348_v45, %v3368_v51  ;;  %v1726_v39 = vcombine.low %v3348_v45, %v3368_v51 }
  0x57   : > { %2594 = vmatpush3.bf16.msra.mxu0 %v2779_v56  ;;  %2616 = vmatpush3.bf16.msra.mxu1 %v2780_v58  ;;  %v1728_v56 = vcombine.low %v3359_v7, %v3371_v43  ;;  %v2811_v58 = vld [vmem:[%s3474_s2 + $0x310] sm:$0xff]  }
  0x58   : > { %2595 = vmatprep.subr.bf16.mxu0 %v2781_v59  ;;  %2617 = vmatprep.subr.bf16.mxu1 %v2782_v60  ;;  %v2812_v59 = vld [vmem:[%s3474_s2 + $0x390] sm:$0xff]   ;;  %v2813_v60 = vld [vmem:[%s3474_s2 + $0x358] sm:$0xff]  }
  0x5b   : > { %2596 = vmatpush3.bf16.msra.mxu0 %v2783_v61  ;;  %2618 = vmatpush3.bf16.msra.mxu1 %v2784_v62  ;;  %v2814_v61 = vld [vmem:[%s3474_s2 + $0x3d8] sm:$0xff]  }
  0x5c   : > { %2597 = vmatprep.subr.bf16.mxu0 %v2785_v63  ;;  %2619 = vmatprep.subr.bf16.mxu1 %v2786_v0  ;;  %v2815_v62 = vld [vmem:[%s3474_s2 + $0x318] sm:$0xff]   ;;  %v2817_v0 = vld [vmem:[%s3474_s2 + $0x360] sm:$0xff]  }
  0x5d   : > { %v2816_v63 = vld [vmem:[%s3474_s2 + $0x398] sm:$0xff]  }
  0x5f   : > { %2598 = vmatpush3.bf16.msra.mxu0 %v2787_v1  ;;  %2620 = vmatpush3.bf16.msra.mxu1 %v2788_v2  ;;  %v2818_v1 = vld [vmem:[%s3474_s2 + $0x3e0] sm:$0xff]  }
  0x60   : > { %2599 = vmatprep.subr.bf16.mxu0 %v2789_v3  ;;  %2621 = vmatprep.subr.bf16.mxu1 %v2790_v4  ;;  %v2819_v2 = vld [vmem:[%s3474_s2 + $0x320] sm:$0xff]   ;;  %v2821_v4 = vld [vmem:[%s3474_s2 + $0x368] sm:$0xff]  }
  0x61   : > { %v2820_v3 = vld [vmem:[%s3474_s2 + $0x3a0] sm:$0xff]  }
  0x63   : > { %2600 = vmatpush3.bf16.msra.mxu0 %v2791_v5  ;;  %2622 = vmatpush3.bf16.msra.mxu1 %v2792_v6  ;;  %v2822_v5 = vld [vmem:[%s3474_s2 + $0x3e8] sm:$0xff]  }
  0x64   : > { %2601 = vmatprep.subr.bf16.mxu0 %v2793_v9  ;;  %2623 = vmatprep.subr.bf16.mxu1 %v2794_v10  ;;  %v2823_v6 = vld [vmem:[%s3474_s2 + $0x328] sm:$0xff]   ;;  %v2825_v9 = vld [vmem:[%s3474_s2 + $0x370] sm:$0xff]  }
  0x65   : > { %v2826_v10 = vld [vmem:[%s3474_s2 + $0x3f0] sm:$0xff]  }
  0x67   : > { %2602 = vmatpush3.bf16.msra.mxu0 %v2795_v47  ;;  %2624 = vmatpush3.bf16.msra.mxu1 %v2796_v34 }
  0x68   : > { %2603 = vmatprep.subr.bf16.mxu0 %v2797_v37  ;;  %2625 = vmatprep.subr.bf16.mxu1 %v2798_v18 }
  0x6b   : > { %2604 = vmatpush3.bf16.msra.mxu0 %v2799_v25  ;;  %2626 = vmatpush3.bf16.msra.mxu1 %v2800_v26 }
  0x6c   : > { %2633 = vmatprep.subr.bf16.mxu0 %v2801_v30  ;;  %2655 = vmatprep.subr.bf16.mxu1 %v2802_v35 }
  0x6e   : > { %1563 = vmatmul.mubr.bf16.vlgmr.msra.gmra.mrb[8].mxu0 %v1330_v20  ;;  %1604 = vmatmul.mubr.bf16.vlgmr.msra.gmra.mrb[8].mxu1 %v1332_v24 }
  0x6f   : > { %2634 = vmatpush3.bf16.msra.mxu0 %v2803_v32  ;;  %2656 = vmatpush3.bf16.msra.mxu1 %v2804_v40 }
  0x70   : > { %2635 = vmatprep.subr.bf16.mxu0 %v2805_v48  ;;  %2657 = vmatprep.subr.bf16.mxu1 %v2806_v41 }
  0x71   : > { %1958 = vmatprep.mubr.bf16.mxu0 %v1727_v33  ;;  %1999 = vmatprep.mubr.bf16.mxu1 %v1729_v54 }
  0x73   : > { %2636 = vmatpush3.bf16.msra.mxu0 %v2807_v50  ;;  %2658 = vmatpush3.bf16.msra.mxu1 %v2808_v27 }
  0x74   : > { %2637 = vmatprep.subr.bf16.mxu0 %v2809_v31  ;;  %2659 = vmatprep.subr.bf16.mxu1 %v2810_v55 }
  0x77   : > { %2638 = vmatpush3.bf16.msra.mxu0 %v2811_v58  ;;  %2660 = vmatpush3.bf16.msra.mxu1 %v2812_v59 }
  0x78   : > { %2639 = vmatprep.subr.bf16.mxu0 %v2813_v60  ;;  %2661 = vmatprep.subr.bf16.mxu1 %v2814_v61 }
  0x7b   : > { %2640 = vmatpush3.bf16.msra.mxu0 %v2815_v62  ;;  %2662 = vmatpush3.bf16.msra.mxu1 %v2816_v63 }
  0x7c   : > { %2641 = vmatprep.subr.bf16.mxu0 %v2817_v0  ;;  %2663 = vmatprep.subr.bf16.mxu1 %v2818_v1 }
  0x7f   : > { %2642 = vmatpush3.bf16.msra.mxu0 %v2819_v2  ;;  %2664 = vmatpush3.bf16.msra.mxu1 %v2820_v3 }
  0x80   : > { %2643 = vmatprep.subr.bf16.mxu0 %v2821_v4  ;;  %2665 = vmatprep.subr.bf16.mxu1 %v2822_v5 }
  0x83   : > { %2644 = vmatpush3.bf16.msra.mxu0 %v2823_v6  ;;  %2666 = vmatpush3.bf16.msra.mxu1 %v2824_v8 }
  0x84   : > { %2645 = vmatprep.subr.bf16.mxu0 %v2825_v9  ;;  %2667 = vmatprep.subr.bf16.mxu1 %v2826_v10 }
  0x87   : > { %2646 = vmatpush3.bf16.msra.mxu0 %v2827_v11  ;;  %2668 = vmatpush3.bf16.msra.mxu1 %v2828_v12  ;;  %v2495_v12 = vld [vmem:[%s3475_s3] ss:$0 sm:$0xff] }
  0x88   : > { %2647 = vmatprep.subr.bf16.mxu0 %v2829_v13  ;;  %2669 = vmatprep.subr.bf16.mxu1 %v2830_v14 }
  0x8b   : > { %2648 = vmatpush3.bf16.msra.mxu0 %v2831_v15  ;;  %2670 = vmatpush3.bf16.msra.mxu1 %v2832_v16 }
  0x8e   : > { %1959 = vmatmul.mubr.bf16.vlgmr.msra.gmra.mrb[12].mxu0 %v1726_v39  ;;  %2000 = vmatmul.mubr.bf16.vlgmr.msra.gmra.mrb[12].mxu1 %v1728_v56 }
 0x101   : > { %v2517_v17 = vpop.f32.mrb[0].mxu0  ;;  %v2539_v47 = vpop.f32.mrb[0].mxu1 }
 0x102   : > { %v2518_v34 = vpop.f32.mrb[1].mxu0  ;;  %v2540_v38 = vpop.f32.mrb[1].mxu1 }
 0x103   : > { %v2519_v37 = vadd.f32 %v2518_v34, %v2517_v17  ;;  %v2541_v42 = vadd.f32 %v2540_v38, %v2539_v47  ;;  %v2520_v46 = vpop.f32.mrb[2].mxu0  ;;  %v2542_v57 = vpop.f32.mrb[2].mxu1 }
 0x104   : > { %v2521_v52 = vpop.f32.mrb[3].mxu0  ;;  %v2543_v18 = vpop.f32.mrb[3].mxu1 }
 0x105   : > { %v896_v19 = vadd.f32 %v2541_v42, %v2519_v37  ;;  %v2522_v20 = vadd.f32 %v2521_v52, %v2520_v46  ;;  %v2544_v21 = vadd.f32 %v2543_v18, %v2542_v57 }
 0x107   : > { %v899_v22 = vadd.f32 %v2544_v21, %v2522_v20 }
 0x121   : > { %v2561_v23 = vpop.f32.mrb[4].mxu0  ;;  %v2583_v24 = vpop.f32.mrb[4].mxu1 }
 0x122   : > { %v2562_v25 = vpop.f32.mrb[5].mxu0  ;;  %v2584_v26 = vpop.f32.mrb[5].mxu1 }
 0x123   : > { %v2563_v28 = vadd.f32 %v2562_v25, %v2561_v23  ;;  %v2585_v29 = vadd.f32 %v2584_v26, %v2583_v24  ;;  %v2564_v30 = vpop.f32.mrb[6].mxu0  ;;  %v2586_v35 = vpop.f32.mrb[6].mxu1 }
 0x124   : > { %v2565_v36 = vpop.f32.mrb[7].mxu0  ;;  %v2587_v32 = vpop.f32.mrb[7].mxu1 }
 0x125   : > { %v1169_v40 = vadd.f32 %v2563_v28, %v896_v19  ;;  %v2566_v44 = vadd.f32 %v2565_v36, %v2564_v30  ;;  %v2588_v45 = vadd.f32 %v2587_v32, %v2586_v35 }
 0x127   : > { %v1210_v48 = vadd.f32 %v2585_v29, %v1169_v40  ;;  %v1172_v49 = vadd.f32 %v2566_v44, %v899_v22 }
 0x129   : > { %v1213_v53 = vadd.f32 %v2588_v45, %v1172_v49 }
 0x141   : > { %v2605_v7 = vpop.f32.mrb[8].mxu0  ;;  %v2627_v41 = vpop.f32.mrb[8].mxu1 }
 0x142   : > { %v2606_v50 = vpop.f32.mrb[9].mxu0  ;;  %v2628_v51 = vpop.f32.mrb[9].mxu1 }
 0x143   : > { %v2607_v43 = vadd.f32 %v2606_v50, %v2605_v7  ;;  %v2629_v27 = vadd.f32 %v2628_v51, %v2627_v41  ;;  %v2608_v31 = vpop.f32.mrb[10].mxu0  ;;  %v2630_v33 = vpop.f32.mrb[10].mxu1 }
 0x144   : > { %v2609_v54 = vpop.f32.mrb[11].mxu0  ;;  %v2631_v39 = vpop.f32.mrb[11].mxu1 }
 0x145   : > { %v1606_v55 = vadd.f32 %v2629_v27, %v2607_v43  ;;  %v2610_v56 = vadd.f32 %v2609_v54, %v2608_v31  ;;  %v2632_v58 = vadd.f32 %v2631_v39, %v2630_v33 }
 0x147   : > { %v1612_v59 = vadd.f32 %v1606_v55, %v1210_v48  ;;  %v1609_v60 = vadd.f32 %v2632_v58, %v2610_v56 }
 0x149   : > { %v1613_v61 = vadd.f32 %v1609_v60, %v1213_v53 }
 0x161   : > { %v2649_v62 = vpop.f32.mrb[12].mxu0  ;;  %v2671_v63 = vpop.f32.mrb[12].mxu1 }
 0x162   : > { %v2650_v0 = vpop.f32.mrb[13].mxu0  ;;  %v2672_v1 = vpop.f32.mrb[13].mxu1 }
 0x163   : > { %v2651_v2 = vadd.f32 %v2650_v0, %v2649_v62  ;;  %v2673_v3 = vadd.f32 %v2672_v1, %v2671_v63  ;;  %v2652_v4 = vpop.f32.mrb[14].mxu0  ;;  %v2674_v5 = vpop.f32.mrb[14].mxu1 }
 0x164   : > { %v2653_v6 = vpop.f32.mrb[15].mxu0  ;;  %v2675_v8 = vpop.f32.mrb[15].mxu1 }
 0x165   : > { %v2002_v9 = vadd.f32 %v2673_v3, %v2651_v2  ;;  %v2654_v10 = vadd.f32 %v2653_v6, %v2652_v4  ;;  %v2676_v11 = vadd.f32 %v2675_v8, %v2674_v5 }
 0x167   : > { %v2008_v13 = vadd.f32 %v2002_v9, %v1612_v59  ;;  %v2005_v14 = vadd.f32 %v2676_v11, %v2654_v10 }
 0x169   : > { %v2017_v15 = vadd.f32 %v2495_v12, %v2008_v13  ;;  %v2009_v16 = vadd.f32 %v2005_v14, %v1613_v61 }
 0x16b   : > { %v2019_v17 = vmul.f32 0.2, %v2017_v15  ;;  %v2018_v47 = vadd.f32 %v2495_v12, %v2009_v16 }
 0x16d   : > { %v2021_v34 = vmax.f32 %v2017_v15, %v2019_v17  ;;  %v2020_v38 = vmul.f32 0.2, %v2018_v47 }
 0x16f   : > { %v2025_v37 = vcombine.high %v2021_v34, %v2021_v34  ;;  %v2029_v42 = vpack.c.bf16 %v2021_v34, %v2021_v34  ;;  %v2022_v46 = vmax.f32 %v2018_v47, %v2020_v38 }
 0x171   : > { %v2030_v57 = vpack.c.bf16 %v2025_v37, %v2025_v37  ;;  %2033 = vst [vmem:[%s311_s29] sm:$0x3] %v2029_v42  ;;  %v2026_v52 = vcombine.high %v2022_v46, %v2022_v46  ;;  %v2031_v18 = vpack.c.bf16 %v2022_v46, %v2022_v46 }
 0x173   : > { %2034 = vst [vmem:[%s311_s29 + $0x2] sm:$0x3] %v2030_v57  ;;  %v2032_v19 = vpack.c.bf16 %v2026_v52, %v2026_v52  ;;  %2035 = vst [vmem:[%s311_s29 + $0x4] sm:$0x3] %v2031_v18 }
 0x175   : > { %2036 = vst [vmem:[%s311_s29 + $0x6] sm:$0x3] %v2032_v19 }
 0x176 PF: > { %s14_s17 = sadd.s32 1, %s2855_s17   ;;  %s3481_s15 = smov %s2851_s16 }
 0x177   : > { %p11_p5 = scmp.ge.s32.totalorder %s14_s17, 4   ;;  %s3482_s16 = smov %s3484_s18 }
 0x179   :  { %13 = sbr.rel (!%p11_p5) target bundleno = 2 (0x2), region = 72 }

// kernel: fc_discriminator_forward.8
= control target key start
LH: loop header
LB: loop body
LE: loop exit
PB: predicated region body
PF: predicated region fallthrough
CT: control target
= control target key end

     0   :  { %s2702_s15 = smov 0   ;;  %s2704_s16 = smov 0   ;;  %s3183_s0 = inlined_call_operand.vmem [shape: bf16[2,3,3,512], index: 0, kind: input, shape index: {}, may-alias: {0,1}]   ;;  %s3184_s1 = inlined_call_operand.vmem [shape: bf16[2,3,3,512], index: 1, kind: input, shape index: {}, may-alias: {0,1}]   ;;  %s3185_s2 = inlined_call_operand.vmem [shape: bf16[4,512,128], index: 2, kind: input, shape index: {}]   ;;  %s3186_s3 = inlined_call_operand.vmem [shape: f32[1,128], index: 3, kind: input, shape index: {}]   ;;  %s3187_s4 = inlined_call_operand.vmem [shape: bf16[2,2,2,128], index: 4, kind: output, shape index: {}]  }
   0x1   :  { %s2706_s17 = smov 0  }
   0x2 LB: > { %s26_s18 = sadd.s32 1, %s2669_s16  ;;  %p1983_p0 = scmp.ge.s32.totalorder %s2673_s17, 1  ;;  %s2673_s17 = sphi %s2706_s17, %s14_s17   ;;  %s2669_s16 = sphi %s2704_s16, %s3189_s16   ;;  %s2665_s15 = sphi %s2702_s15, %s3188_s15  }
   0x3   : > { %p28_p1 = scmp.ge.s32.totalorder %s26_s18, 2  ;;  %p218_p2 = scmp.lt.s32.totalorder %s2673_s17, 3 }
   0x5   : > { %s3191_s18 = smov (%p28_p1, %s26_s18), 0  ;;  %p219_p3 = pnand %p1983_p0, %p218_p2 }
   0x6   : > { %v2523_v0 = vld [vmem:[%s3185_s2 + $0x140] sm:$0xff] (!%p219_p3)   ;;  %p274_p4 = scmp.lt.s32.totalorder (!%p219_p3), %s2665_s15, 1  ;;  %v2527_v4 = vld [vmem:[%s3185_s2 + $0x148] sm:$0xff] (!%p219_p3)   ;;  %v2531_v8 = vld [vmem:[%s3185_s2 + $0x150] sm:$0xff] (!%p219_p3)   ;;  %v499_v32 = vlaneseq (!%p219_p3)  ;;  %vm397_vm0 = vsmask.f32 (!%p219_p3), 256 }
   0x7   : > { %222 = sbr.rel (%p219_p3) target bundleno = 370 (0x172), region = 36  ;;  %v2524_v1 = vld [vmem:[%s3185_s2 + $0x1c0] sm:$0xff] (!%p219_p3)   ;;  %2318 = vmatprep.subr.bf16.mxu0 (!%p219_p3), %v2523_v0  ;;  %v2528_v5 = vld [vmem:[%s3185_s2 + $0x1c8] sm:$0xff] (!%p219_p3)   ;;  %v2532_v9 = vld [vmem:[%s3185_s2 + $0x1d0] sm:$0xff] (!%p219_p3)   ;;  %vm398_vm1 = vsmask.f32 (!%p219_p3), 1284 }
   0x8   : > { %v2525_v2 = vld [vmem:[%s3185_s2 + $0x100] sm:$0xff] (!%p219_p3)   ;;  %2340 = vmatprep.subr.bf16.mxu1 (!%p219_p3), %v2524_v1  ;;  %v2529_v6 = vld [vmem:[%s3185_s2 + $0x108] sm:$0xff] (!%p219_p3)   ;;  %v2533_v10 = vld [vmem:[%s3185_s2 + $0x110] sm:$0xff] (!%p219_p3)   ;;  %vm400_vm2 = vsmask.f32 (!%p219_p3), 2312  ;;  %v2833_v40 = vshrl.u32 (!%p219_p3), %v499_v32, 7 }
   0x9   : > { %v2526_v3 = vld [vmem:[%s3185_s2 + $0x180] sm:$0xff] (!%p219_p3)   ;;  %2319 = vmatpush3.bf16.msra.mxu0 (!%p219_p3), %v2525_v2  ;;  %v2530_v7 = vld [vmem:[%s3185_s2 + $0x188] sm:$0xff] (!%p219_p3)   ;;  %v2534_v11 = vld [vmem:[%s3185_s2 + $0x190] sm:$0xff] (!%p219_p3)   ;;  %vm402_vm3 = vsmask.f32 (!%p219_p3), 3340 }
   0xa   : > { %2341 = vmatpush3.bf16.msra.mxu1 (!%p219_p3), %v2526_v3  ;;  %2320 = vmatprep.subr.bf16.mxu0 (!%p219_p3), %v2527_v4  ;;  %v2535_v12 = vld [vmem:[%s3185_s2 + $0x158] sm:$0xff] (!%p219_p3)   ;;  %v2539_v16 = vld [vmem:[%s3185_s2 + $0x160] sm:$0xff] (!%p219_p3)   ;;  %v2543_v20 = vld [vmem:[%s3185_s2 + $0x168] sm:$0xff] (!%p219_p3)   ;;  %vm404_vm5 = vsmask.f32 (!%p219_p3), 4368 }
   0xb   : > { %2342 = vmatprep.subr.bf16.mxu1 (!%p219_p3), %v2528_v5  ;;  %v2536_v13 = vld [vmem:[%s3185_s2 + $0x1d8] sm:$0xff] (!%p219_p3)   ;;  %v2540_v17 = vld [vmem:[%s3185_s2 + $0x1e0] sm:$0xff] (!%p219_p3)   ;;  %v2544_v21 = vld [vmem:[%s3185_s2 + $0x1e8] sm:$0xff] (!%p219_p3)   ;;  %vm406_vm6 = vsmask.f32 (!%p219_p3), 5396 }
   0xc   : > { %v2537_v14 = vld [vmem:[%s3185_s2 + $0x118] sm:$0xff] (!%p219_p3)   ;;  %v2541_v18 = vld [vmem:[%s3185_s2 + $0x120] sm:$0xff] (!%p219_p3)   ;;  %v2545_v22 = vld [vmem:[%s3185_s2 + $0x128] sm:$0xff] (!%p219_p3)   ;;  %vm408_vm8 = vsmask.f32 (!%p219_p3), 6424 }
   0xd   : > { %2321 = vmatpush3.bf16.msra.mxu0 (!%p219_p3), %v2529_v6  ;;  %v2538_v15 = vld [vmem:[%s3185_s2 + $0x198] sm:$0xff] (!%p219_p3)   ;;  %v2542_v19 = vld [vmem:[%s3185_s2 + $0x1a0] sm:$0xff] (!%p219_p3)   ;;  %v2546_v23 = vld [vmem:[%s3185_s2 + $0x1a8] sm:$0xff] (!%p219_p3)   ;;  %vm410_vm9 = vsmask.f32 (!%p219_p3), 7452 }
   0xe   : > { %s3193_s15 = smov (!%p274_p4, %s2665_s15), 1  ;;  %2343 = vmatpush3.bf16.msra.mxu1 %v2530_v7  ;;  %2322 = vmatprep.subr.bf16.mxu0 %v2531_v8  ;;  %v2547_v24 = vld [vmem:[%s3185_s2 + $0x170] sm:$0xff]   ;;  %v2551_v28 = vld [vmem:[%s3185_s2 + $0x178] sm:$0xff]   ;;  %vm399_vm4 = vmor %vm397_vm0, %vm398_vm1  ;;  %v2675_v45 = vmov 1966171168  }
   0xf   : > { %2344 = vmatprep.subr.bf16.mxu1 %v2532_v9  ;;  %v2548_v25 = vld [vmem:[%s3185_s2 + $0x1f0] sm:$0xff]   ;;  %s2494_s27 = smul.u32 24, %s3193_s15  ;;  %v2552_v29 = vld [vmem:[%s3185_s2 + $0x1f8] sm:$0xff]   ;;  %vm401_vm7 = vmor %vm399_vm4, %vm400_vm2  ;;  %v497_v46 = vunpack.c.l.s4 %v2675_v45  ;;  %s1986_s21 = sshll.u32 %s3193_s15, 1 }
  0x10   : > { %v2549_v26 = vld [vmem:[%s3185_s2 + $0x130] sm:$0xff]   ;;  %v2553_v30 = vld [vmem:[%s3185_s2 + $0x138] sm:$0xff]   ;;  %v2555_v42 = vld [vmem:[%s3185_s2 + $0x40] sm:$0xff]   ;;  %s309_s24 = scalar_lea.vmem %s3187_s4, %s1986_s21 }
  0x11   : > { %2323 = vmatpush3.bf16.msra.mxu0 %v2533_v10  ;;  %v2550_v27 = vld [vmem:[%s3185_s2 + $0x1b0] sm:$0xff]   ;;  %s2317_s6 = sadd.s32 16, %s2494_s27  ;;  %s282_s13 = scalar_lea.vmem %s3183_s0, %s2494_s27  ;;  %v2554_v31 = vld [vmem:[%s3185_s2 + $0x1b8] sm:$0xff]   ;;  %vm403_vm10 = vmor %vm401_vm7, %vm402_vm3  ;;  %v498_v50 = vunpack.c.0.s8 %v497_v46 }
  0x12   : > { %2345 = vmatpush3.bf16.msra.mxu1 %v2534_v11  ;;  %2324 = vmatprep.subr.bf16.mxu0 %v2535_v12  ;;  %s299_s22 = scalar_lea.vmem %s3184_s1, %s2317_s6  ;;  %v1987_v33 = vld.sshfl [vmem:[%s282_s13] sm:$0xff pattern:$0x75316420]  ;;  %v2825_v34 = vld.sshfl [vmem:[%s282_s13 + $0x8] sm:$0xff pattern:$0x75316420]  ;;  %vm405_vm11 = vmor %vm403_vm10, %vm404_vm5 }
  0x13   : > { %2346 = vmatprep.subr.bf16.mxu1 %v2536_v13  ;;  %v2827_v35 = vld.sshfl [vmem:[%s299_s22] sm:$0xff pattern:$0x75316420]  ;;  %v395_v36 = vcombine.high %v1987_v33, %v1987_v33  ;;  %v396_v37 = vcombine.high %v2825_v34, %v2825_v34  ;;  %v413_v39 = vshrl.u32 %v1987_v33, 16  ;;  %v422_v43 = vshrl.u32 %v2825_v34, 16  ;;  %vm407_vm12 = vmor %vm405_vm11, %vm406_vm6  ;;  %v2559_v7 = vld [vmem:[%s3185_s2 + $0x48] sm:$0xff]  }
  0x14   : > { %v1472_v38 = vcombine.high %v2827_v35, %v2827_v35  ;;  %v1474_v47 = vshrl.u32 %v2827_v35, 16  ;;  %v2556_v49 = vld [vmem:[%s3185_s2 + $0xc0] sm:$0xff]   ;;  %vm409_vm13 = vmor %vm407_vm12, %vm408_vm8  ;;  %v796_v51 = vcombine.low %v1987_v33, %v2825_v34  ;;  %v2848_v54 = vsub.s32 %v498_v50, %v2833_v40  ;;  %v2560_v10 = vld [vmem:[%s3185_s2 + $0xc8] sm:$0xff]  }
  0x15   : > { %2325 = vmatpush3.bf16.msra.mxu0 %v2537_v14  ;;  %v418_v41 = vshll.u32 %v395_v36, 16  ;;  %v427_v44 = vshll.u32 %v396_v37, 16  ;;  %vm411_vm14 = vmor %vm409_vm13, %vm410_vm9  ;;  %v2557_v4 = vld [vmem:[%s3185_s2] sm:$0xff]   ;;  %v2561_v12 = vld [vmem:[%s3185_s2 + $0x8] sm:$0xff]  }
  0x16   : > { %2347 = vmatpush3.bf16.msra.mxu1 %v2538_v15  ;;  %2326 = vmatprep.subr.bf16.mxu0 %v2539_v16  ;;  %v1479_v48 = vshll.u32 %v1472_v38, 16  ;;  %v2851_v58 = vrot.slane %v796_v51, %v2848_v54  ;;  %v2558_v9 = vld [vmem:[%s3185_s2 + $0x80] sm:$0xff]   ;;  %v2563_v13 = vld [vmem:[%s3185_s2 + $0x50] sm:$0xff]   ;;  %v2562_v14 = vld [vmem:[%s3185_s2 + $0x88] sm:$0xff]  }
  0x17   : > { %2348 = vmatprep.subr.bf16.mxu1 %v2540_v17  ;;  %v420_v52 = vsel %vm411_vm14, %v413_v39, %v418_v41  ;;  %v429_v53 = vsel %vm411_vm14, %v422_v43, %v427_v44  ;;  %v2564_v15 = vld [vmem:[%s3185_s2 + $0xd0] sm:$0xff]   ;;  %v2567_v17 = vld [vmem:[%s3185_s2 + $0x58] sm:$0xff]   ;;  %v2588_v45 = vld [vmem:[%s3185_s2 + $0x2c0] sm:$0xff]  }
  0x18   : > { %v1481_v55 = vsel %vm411_vm14, %v1474_v47, %v1479_v48  ;;  %v495_v56 = vcombine.low %v420_v52, %v429_v53  ;;  %v804_v61 = vcombine.high %v2851_v58, %v2851_v58  ;;  %v2565_v16 = vld [vmem:[%s3185_s2 + $0x10] sm:$0xff]   ;;  %v2584_v38 = vld [vmem:[%s3185_s2 + $0xf8] sm:$0xff]   ;;  %v811_v41 = vrot.slane %v2851_v58, %v2848_v54  ;;  %v2589_v46 = vld [vmem:[%s3185_s2 + $0x200] sm:$0xff]  }
  0x19   : > { %2327 = vmatpush3.bf16.msra.mxu0 %v2541_v18  ;;  %v1547_v57 = vcombine.low %v429_v53, %v1481_v55  ;;  %v2566_v18 = vld [vmem:[%s3185_s2 + $0x90] sm:$0xff]   ;;  %v2585_v39 = vld [vmem:[%s3185_s2 + $0x38] sm:$0xff]   ;;  %v2591_v48 = vld [vmem:[%s3185_s2 + $0x248] sm:$0xff]  }
  0x1a   : > { %2349 = vmatpush3.bf16.msra.mxu1 %v2542_v19  ;;  %2328 = vmatprep.subr.bf16.mxu0 %v2543_v20  ;;  %v502_v59 = vrot.slane %v495_v56, %v2848_v54  ;;  %v818_v2 = vrot.slane %v804_v61, %v2848_v54  ;;  %v2568_v19 = vld [vmem:[%s3185_s2 + $0xd8] sm:$0xff]   ;;  %v2580_v33 = vld [vmem:[%s3185_s2 + $0xf0] sm:$0xff]   ;;  %v819_v47 = vcombine.high %v811_v41, %v811_v41  ;;  %v2592_v51 = vld [vmem:[%s3185_s2 + $0x2c8] sm:$0xff]  }
  0x1b   : > { %2350 = vmatprep.subr.bf16.mxu1 %v2544_v21  ;;  %v1554_v60 = vrot.slane %v1547_v57, %v2848_v54  ;;  %v2569_v20 = vld [vmem:[%s3185_s2 + $0x18] sm:$0xff]   ;;  %v2571_v21 = vld [vmem:[%s3185_s2 + $0x60] sm:$0xff]   ;;  %v2582_v36 = vld [vmem:[%s3185_s2 + $0xb0] sm:$0xff]  }
  0x1c   : > { %v503_v62 = vcombine.high %v502_v59, %v502_v59  ;;  %v510_v63 = vrot.slane %v502_v59, %v2848_v54  ;;  %v820_v11 = vcombine.high %v818_v2, %v818_v2  ;;  %v2586_v43 = vld [vmem:[%s3185_s2 + $0xb8] sm:$0xff]   ;;  %v2593_v52 = vld [vmem:[%s3185_s2 + $0x208] sm:$0xff]   ;;  %v2595_v53 = vld [vmem:[%s3185_s2 + $0x250] sm:$0xff]  }
  0x1d   : > { %2329 = vmatpush3.bf16.msra.mxu0 %v2545_v22  ;;  %v1555_v0 = vcombine.high %v1554_v60, %v1554_v60  ;;  %v2859_v1 = vrot.slane %v1554_v60, %v2848_v54  ;;  %v2570_v22 = vld [vmem:[%s3185_s2 + $0x98] sm:$0xff]   ;;  %v2594_v55 = vld [vmem:[%s3185_s2 + $0x288] sm:$0xff]   ;;  %v2596_v56 = vld [vmem:[%s3185_s2 + $0x2d0] sm:$0xff]  }
  0x1e   : > { %2351 = vmatpush3.bf16.msra.mxu1 %v2546_v23  ;;  %2330 = vmatprep.subr.bf16.mxu0 %v2547_v24  ;;  %v517_v3 = vrot.slane %v503_v62, %v2848_v54  ;;  %v518_v6 = vcombine.high %v510_v63, %v510_v63  ;;  %v2572_v23 = vld [vmem:[%s3185_s2 + $0xe0] sm:$0xff]   ;;  %v2597_v57 = vld [vmem:[%s3185_s2 + $0x210] sm:$0xff]   ;;  %v2599_v58 = vld [vmem:[%s3185_s2 + $0x258] sm:$0xff]  }
  0x1f   : > { %2352 = vmatprep.subr.bf16.mxu1 %v2548_v25  ;;  %v2867_v5 = vrot.slane %v1555_v0, %v2848_v54  ;;  %v2573_v24 = vld [vmem:[%s3185_s2 + $0x20] sm:$0xff]   ;;  %v2575_v25 = vld [vmem:[%s3185_s2 + $0x68] sm:$0xff]   ;;  %v2598_v59 = vld [vmem:[%s3185_s2 + $0x290] sm:$0xff]  }
  0x20   : > { %748 = vmatprep.mubr.bf16.mxu0 %v517_v3  ;;  %v519_v8 = vcombine.high %v517_v3, %v517_v3  ;;  %v2600_v60 = vld [vmem:[%s3185_s2 + $0x2d8] sm:$0xff]   ;;  %v2603_v62 = vld [vmem:[%s3185_s2 + $0x260] sm:$0xff]   ;;  %v2607_v3 = vld [vmem:[%s3185_s2 + $0x268] sm:$0xff]  }
  0x21   : > { %2331 = vmatpush3.bf16.msra.mxu0 %v2549_v26  ;;  %v2574_v26 = vld [vmem:[%s3185_s2 + $0xa0] sm:$0xff]   ;;  %v2601_v61 = vld [vmem:[%s3185_s2 + $0x218] sm:$0xff]  }
  0x22   : > { %2353 = vmatpush3.bf16.msra.mxu1 %v2550_v27  ;;  %2332 = vmatprep.subr.bf16.mxu0 %v2551_v28  ;;  %v1170_v27 = vcombine.low %v2825_v34, %v2827_v35  ;;  %v2576_v28 = vld [vmem:[%s3185_s2 + $0xe8] sm:$0xff]   ;;  %v2581_v34 = vld [vmem:[%s3185_s2 + $0x30] sm:$0xff]   ;;  %v2583_v35 = vld [vmem:[%s3185_s2 + $0x78] sm:$0xff]  }
  0x23   : > { %2354 = vmatprep.subr.bf16.mxu1 %v2552_v29  ;;  %788 = vmatprep.mubr.bf16.mxu1 %v519_v8  ;;  %v2577_v29 = vld [vmem:[%s3185_s2 + $0x28] sm:$0xff]   ;;  %v2604_v0 = vld [vmem:[%s3185_s2 + $0x2e0] sm:$0xff]   ;;  %v2611_v8 = vld [vmem:[%s3185_s2 + $0x270] sm:$0xff]  }
  0x24   : > { %v2938_v32 = vrot.slane %v1170_v27, %v2848_v54  ;;  %v2626_v27 = vld [vmem:[%s3185_s2 + $0x388] sm:$0xff]  }
  0x25   : > { %2333 = vmatpush3.bf16.msra.mxu0 %v2553_v30  ;;  %v2579_v30 = vld [vmem:[%s3185_s2 + $0x70] sm:$0xff]  }
  0x26   : > { %2355 = vmatpush3.bf16.msra.mxu1 %v2554_v31  ;;  %2362 = vmatprep.subr.bf16.mxu0 %v2555_v42  ;;  %v2578_v31 = vld [vmem:[%s3185_s2 + $0xa8] sm:$0xff]   ;;  %v1178_v37 = vcombine.high %v2938_v32, %v2938_v32  ;;  %v2587_v42 = vld [vmem:[%s3185_s2 + $0x240] sm:$0xff]  }
  0x27   : > { %2384 = vmatprep.subr.bf16.mxu1 %v2556_v49  ;;  %v2590_v49 = vld [vmem:[%s3185_s2 + $0x280] sm:$0xff]  }
  0x28   : > { %749 = vmatmul.mubr.bf16.vlgmr.msra.gmra.mrb[0].mxu0 %v510_v63  ;;  %v1192_v44 = vrot.slane %v1178_v37, %v2848_v54  ;;  %v2602_v63 = vld [vmem:[%s3185_s2 + $0x298] sm:$0xff]   ;;  %v2639_v37 = vld [vmem:[%s3185_s2 + $0x368] sm:$0xff]  }
  0x29   : > { %2363 = vmatpush3.bf16.msra.mxu0 %v2557_v4  ;;  %789 = vmatmul.mubr.bf16.vlgmr.msra.gmra.mrb[0].mxu1 %v518_v6  ;;  %v2606_v4 = vld [vmem:[%s3185_s2 + $0x2a0] sm:$0xff]   ;;  %v2608_v6 = vld [vmem:[%s3185_s2 + $0x2e8] sm:$0xff]  }
  0x2a   : > { %2364 = vmatprep.subr.bf16.mxu0 %v2559_v7  ;;  %2385 = vmatpush3.bf16.msra.mxu1 %v2558_v9  ;;  %v1194_v50 = vcombine.high %v1192_v44, %v1192_v44  ;;  %v2609_v7 = vld [vmem:[%s3185_s2 + $0x228] sm:$0xff]  }
  0x2b   : > { %1049 = vmatprep.mubr.bf16.mxu0 %v818_v2  ;;  %2386 = vmatprep.subr.bf16.mxu1 %v2560_v10  ;;  %v2605_v2 = vld [vmem:[%s3185_s2 + $0x220] sm:$0xff]   ;;  %v2610_v9 = vld [vmem:[%s3185_s2 + $0x2a8] sm:$0xff]   ;;  %v2612_v10 = vld [vmem:[%s3185_s2 + $0x2f0] sm:$0xff]  }
  0x2c   : > { %1089 = vmatprep.mubr.bf16.mxu1 %v820_v11  ;;  %v2613_v11 = vld [vmem:[%s3185_s2 + $0x230] sm:$0xff]  }
  0x2d   : > { %2365 = vmatpush3.bf16.msra.mxu0 %v2561_v12  ;;  %v2615_v12 = vld [vmem:[%s3185_s2 + $0x278] sm:$0xff]  }
  0x2e   : > { %2366 = vmatprep.subr.bf16.mxu0 %v2563_v13  ;;  %2387 = vmatpush3.bf16.msra.mxu1 %v2562_v14  ;;  %v2614_v13 = vld [vmem:[%s3185_s2 + $0x2b0] sm:$0xff]   ;;  %v2616_v14 = vld [vmem:[%s3185_s2 + $0x2f8] sm:$0xff]  }
  0x2f   : > { %2388 = vmatprep.subr.bf16.mxu1 %v2564_v15  ;;  %v2617_v15 = vld [vmem:[%s3185_s2 + $0x238] sm:$0xff]  }
  0x31   : > { %2367 = vmatpush3.bf16.msra.mxu0 %v2565_v16  ;;  %v1185_v16 = vrot.slane %v2938_v32, %v2848_v54  ;;  %v2633_v32 = vld [vmem:[%s3185_s2 + $0x318] sm:$0xff]  }
  0x32   : > { %2368 = vmatprep.subr.bf16.mxu0 %v2567_v17  ;;  %2389 = vmatpush3.bf16.msra.mxu1 %v2566_v18  ;;  %v2619_v17 = vld [vmem:[%s3185_s2 + $0x340] sm:$0xff]   ;;  %v2618_v18 = vld [vmem:[%s3185_s2 + $0x2b8] sm:$0xff]  }
  0x33   : > { %2390 = vmatprep.subr.bf16.mxu1 %v2568_v19  ;;  %v2620_v19 = vld [vmem:[%s3185_s2 + $0x3c0] sm:$0xff]   ;;  %v1193_v54 = vcombine.high %v1185_v16, %v1185_v16 }
  0x35   : > { %2369 = vmatpush3.bf16.msra.mxu0 %v2569_v20  ;;  %v2621_v20 = vld [vmem:[%s3185_s2 + $0x300] sm:$0xff]  }
  0x36   : > { %2370 = vmatprep.subr.bf16.mxu0 %v2571_v21  ;;  %2391 = vmatpush3.bf16.msra.mxu1 %v2570_v22  ;;  %v2623_v21 = vld [vmem:[%s3185_s2 + $0x348] sm:$0xff]   ;;  %v2622_v22 = vld [vmem:[%s3185_s2 + $0x380] sm:$0xff]  }
  0x37   : > { %2392 = vmatprep.subr.bf16.mxu1 %v2572_v23  ;;  %v1571_v23 = vcombine.high %v2867_v5, %v2867_v5 }
  0x39   : > { %2371 = vmatpush3.bf16.msra.mxu0 %v2573_v24  ;;  %v2624_v24 = vld [vmem:[%s3185_s2 + $0x3c8] sm:$0xff]  }
  0x3a   : > { %2372 = vmatprep.subr.bf16.mxu0 %v2575_v25  ;;  %2393 = vmatpush3.bf16.msra.mxu1 %v2574_v26  ;;  %v2625_v25 = vld [vmem:[%s3185_s2 + $0x308] sm:$0xff]   ;;  %v2627_v26 = vld [vmem:[%s3185_s2 + $0x350] sm:$0xff]  }
  0x3b   : > { %2394 = vmatprep.subr.bf16.mxu1 %v2576_v28  ;;  %v2628_v28 = vld [vmem:[%s3185_s2 + $0x3d0] sm:$0xff]  }
  0x3d   : > { %2373 = vmatpush3.bf16.msra.mxu0 %v2577_v29  ;;  %v2631_v29 = vld [vmem:[%s3185_s2 + $0x358] sm:$0xff]  }
  0x3e   : > { %2374 = vmatprep.subr.bf16.mxu0 %v2579_v30  ;;  %2395 = vmatpush3.bf16.msra.mxu1 %v2578_v31  ;;  %v2630_v30 = vld [vmem:[%s3185_s2 + $0x390] sm:$0xff]   ;;  %v2632_v31 = vld [vmem:[%s3185_s2 + $0x3d8] sm:$0xff]  }
  0x3f   : > { %2396 = vmatprep.subr.bf16.mxu1 %v2580_v33  ;;  %v2635_v33 = vld [vmem:[%s3185_s2 + $0x360] sm:$0xff]  }
  0x41   : > { %2375 = vmatpush3.bf16.msra.mxu0 %v2581_v34  ;;  %v2634_v34 = vld [vmem:[%s3185_s2 + $0x398] sm:$0xff]  }
  0x42   : > { %2376 = vmatprep.subr.bf16.mxu0 %v2583_v35  ;;  %2397 = vmatpush3.bf16.msra.mxu1 %v2582_v36  ;;  %v2636_v35 = vld [vmem:[%s3185_s2 + $0x3e0] sm:$0xff]  }
  0x43   : > { %2398 = vmatprep.subr.bf16.mxu1 %v2584_v38  ;;  %v2637_v36 = vld [vmem:[%s3185_s2 + $0x320] sm:$0xff]  }
  0x44   : > { %v2638_v38 = vld [vmem:[%s3185_s2 + $0x3a0] sm:$0xff]  }
  0x45   : > { %2377 = vmatpush3.bf16.msra.mxu0 %v2585_v39  ;;  %v2640_v39 = vld [vmem:[%s3185_s2 + $0x3e8] sm:$0xff]  }
  0x46   : > { %2406 = vmatprep.subr.bf16.mxu0 %v2587_v42  ;;  %2399 = vmatpush3.bf16.msra.mxu1 %v2586_v43  ;;  %v2643_v42 = vld [vmem:[%s3185_s2 + $0x370] sm:$0xff]   ;;  %v2642_v43 = vld [vmem:[%s3185_s2 + $0x3a8] sm:$0xff]  }
  0x47   : > { %2428 = vmatprep.subr.bf16.mxu1 %v2588_v45  ;;  %v2645_v45 = vld [vmem:[%s3185_s2 + $0x330] sm:$0xff]  }
  0x48   : > { %1050 = vmatmul.mubr.bf16.vlgmr.msra.gmra.mrb[4].mxu0 %v811_v41  ;;  %v2641_v41 = vld [vmem:[%s3185_s2 + $0x328] sm:$0xff]  }
  0x49   : > { %2407 = vmatpush3.bf16.msra.mxu0 %v2589_v46  ;;  %1423 = vmatprep.mubr.bf16.mxu0 %v1192_v44  ;;  %v2644_v44 = vld [vmem:[%s3185_s2 + $0x3f0] sm:$0xff]   ;;  %v2647_v46 = vld [vmem:[%s3185_s2 + $0x378] sm:$0xff]  }
  0x4a   : > { %1090 = vmatmul.mubr.bf16.vlgmr.msra.gmra.mrb[4].mxu1 %v819_v47  ;;  %2408 = vmatprep.subr.bf16.mxu0 %v2591_v48  ;;  %v2646_v47 = vld [vmem:[%s3185_s2 + $0x3b0] sm:$0xff]   ;;  %v2648_v48 = vld [vmem:[%s3185_s2 + $0x3f8] sm:$0xff]  }
  0x4b   : > { %2429 = vmatpush3.bf16.msra.mxu1 %v2590_v49  ;;  %1463 = vmatprep.mubr.bf16.mxu1 %v1194_v50  ;;  %v2649_v49 = vld [vmem:[%s3185_s2 + $0x338] sm:$0xff]  }
  0x4c   : > { %2430 = vmatprep.subr.bf16.mxu1 %v2592_v51  ;;  %v2650_v50 = vld [vmem:[%s3185_s2 + $0x3b8] sm:$0xff]   ;;  %v1570_v51 = vcombine.high %v2859_v1, %v2859_v1 }
  0x4d   : > { %2409 = vmatpush3.bf16.msra.mxu0 %v2593_v52 }
  0x4e   : > { %2410 = vmatprep.subr.bf16.mxu0 %v2595_v53 }
  0x4f   : > { %2431 = vmatpush3.bf16.msra.mxu1 %v2594_v55 }
  0x50   : > { %2432 = vmatprep.subr.bf16.mxu1 %v2596_v56 }
  0x51   : > { %2411 = vmatpush3.bf16.msra.mxu0 %v2597_v57 }
  0x52   : > { %2412 = vmatprep.subr.bf16.mxu0 %v2599_v58 }
  0x53   : > { %2433 = vmatpush3.bf16.msra.mxu1 %v2598_v59 }
  0x54   : > { %2434 = vmatprep.subr.bf16.mxu1 %v2600_v60 }
  0x55   : > { %2413 = vmatpush3.bf16.msra.mxu0 %v2601_v61 }
  0x56   : > { %2414 = vmatprep.subr.bf16.mxu0 %v2603_v62 }
  0x57   : > { %2435 = vmatpush3.bf16.msra.mxu1 %v2602_v63 }
  0x58   : > { %2436 = vmatprep.subr.bf16.mxu1 %v2604_v0 }
  0x59   : > { %2415 = vmatpush3.bf16.msra.mxu0 %v2605_v2 }
  0x5a   : > { %2416 = vmatprep.subr.bf16.mxu0 %v2607_v3 }
  0x5b   : > { %2437 = vmatpush3.bf16.msra.mxu1 %v2606_v4 }
  0x5c   : > { %2438 = vmatprep.subr.bf16.mxu1 %v2608_v6 }
  0x5d   : > { %2417 = vmatpush3.bf16.msra.mxu0 %v2609_v7 }
  0x5e   : > { %2418 = vmatprep.subr.bf16.mxu0 %v2611_v8 }
  0x5f   : > { %2439 = vmatpush3.bf16.msra.mxu1 %v2610_v9 }
  0x60   : > { %2440 = vmatprep.subr.bf16.mxu1 %v2612_v10 }
  0x61   : > { %2419 = vmatpush3.bf16.msra.mxu0 %v2613_v11 }
  0x62   : > { %2420 = vmatprep.subr.bf16.mxu0 %v2615_v12 }
  0x63   : > { %2441 = vmatpush3.bf16.msra.mxu1 %v2614_v13 }
  0x64   : > { %2442 = vmatprep.subr.bf16.mxu1 %v2616_v14 }
  0x65   : > { %2421 = vmatpush3.bf16.msra.mxu0 %v2617_v15 }
  0x66   : > { %2450 = vmatprep.subr.bf16.mxu0 %v2619_v17 }
  0x67   : > { %2443 = vmatpush3.bf16.msra.mxu1 %v2618_v18 }
  0x68   : > { %1424 = vmatmul.mubr.bf16.vlgmr.msra.gmra.mrb[8].mxu0 %v1185_v16  ;;  %2472 = vmatprep.subr.bf16.mxu1 %v2620_v19 }
  0x69   : > { %2451 = vmatpush3.bf16.msra.mxu0 %v2621_v20  ;;  %1800 = vmatprep.mubr.bf16.mxu0 %v2867_v5  ;;  %v2629_v5 = vld [vmem:[%s3185_s2 + $0x310] sm:$0xff]  }
  0x6a   : > { %1464 = vmatmul.mubr.bf16.vlgmr.msra.gmra.mrb[8].mxu1 %v1193_v54  ;;  %2452 = vmatprep.subr.bf16.mxu0 %v2623_v21 }
  0x6b   : > { %2473 = vmatpush3.bf16.msra.mxu1 %v2622_v22  ;;  %1840 = vmatprep.mubr.bf16.mxu1 %v1571_v23 }
  0x6c   : > { %2474 = vmatprep.subr.bf16.mxu1 %v2624_v24 }
  0x6d   : > { %2453 = vmatpush3.bf16.msra.mxu0 %v2625_v25 }
  0x6e   : > { %2454 = vmatprep.subr.bf16.mxu0 %v2627_v26 }
  0x6f   : > { %2475 = vmatpush3.bf16.msra.mxu1 %v2626_v27 }
  0x70   : > { %2476 = vmatprep.subr.bf16.mxu1 %v2628_v28 }
  0x71   : > { %2455 = vmatpush3.bf16.msra.mxu0 %v2629_v5 }
  0x72   : > { %2456 = vmatprep.subr.bf16.mxu0 %v2631_v29 }
  0x73   : > { %2477 = vmatpush3.bf16.msra.mxu1 %v2630_v30 }
  0x74   : > { %2478 = vmatprep.subr.bf16.mxu1 %v2632_v31  ;;  %v2676_v31 = vmov 1983009808  }
  0x75   : > { %2457 = vmatpush3.bf16.msra.mxu0 %v2633_v32  ;;  %v1861_v32 = vunpack.c.l.s4 %v2676_v31 }
  0x76   : > { %2458 = vmatprep.subr.bf16.mxu0 %v2635_v33 }
  0x77   : > { %2479 = vmatpush3.bf16.msra.mxu1 %v2634_v34 }
  0x78   : > { %2480 = vmatprep.subr.bf16.mxu1 %v2636_v35 }
  0x79   : > { %2459 = vmatpush3.bf16.msra.mxu0 %v2637_v36  ;;  %v2313_v36 = vld [vmem:[%s3186_s3] ss:$0 sm:$0xff] }
  0x7a   : > { %2460 = vmatprep.subr.bf16.mxu0 %v2639_v37 }
  0x7b   : > { %2481 = vmatpush3.bf16.msra.mxu1 %v2638_v38  ;;  %v1862_v38 = vunpack.c.0.s8 %v1861_v32 }
  0x7c   : > { %2482 = vmatprep.subr.bf16.mxu1 %v2640_v39 }
  0x7d   : > { %2461 = vmatpush3.bf16.msra.mxu0 %v2641_v41 }
  0x7e   : > { %2462 = vmatprep.subr.bf16.mxu0 %v2643_v42  ;;  %v1865_v42 = vsub.s32 %v1862_v38, %v2833_v40 }
  0x7f   : > { %2483 = vmatpush3.bf16.msra.mxu1 %v2642_v43 }
  0x80   : > { %2484 = vmatprep.subr.bf16.mxu1 %v2644_v44 }
  0x81   : > { %2463 = vmatpush3.bf16.msra.mxu0 %v2645_v45 }
  0x82   : > { %2464 = vmatprep.subr.bf16.mxu0 %v2647_v46 }
  0x83   : > { %2485 = vmatpush3.bf16.msra.mxu1 %v2646_v47 }
  0x84   : > { %2486 = vmatprep.subr.bf16.mxu1 %v2648_v48 }
  0x85   : > { %2465 = vmatpush3.bf16.msra.mxu0 %v2649_v49 }
  0x87   : > { %2487 = vmatpush3.bf16.msra.mxu1 %v2650_v50 }
  0x88   : > { %1801 = vmatmul.mubr.bf16.vlgmr.msra.gmra.mrb[12].mxu0 %v2859_v1 }
  0x8a   : > { %1841 = vmatmul.mubr.bf16.vlgmr.msra.gmra.mrb[12].mxu1 %v1570_v51 }
  0xfb   : > { %v2334_v52 = vpop.f32.mrb[0].mxu0 }
  0xfc   : > { %v2335_v53 = vpop.f32.mrb[1].mxu0  ;;  %v2356_v55 = vpop.f32.mrb[0].mxu1 }
  0xfd   : > { %v2336_v56 = vadd.f32 %v2335_v53, %v2334_v52  ;;  %v2337_v57 = vpop.f32.mrb[2].mxu0  ;;  %v2357_v58 = vpop.f32.mrb[1].mxu1 }
  0xfe   : > { %v2338_v59 = vpop.f32.mrb[3].mxu0  ;;  %v2358_v60 = vadd.f32 %v2357_v58, %v2356_v55  ;;  %v2359_v61 = vpop.f32.mrb[2].mxu1 }
  0xff   : > { %v2360_v62 = vpop.f32.mrb[3].mxu1 }
 0x100   : > { %v791_v63 = vadd.f32 %v2358_v60, %v2336_v56 }
 0x11b   : > { %v2378_v0 = vpop.f32.mrb[4].mxu0 }
 0x11c   : > { %v2379_v2 = vpop.f32.mrb[5].mxu0 }
 0x11d   : > { %v2400_v3 = vpop.f32.mrb[4].mxu1  ;;  %v2380_v4 = vadd.f32 %v2379_v2, %v2378_v0  ;;  %v2381_v6 = vpop.f32.mrb[6].mxu0 }
 0x11e   : > { %v2401_v7 = vpop.f32.mrb[5].mxu1  ;;  %v2382_v8 = vpop.f32.mrb[7].mxu0 }
 0x11f   : > { %v1052_v1 = vadd.f32 %v2380_v4, %v791_v63  ;;  %v2402_v9 = vadd.f32 %v2401_v7, %v2400_v3  ;;  %v2403_v10 = vpop.f32.mrb[6].mxu1 }
 0x120   : > { %v2404_v11 = vpop.f32.mrb[7].mxu1 }
 0x121   : > { %v1092_v12 = vadd.f32 %v2402_v9, %v1052_v1 }
 0x13b   : > { %v2422_v13 = vpop.f32.mrb[8].mxu0 }
 0x13c   : > { %v2423_v14 = vpop.f32.mrb[9].mxu0 }
 0x13d   : > { %v2444_v15 = vpop.f32.mrb[8].mxu1  ;;  %v2424_v16 = vadd.f32 %v2423_v14, %v2422_v13  ;;  %v2425_v17 = vpop.f32.mrb[10].mxu0 }
 0x13e   : > { %v2445_v18 = vpop.f32.mrb[9].mxu1  ;;  %v2426_v19 = vpop.f32.mrb[11].mxu0 }
 0x13f   : > { %v2446_v20 = vadd.f32 %v2445_v18, %v2444_v15  ;;  %v2447_v54 = vpop.f32.mrb[10].mxu1 }
 0x140   : > { %v2448_v21 = vpop.f32.mrb[11].mxu1 }
 0x141   : > { %v1466_v22 = vadd.f32 %v2446_v20, %v2424_v16 }
 0x143   : > { %v1471_v23 = vadd.f32 %v1466_v22, %v1092_v12 }
 0x15b   : > { %v2466_v24 = vpop.f32.mrb[12].mxu0 }
 0x15c   : > { %v2467_v25 = vpop.f32.mrb[13].mxu0 }
 0x15d   : > { %v2488_v26 = vpop.f32.mrb[12].mxu1  ;;  %v2468_v27 = vadd.f32 %v2467_v25, %v2466_v24  ;;  %v2469_v28 = vpop.f32.mrb[14].mxu0 }
 0x15e   : > { %v2489_v5 = vpop.f32.mrb[13].mxu1  ;;  %v2470_v29 = vpop.f32.mrb[15].mxu0 }
 0x15f   : > { %v2490_v30 = vadd.f32 %v2489_v5, %v2488_v26  ;;  %v2491_v33 = vpop.f32.mrb[14].mxu1 }
 0x160   : > { %v2492_v34 = vpop.f32.mrb[15].mxu1 }
 0x161   : > { %v1843_v35 = vadd.f32 %v2490_v30, %v2468_v27 }
 0x163   : > { %v1848_v37 = vadd.f32 %v1843_v35, %v1471_v23 }
 0x165   : > { %v1856_v39 = vadd.f32 %v2313_v36, %v1848_v37 }
 0x167   : > { %v1857_v41 = vmul.f32 0.2, %v1856_v39 }
 0x169   : > { %v1858_v43 = vmax.f32 %v1856_v39, %v1857_v41 }
 0x16b   : > { %v1866_v44 = vrot.slane %v1858_v43, %v1865_v42 }
 0x16d   : > { %v1867_v45 = vcombine.high %v1866_v44, %v1866_v44  ;;  %v1870_v46 = vpack.c.bf16 %v1866_v44, %v1866_v44 }
 0x16f   : > { %v1871_v47 = vpack.c.bf16 %v1867_v45, %v1867_v45  ;;  %1872 = vst [vmem:[%s309_s24] sm:$0x1] %v1870_v46 }
 0x171   : > { %1873 = vst [vmem:[%s309_s24 + $0x1] sm:$0x1] %v1871_v47 }
 0x172 PF: > { %s14_s17 = sadd.s32 1, %s2673_s17   ;;  %s3188_s15 = smov %s2669_s16 }
 0x173   : > { %p11_p5 = scmp.ge.s32.totalorder %s14_s17, 4   ;;  %s3189_s16 = smov %s3191_s18 }
 0x175   :  { %13 = sbr.rel (!%p11_p5) target bundleno = 2 (0x2), region = 72 }

// kernel: fc_discriminator_forward.9
= control target key start
LH: loop header
LB: loop body
LE: loop exit
PB: predicated region body
PF: predicated region fallthrough
CT: control target
= control target key end

     0   :  { %s2507_s15 = smov 0   ;;  %s2509_s16 = smov 0   ;;  %s2968_s0 = inlined_call_operand.vmem [shape: bf16[2,2,2,512], index: 0, kind: input, shape index: {}, may-alias: {0,1}]   ;;  %s2969_s1 = inlined_call_operand.vmem [shape: bf16[2,2,2,512], index: 1, kind: input, shape index: {}, may-alias: {0,1}]   ;;  %s2970_s2 = inlined_call_operand.vmem [shape: bf16[4,512,128], index: 2, kind: input, shape index: {}]   ;;  %s2971_s3 = inlined_call_operand.vmem [shape: f32[1,128], index: 3, kind: input, shape index: {}]   ;;  %s2972_s4 = inlined_call_operand.vmem [shape: f32[2,1,1,128], index: 4, kind: output, shape index: {}]  }
   0x1   :  { %s2511_s17 = smov 0  }
   0x2 LB: > { %s26_s18 = sadd.s32 1, %s2475_s16  ;;  %p1801_p0 = scmp.ge.s32.totalorder %s2479_s17, 1  ;;  %s2479_s17 = sphi %s2511_s17, %s14_s17   ;;  %s2475_s16 = sphi %s2509_s16, %s2974_s16   ;;  %s2471_s15 = sphi %s2507_s15, %s2973_s15  }
   0x3   : > { %p28_p1 = scmp.ge.s32.totalorder %s26_s18, 2  ;;  %p200_p2 = scmp.lt.s32.totalorder %s2479_s17, 3 }
   0x5   : > { %s2976_s18 = smov (%p28_p1, %s26_s18), 0  ;;  %p201_p3 = pnand %p1801_p0, %p200_p2 }
   0x6   : > { %v2329_v0 = vld [vmem:[%s2970_s2 + $0x140] sm:$0xff] (!%p201_p3)   ;;  %v2333_v4 = vld [vmem:[%s2970_s2 + $0x148] sm:$0xff] (!%p201_p3)   ;;  %v2337_v8 = vld [vmem:[%s2970_s2 + $0x150] sm:$0xff] (!%p201_p3)   ;;  %p239_p4 = scmp.lt.s32.totalorder (!%p201_p3), %s2471_s15, 1  ;;  %v407_v30 = vlaneseq (!%p201_p3)  ;;  %v2481_v34 = vmov (!%p201_p3), 1966171168  }
   0x7   : > { %204 = sbr.rel (%p201_p3) target bundleno = 360 (0x168), region = 36  ;;  %v2330_v1 = vld [vmem:[%s2970_s2 + $0x1c0] sm:$0xff] (!%p201_p3)   ;;  %2128 = vmatprep.subr.bf16.mxu0 (!%p201_p3), %v2329_v0  ;;  %v2334_v5 = vld [vmem:[%s2970_s2 + $0x1c8] sm:$0xff] (!%p201_p3)   ;;  %v2338_v9 = vld [vmem:[%s2970_s2 + $0x1d0] sm:$0xff] (!%p201_p3)   ;;  %v405_v35 = vunpack.c.l.s4 (!%p201_p3), %v2481_v34 }
   0x8   : > { %v2331_v2 = vld [vmem:[%s2970_s2 + $0x100] sm:$0xff] (!%p201_p3)   ;;  %2150 = vmatprep.subr.bf16.mxu1 (!%p201_p3), %v2330_v1  ;;  %v2335_v6 = vld [vmem:[%s2970_s2 + $0x108] sm:$0xff] (!%p201_p3)   ;;  %v2339_v10 = vld [vmem:[%s2970_s2 + $0x110] sm:$0xff] (!%p201_p3)   ;;  %v408_v36 = vshrl.u32 (!%p201_p3), %v407_v30, 7 }
   0x9   : > { %v2332_v3 = vld [vmem:[%s2970_s2 + $0x180] sm:$0xff] (!%p201_p3)   ;;  %2129 = vmatpush3.bf16.msra.mxu0 (!%p201_p3), %v2331_v2  ;;  %v2336_v7 = vld [vmem:[%s2970_s2 + $0x188] sm:$0xff] (!%p201_p3)   ;;  %v2340_v11 = vld [vmem:[%s2970_s2 + $0x190] sm:$0xff] (!%p201_p3)   ;;  %v406_v40 = vunpack.c.0.s8 (!%p201_p3), %v405_v35 }
   0xa   : > { %2151 = vmatpush3.bf16.msra.mxu1 (!%p201_p3), %v2332_v3  ;;  %2130 = vmatprep.subr.bf16.mxu0 (!%p201_p3), %v2333_v4  ;;  %v2341_v12 = vld [vmem:[%s2970_s2 + $0x158] sm:$0xff] (!%p201_p3)   ;;  %v2345_v16 = vld [vmem:[%s2970_s2 + $0x160] sm:$0xff] (!%p201_p3)   ;;  %v2349_v20 = vld [vmem:[%s2970_s2 + $0x168] sm:$0xff] (!%p201_p3)  }
   0xb   : > { %2152 = vmatprep.subr.bf16.mxu1 (!%p201_p3), %v2334_v5  ;;  %v2342_v13 = vld [vmem:[%s2970_s2 + $0x1d8] sm:$0xff] (!%p201_p3)   ;;  %v2346_v17 = vld [vmem:[%s2970_s2 + $0x1e0] sm:$0xff] (!%p201_p3)   ;;  %v2350_v21 = vld [vmem:[%s2970_s2 + $0x1e8] sm:$0xff] (!%p201_p3)   ;;  %v2639_v41 = vsub.s32 (!%p201_p3), %v406_v40, %v408_v36 }
   0xc   : > { %v2343_v14 = vld [vmem:[%s2970_s2 + $0x118] sm:$0xff] (!%p201_p3)   ;;  %v2347_v18 = vld [vmem:[%s2970_s2 + $0x120] sm:$0xff] (!%p201_p3)   ;;  %v2351_v22 = vld [vmem:[%s2970_s2 + $0x128] sm:$0xff] (!%p201_p3)  }
   0xd   : > { %2131 = vmatpush3.bf16.msra.mxu0 (!%p201_p3), %v2335_v6  ;;  %v2344_v15 = vld [vmem:[%s2970_s2 + $0x198] sm:$0xff] (!%p201_p3)   ;;  %v2348_v19 = vld [vmem:[%s2970_s2 + $0x1a0] sm:$0xff] (!%p201_p3)   ;;  %v2352_v23 = vld [vmem:[%s2970_s2 + $0x1a8] sm:$0xff] (!%p201_p3)  }
   0xe   : > { %2153 = vmatpush3.bf16.msra.mxu1 %v2336_v7  ;;  %2132 = vmatprep.subr.bf16.mxu0 %v2337_v8  ;;  %s2978_s15 = smov (!%p239_p4, %s2471_s15), 1  ;;  %v2353_v24 = vld [vmem:[%s2970_s2 + $0x170] sm:$0xff]   ;;  %v2357_v28 = vld [vmem:[%s2970_s2 + $0x178] sm:$0xff]   ;;  %v2361_v37 = vld [vmem:[%s2970_s2 + $0x40] sm:$0xff]  }
   0xf   : > { %2154 = vmatprep.subr.bf16.mxu1 %v2338_v9  ;;  %v2354_v25 = vld [vmem:[%s2970_s2 + $0x1f0] sm:$0xff]   ;;  %s1802_s29 = sshll.u32 %s2978_s15, 3  ;;  %v2358_v29 = vld [vmem:[%s2970_s2 + $0x1f8] sm:$0xff]   ;;  %v2362_v38 = vld [vmem:[%s2970_s2 + $0xc0] sm:$0xff]   ;;  %s262_s28 = scalar_lea.vmem %s2972_s4, %s2978_s15 }
  0x10   : > { %v2355_v26 = vld [vmem:[%s2970_s2 + $0x130] sm:$0xff]   ;;  %s246_s12 = scalar_lea.vmem %s2968_s0, %s1802_s29  ;;  %v2359_v31 = vld [vmem:[%s2970_s2 + $0x138] sm:$0xff]   ;;  %v2363_v44 = vld [vmem:[%s2970_s2] sm:$0xff]   ;;  %s254_s22 = sadd.s32 4, %s1802_s29 }
  0x11   : > { %2133 = vmatpush3.bf16.msra.mxu0 %v2339_v10  ;;  %v2356_v27 = vld [vmem:[%s2970_s2 + $0x1b0] sm:$0xff]   ;;  %v2360_v32 = vld [vmem:[%s2970_s2 + $0x1b8] sm:$0xff]   ;;  %v1868_v33 = vld.sshfl [vmem:[%s246_s12] sm:$0x33 pattern:$0x75316420]  ;;  %s255_s6 = scalar_lea.vmem %s2969_s1, %s254_s22 }
  0x12   : > { %2155 = vmatpush3.bf16.msra.mxu1 %v2340_v11  ;;  %2134 = vmatprep.subr.bf16.mxu0 %v2341_v12  ;;  %v403_v39 = vcombine.high %v1868_v33, %v1868_v33  ;;  %v2643_v43 = vrot.slane %v1868_v33, %v2639_v41  ;;  %v2365_v49 = vld [vmem:[%s2970_s2 + $0x48] sm:$0xff]   ;;  %v2364_v52 = vld [vmem:[%s2970_s2 + $0x80] sm:$0xff]   ;;  %v2369_v55 = vld [vmem:[%s2970_s2 + $0x50] sm:$0xff]  }
  0x13   : > { %2156 = vmatprep.subr.bf16.mxu1 %v2342_v13  ;;  %v2366_v53 = vld [vmem:[%s2970_s2 + $0xc8] sm:$0xff]   ;;  %v2370_v57 = vld [vmem:[%s2970_s2 + $0xd0] sm:$0xff]   ;;  %v2373_v59 = vld [vmem:[%s2970_s2 + $0x58] sm:$0xff]  }
  0x14   : > { %v417_v42 = vrot.slane %v403_v39, %v2639_v41  ;;  %v421_v47 = vshrl.u32 %v2643_v43, 16  ;;  %v2651_v48 = vcombine.high %v2643_v43, %v2643_v43  ;;  %v2367_v54 = vld [vmem:[%s2970_s2 + $0x8] sm:$0xff]   ;;  %v2371_v58 = vld [vmem:[%s2970_s2 + $0x10] sm:$0xff]   ;;  %v2374_v61 = vld [vmem:[%s2970_s2 + $0xd8] sm:$0xff]  }
  0x15   : > { %2135 = vmatpush3.bf16.msra.mxu0 %v2343_v14  ;;  %v2368_v56 = vld [vmem:[%s2970_s2 + $0x88] sm:$0xff]   ;;  %v2372_v60 = vld [vmem:[%s2970_s2 + $0x90] sm:$0xff]   ;;  %v2375_v62 = vld [vmem:[%s2970_s2 + $0x18] sm:$0xff]  }
  0x16   : > { %2157 = vmatpush3.bf16.msra.mxu1 %v2344_v15  ;;  %2136 = vmatprep.subr.bf16.mxu0 %v2345_v16  ;;  %v424_v45 = vshrl.u32 %v417_v42, 16  ;;  %v419_v46 = vcombine.high %v417_v42, %v417_v42  ;;  %v427_v51 = vshrl.u32 %v2651_v48, 16  ;;  %v2377_v63 = vld [vmem:[%s2970_s2 + $0x60] sm:$0xff]   ;;  %v2376_v0 = vld [vmem:[%s2970_s2 + $0x98] sm:$0xff]   ;;  %v2381_v3 = vld [vmem:[%s2970_s2 + $0x68] sm:$0xff]  }
  0x17   : > { %2158 = vmatprep.subr.bf16.mxu1 %v2346_v17  ;;  %v2378_v1 = vld [vmem:[%s2970_s2 + $0xe0] sm:$0xff]   ;;  %v2382_v5 = vld [vmem:[%s2970_s2 + $0xe8] sm:$0xff]   ;;  %v2385_v7 = vld [vmem:[%s2970_s2 + $0x70] sm:$0xff]  }
  0x18   : > { %660 = vmatprep.mubr.bf16.mxu0 %v424_v45  ;;  %v430_v50 = vshrl.u32 %v419_v46, 16  ;;  %v2379_v2 = vld [vmem:[%s2970_s2 + $0x20] sm:$0xff]   ;;  %v2383_v6 = vld [vmem:[%s2970_s2 + $0x28] sm:$0xff]   ;;  %v2386_v9 = vld [vmem:[%s2970_s2 + $0xf0] sm:$0xff]  }
  0x19   : > { %2137 = vmatpush3.bf16.msra.mxu0 %v2347_v18  ;;  %v2380_v4 = vld [vmem:[%s2970_s2 + $0xa0] sm:$0xff]   ;;  %v2384_v8 = vld [vmem:[%s2970_s2 + $0xa8] sm:$0xff]   ;;  %v2387_v10 = vld [vmem:[%s2970_s2 + $0x30] sm:$0xff]  }
  0x1a   : > { %2159 = vmatpush3.bf16.msra.mxu1 %v2348_v19  ;;  %2138 = vmatprep.subr.bf16.mxu0 %v2349_v20  ;;  %v2389_v11 = vld [vmem:[%s2970_s2 + $0x78] sm:$0xff]   ;;  %v2388_v12 = vld [vmem:[%s2970_s2 + $0xb0] sm:$0xff]   ;;  %v2393_v15 = vld [vmem:[%s2970_s2 + $0x240] sm:$0xff]  }
  0x1b   : > { %2160 = vmatprep.subr.bf16.mxu1 %v2350_v21  ;;  %700 = vmatprep.mubr.bf16.mxu1 %v430_v50  ;;  %v2390_v13 = vld [vmem:[%s2970_s2 + $0xf8] sm:$0xff]   ;;  %v2394_v17 = vld [vmem:[%s2970_s2 + $0x2c0] sm:$0xff]   ;;  %v2397_v19 = vld [vmem:[%s2970_s2 + $0x248] sm:$0xff]  }
  0x1c   : > { %v2391_v14 = vld [vmem:[%s2970_s2 + $0x38] sm:$0xff]   ;;  %v2395_v18 = vld [vmem:[%s2970_s2 + $0x200] sm:$0xff]   ;;  %v2398_v21 = vld [vmem:[%s2970_s2 + $0x2c8] sm:$0xff]  }
  0x1d   : > { %2139 = vmatpush3.bf16.msra.mxu0 %v2351_v22  ;;  %v2392_v16 = vld [vmem:[%s2970_s2 + $0xb8] sm:$0xff]   ;;  %v2396_v20 = vld [vmem:[%s2970_s2 + $0x280] sm:$0xff]   ;;  %v2399_v22 = vld [vmem:[%s2970_s2 + $0x208] sm:$0xff]  }
  0x1e   : > { %2161 = vmatpush3.bf16.msra.mxu1 %v2352_v23  ;;  %2140 = vmatprep.subr.bf16.mxu0 %v2353_v24  ;;  %v2401_v23 = vld [vmem:[%s2970_s2 + $0x250] sm:$0xff]   ;;  %v2400_v24 = vld [vmem:[%s2970_s2 + $0x288] sm:$0xff]   ;;  %v2407_v30 = vld [vmem:[%s2970_s2 + $0x218] sm:$0xff]  }
  0x1f   : > { %2162 = vmatprep.subr.bf16.mxu1 %v2354_v25  ;;  %v2402_v25 = vld [vmem:[%s2970_s2 + $0x2d0] sm:$0xff]   ;;  %v2410_v33 = vld [vmem:[%s2970_s2 + $0x2e0] sm:$0xff]   ;;  %v2413_v35 = vld [vmem:[%s2970_s2 + $0x268] sm:$0xff]  }
  0x20   : > { %v2411_v34 = vld [vmem:[%s2970_s2 + $0x220] sm:$0xff]   ;;  %v2417_v39 = vld [vmem:[%s2970_s2 + $0x270] sm:$0xff]   ;;  %v2416_v40 = vld [vmem:[%s2970_s2 + $0x2a8] sm:$0xff]  }
  0x21   : > { %2141 = vmatpush3.bf16.msra.mxu0 %v2355_v26  ;;  %v2403_v26 = vld [vmem:[%s2970_s2 + $0x210] sm:$0xff]   ;;  %v2412_v36 = vld [vmem:[%s2970_s2 + $0x2a0] sm:$0xff]   ;;  %v2423_v50 = vld [vmem:[%s2970_s2 + $0x238] sm:$0xff]  }
  0x22   : > { %2163 = vmatpush3.bf16.msra.mxu1 %v2356_v27  ;;  %2142 = vmatprep.subr.bf16.mxu0 %v2357_v28  ;;  %v2405_v27 = vld [vmem:[%s2970_s2 + $0x258] sm:$0xff]   ;;  %v2404_v28 = vld [vmem:[%s2970_s2 + $0x290] sm:$0xff]   ;;  %v1997_v45 = vld.sshfl [vmem:[%s255_s6] sm:$0x33 pattern:$0x75316420] }
  0x23   : > { %2164 = vmatprep.subr.bf16.mxu1 %v2358_v29  ;;  %v2406_v29 = vld [vmem:[%s2970_s2 + $0x2d8] sm:$0xff]  }
  0x25   : > { %2143 = vmatpush3.bf16.msra.mxu0 %v2359_v31  ;;  %v2409_v31 = vld [vmem:[%s2970_s2 + $0x260] sm:$0xff]  }
  0x26   : > { %2165 = vmatpush3.bf16.msra.mxu1 %v2360_v32  ;;  %2172 = vmatprep.subr.bf16.mxu0 %v2361_v37  ;;  %v2408_v32 = vld [vmem:[%s2970_s2 + $0x298] sm:$0xff]   ;;  %v2414_v37 = vld [vmem:[%s2970_s2 + $0x2e8] sm:$0xff]  }
  0x27   : > { %2194 = vmatprep.subr.bf16.mxu1 %v2362_v38  ;;  %v2415_v38 = vld [vmem:[%s2970_s2 + $0x228] sm:$0xff]  }
  0x28   : > { %661 = vmatmul.mubr.bf16.vlgmr.msra.gmra.mrb[0].mxu0 %v421_v47  ;;  %v2420_v47 = vld [vmem:[%s2970_s2 + $0x2b0] sm:$0xff]  }
  0x29   : > { %2173 = vmatpush3.bf16.msra.mxu0 %v2363_v44  ;;  %701 = vmatmul.mubr.bf16.vlgmr.msra.gmra.mrb[0].mxu1 %v427_v51  ;;  %v2421_v44 = vld [vmem:[%s2970_s2 + $0x278] sm:$0xff]  }
  0x2a   : > { %2174 = vmatprep.subr.bf16.mxu0 %v2365_v49  ;;  %2195 = vmatpush3.bf16.msra.mxu1 %v2364_v52  ;;  %v2843_v52 = vrot.slane %v1997_v45, %v2639_v41 }
  0x2b   : > { %936 = vmatprep.mubr.bf16.mxu0 %v417_v42  ;;  %2196 = vmatprep.subr.bf16.mxu1 %v2366_v53  ;;  %v2418_v42 = vld [vmem:[%s2970_s2 + $0x2f0] sm:$0xff]   ;;  %v2425_v53 = vld [vmem:[%s2970_s2 + $0x340] sm:$0xff]  }
  0x2c   : > { %976 = vmatprep.mubr.bf16.mxu1 %v419_v46  ;;  %v1057_v46 = vcombine.high %v1997_v45, %v1997_v45 }
  0x2d   : > { %2175 = vmatpush3.bf16.msra.mxu0 %v2367_v54  ;;  %v2424_v54 = vld [vmem:[%s2970_s2 + $0x2b8] sm:$0xff]  }
  0x2e   : > { %2176 = vmatprep.subr.bf16.mxu0 %v2369_v55  ;;  %2197 = vmatpush3.bf16.msra.mxu1 %v2368_v56  ;;  %v1071_v49 = vrot.slane %v1057_v46, %v2639_v41  ;;  %v2426_v55 = vld [vmem:[%s2970_s2 + $0x3c0] sm:$0xff]  }
  0x2f   : > { %2198 = vmatprep.subr.bf16.mxu1 %v2370_v57  ;;  %v2427_v41 = vld [vmem:[%s2970_s2 + $0x300] sm:$0xff]   ;;  %v2859_v57 = vcombine.high %v2843_v52, %v2843_v52 }
  0x30   : > { %v1073_v51 = vcombine.high %v1071_v49, %v1071_v49  ;;  %v1420_v56 = vshrl.u32 %v1071_v49, 16 }
  0x31   : > { %2177 = vmatpush3.bf16.msra.mxu0 %v2371_v58  ;;  %v2429_v58 = vld [vmem:[%s2970_s2 + $0x348] sm:$0xff]  }
  0x32   : > { %2178 = vmatprep.subr.bf16.mxu0 %v2373_v59  ;;  %2199 = vmatpush3.bf16.msra.mxu1 %v2372_v60  ;;  %v2428_v59 = vld [vmem:[%s2970_s2 + $0x380] sm:$0xff]   ;;  %v1426_v60 = vshrl.u32 %v1073_v51, 16 }
  0x33   : > { %2200 = vmatprep.subr.bf16.mxu1 %v2374_v61  ;;  %v2430_v61 = vld [vmem:[%s2970_s2 + $0x3c8] sm:$0xff]  }
  0x35   : > { %2179 = vmatpush3.bf16.msra.mxu0 %v2375_v62  ;;  %v2431_v62 = vld [vmem:[%s2970_s2 + $0x308] sm:$0xff]  }
  0x36   : > { %2180 = vmatprep.subr.bf16.mxu0 %v2377_v63  ;;  %2201 = vmatpush3.bf16.msra.mxu1 %v2376_v0  ;;  %v2433_v63 = vld [vmem:[%s2970_s2 + $0x350] sm:$0xff]   ;;  %v2432_v0 = vld [vmem:[%s2970_s2 + $0x388] sm:$0xff]  }
  0x37   : > { %2202 = vmatprep.subr.bf16.mxu1 %v2378_v1  ;;  %v2434_v1 = vld [vmem:[%s2970_s2 + $0x3d0] sm:$0xff]  }
  0x39   : > { %2181 = vmatpush3.bf16.msra.mxu0 %v2379_v2  ;;  %v2435_v2 = vld [vmem:[%s2970_s2 + $0x310] sm:$0xff]  }
  0x3a   : > { %2182 = vmatprep.subr.bf16.mxu0 %v2381_v3  ;;  %2203 = vmatpush3.bf16.msra.mxu1 %v2380_v4  ;;  %v2437_v3 = vld [vmem:[%s2970_s2 + $0x358] sm:$0xff]   ;;  %v2436_v4 = vld [vmem:[%s2970_s2 + $0x390] sm:$0xff]  }
  0x3b   : > { %2204 = vmatprep.subr.bf16.mxu1 %v2382_v5  ;;  %v2438_v5 = vld [vmem:[%s2970_s2 + $0x3d8] sm:$0xff]  }
  0x3d   : > { %2183 = vmatpush3.bf16.msra.mxu0 %v2383_v6  ;;  %v2439_v6 = vld [vmem:[%s2970_s2 + $0x318] sm:$0xff]  }
  0x3e   : > { %2184 = vmatprep.subr.bf16.mxu0 %v2385_v7  ;;  %2205 = vmatpush3.bf16.msra.mxu1 %v2384_v8  ;;  %v2441_v7 = vld [vmem:[%s2970_s2 + $0x360] sm:$0xff]   ;;  %v2440_v8 = vld [vmem:[%s2970_s2 + $0x398] sm:$0xff]  }
  0x3f   : > { %2206 = vmatprep.subr.bf16.mxu1 %v2386_v9  ;;  %v2442_v9 = vld [vmem:[%s2970_s2 + $0x3e0] sm:$0xff]  }
  0x41   : > { %2185 = vmatpush3.bf16.msra.mxu0 %v2387_v10  ;;  %v2443_v10 = vld [vmem:[%s2970_s2 + $0x320] sm:$0xff]  }
  0x42   : > { %2186 = vmatprep.subr.bf16.mxu0 %v2389_v11  ;;  %2207 = vmatpush3.bf16.msra.mxu1 %v2388_v12  ;;  %v2445_v11 = vld [vmem:[%s2970_s2 + $0x368] sm:$0xff]   ;;  %v2444_v12 = vld [vmem:[%s2970_s2 + $0x3a0] sm:$0xff]  }
  0x43   : > { %2208 = vmatprep.subr.bf16.mxu1 %v2390_v13  ;;  %v2446_v13 = vld [vmem:[%s2970_s2 + $0x3e8] sm:$0xff]  }
  0x45   : > { %2187 = vmatpush3.bf16.msra.mxu0 %v2391_v14  ;;  %v2447_v14 = vld [vmem:[%s2970_s2 + $0x328] sm:$0xff]  }
  0x46   : > { %2216 = vmatprep.subr.bf16.mxu0 %v2393_v15  ;;  %2209 = vmatpush3.bf16.msra.mxu1 %v2392_v16  ;;  %v2449_v15 = vld [vmem:[%s2970_s2 + $0x370] sm:$0xff]   ;;  %v2448_v16 = vld [vmem:[%s2970_s2 + $0x3a8] sm:$0xff]  }
  0x47   : > { %2238 = vmatprep.subr.bf16.mxu1 %v2394_v17  ;;  %v2450_v17 = vld [vmem:[%s2970_s2 + $0x3f0] sm:$0xff]  }
  0x48   : > { %937 = vmatmul.mubr.bf16.vlgmr.msra.gmra.mrb[4].mxu0 %v2643_v43  ;;  %v2419_v43 = vld [vmem:[%s2970_s2 + $0x230] sm:$0xff]  }
  0x49   : > { %2217 = vmatpush3.bf16.msra.mxu0 %v2395_v18  ;;  %977 = vmatmul.mubr.bf16.vlgmr.msra.gmra.mrb[4].mxu1 %v2651_v48  ;;  %v2422_v48 = vld [vmem:[%s2970_s2 + $0x2f8] sm:$0xff]   ;;  %v2451_v18 = vld [vmem:[%s2970_s2 + $0x330] sm:$0xff]  }
  0x4a   : > { %2218 = vmatprep.subr.bf16.mxu0 %v2397_v19  ;;  %2239 = vmatpush3.bf16.msra.mxu1 %v2396_v20  ;;  %v2453_v19 = vld [vmem:[%s2970_s2 + $0x378] sm:$0xff]   ;;  %v2452_v20 = vld [vmem:[%s2970_s2 + $0x3b0] sm:$0xff]  }
  0x4b   : > { %2240 = vmatprep.subr.bf16.mxu1 %v2398_v21  ;;  %1302 = vmatprep.mubr.bf16.mxu0 %v1071_v49  ;;  %v2454_v21 = vld [vmem:[%s2970_s2 + $0x3f8] sm:$0xff]  }
  0x4c   : > { %1342 = vmatprep.mubr.bf16.mxu1 %v1073_v51 }
  0x4d   : > { %2219 = vmatpush3.bf16.msra.mxu0 %v2399_v22  ;;  %v2455_v22 = vld [vmem:[%s2970_s2 + $0x338] sm:$0xff]  }
  0x4e   : > { %2220 = vmatprep.subr.bf16.mxu0 %v2401_v23  ;;  %2241 = vmatpush3.bf16.msra.mxu1 %v2400_v24  ;;  %v2456_v23 = vld [vmem:[%s2970_s2 + $0x3b8] sm:$0xff]   ;;  %v1417_v24 = vshrl.u32 %v2843_v52, 16 }
  0x4f   : > { %2242 = vmatprep.subr.bf16.mxu1 %v2402_v25  ;;  %v1423_v25 = vshrl.u32 %v2859_v57, 16 }
  0x51   : > { %2221 = vmatpush3.bf16.msra.mxu0 %v2403_v26 }
  0x52   : > { %2222 = vmatprep.subr.bf16.mxu0 %v2405_v27  ;;  %2243 = vmatpush3.bf16.msra.mxu1 %v2404_v28 }
  0x53   : > { %2244 = vmatprep.subr.bf16.mxu1 %v2406_v29 }
  0x55   : > { %2223 = vmatpush3.bf16.msra.mxu0 %v2407_v30 }
  0x56   : > { %2224 = vmatprep.subr.bf16.mxu0 %v2409_v31  ;;  %2245 = vmatpush3.bf16.msra.mxu1 %v2408_v32 }
  0x57   : > { %2246 = vmatprep.subr.bf16.mxu1 %v2410_v33 }
  0x59   : > { %2225 = vmatpush3.bf16.msra.mxu0 %v2411_v34 }
  0x5a   : > { %2226 = vmatprep.subr.bf16.mxu0 %v2413_v35  ;;  %2247 = vmatpush3.bf16.msra.mxu1 %v2412_v36 }
  0x5b   : > { %2248 = vmatprep.subr.bf16.mxu1 %v2414_v37 }
  0x5d   : > { %2227 = vmatpush3.bf16.msra.mxu0 %v2415_v38 }
  0x5e   : > { %2228 = vmatprep.subr.bf16.mxu0 %v2417_v39  ;;  %2249 = vmatpush3.bf16.msra.mxu1 %v2416_v40 }
  0x5f   : > { %2250 = vmatprep.subr.bf16.mxu1 %v2418_v42 }
  0x61   : > { %2229 = vmatpush3.bf16.msra.mxu0 %v2419_v43 }
  0x62   : > { %2230 = vmatprep.subr.bf16.mxu0 %v2421_v44  ;;  %2251 = vmatpush3.bf16.msra.mxu1 %v2420_v47 }
  0x63   : > { %2252 = vmatprep.subr.bf16.mxu1 %v2422_v48 }
  0x65   : > { %2231 = vmatpush3.bf16.msra.mxu0 %v2423_v50 }
  0x66   : > { %2260 = vmatprep.subr.bf16.mxu0 %v2425_v53  ;;  %2253 = vmatpush3.bf16.msra.mxu1 %v2424_v54 }
  0x67   : > { %2282 = vmatprep.subr.bf16.mxu1 %v2426_v55 }
  0x68   : > { %1303 = vmatmul.mubr.bf16.vlgmr.msra.gmra.mrb[8].mxu0 %v2843_v52 }
  0x69   : > { %2261 = vmatpush3.bf16.msra.mxu0 %v2427_v41  ;;  %1656 = vmatprep.mubr.bf16.mxu0 %v1420_v56 }
  0x6a   : > { %1343 = vmatmul.mubr.bf16.vlgmr.msra.gmra.mrb[8].mxu1 %v2859_v57  ;;  %2262 = vmatprep.subr.bf16.mxu0 %v2429_v58 }
  0x6b   : > { %2283 = vmatpush3.bf16.msra.mxu1 %v2428_v59  ;;  %1696 = vmatprep.mubr.bf16.mxu1 %v1426_v60 }
  0x6c   : > { %2284 = vmatprep.subr.bf16.mxu1 %v2430_v61 }
  0x6d   : > { %2263 = vmatpush3.bf16.msra.mxu0 %v2431_v62 }
  0x6e   : > { %2264 = vmatprep.subr.bf16.mxu0 %v2433_v63 }
  0x6f   : > { %2285 = vmatpush3.bf16.msra.mxu1 %v2432_v0 }
  0x70   : > { %2286 = vmatprep.subr.bf16.mxu1 %v2434_v1 }
  0x71   : > { %2265 = vmatpush3.bf16.msra.mxu0 %v2435_v2 }
  0x72   : > { %2266 = vmatprep.subr.bf16.mxu0 %v2437_v3 }
  0x73   : > { %2287 = vmatpush3.bf16.msra.mxu1 %v2436_v4 }
  0x74   : > { %2288 = vmatprep.subr.bf16.mxu1 %v2438_v5 }
  0x75   : > { %2267 = vmatpush3.bf16.msra.mxu0 %v2439_v6 }
  0x76   : > { %2268 = vmatprep.subr.bf16.mxu0 %v2441_v7 }
  0x77   : > { %2289 = vmatpush3.bf16.msra.mxu1 %v2440_v8  ;;  %v1705_v8 = vld [vmem:[%s2971_s3] sm:$0x1] }
  0x78   : > { %2290 = vmatprep.subr.bf16.mxu1 %v2442_v9 }
  0x79   : > { %2269 = vmatpush3.bf16.msra.mxu0 %v2443_v10 }
  0x7a   : > { %2270 = vmatprep.subr.bf16.mxu0 %v2445_v11 }
  0x7b   : > { %2291 = vmatpush3.bf16.msra.mxu1 %v2444_v12 }
  0x7c   : > { %2292 = vmatprep.subr.bf16.mxu1 %v2446_v13 }
  0x7d   : > { %2271 = vmatpush3.bf16.msra.mxu0 %v2447_v14 }
  0x7e   : > { %2272 = vmatprep.subr.bf16.mxu0 %v2449_v15 }
  0x7f   : > { %2293 = vmatpush3.bf16.msra.mxu1 %v2448_v16 }
  0x80   : > { %2294 = vmatprep.subr.bf16.mxu1 %v2450_v17 }
  0x81   : > { %2273 = vmatpush3.bf16.msra.mxu0 %v2451_v18 }
  0x82   : > { %2274 = vmatprep.subr.bf16.mxu0 %v2453_v19 }
  0x83   : > { %2295 = vmatpush3.bf16.msra.mxu1 %v2452_v20 }
  0x84   : > { %2296 = vmatprep.subr.bf16.mxu1 %v2454_v21 }
  0x85   : > { %2275 = vmatpush3.bf16.msra.mxu0 %v2455_v22 }
  0x87   : > { %2297 = vmatpush3.bf16.msra.mxu1 %v2456_v23 }
  0x88   : > { %1657 = vmatmul.mubr.bf16.vlgmr.msra.gmra.mrb[12].mxu0 %v1417_v24 }
  0x8a   : > { %1697 = vmatmul.mubr.bf16.vlgmr.msra.gmra.mrb[12].mxu1 %v1423_v25 }
  0xfb   : > { %v2144_v26 = vpop.f32.mrb[0].mxu0 }
  0xfc   : > { %v2145_v27 = vpop.f32.mrb[1].mxu0  ;;  %v2166_v28 = vpop.f32.mrb[0].mxu1 }
  0xfd   : > { %v2146_v29 = vadd.f32 %v2145_v27, %v2144_v26  ;;  %v2147_v30 = vpop.f32.mrb[2].mxu0  ;;  %v2167_v31 = vpop.f32.mrb[1].mxu1 }
  0xfe   : > { %v2148_v32 = vpop.f32.mrb[3].mxu0  ;;  %v2168_v33 = vadd.f32 %v2167_v31, %v2166_v28  ;;  %v2169_v34 = vpop.f32.mrb[2].mxu1 }
  0xff   : > { %v2170_v35 = vpop.f32.mrb[3].mxu1 }
 0x100   : > { %v703_v36 = vadd.f32 %v2168_v33, %v2146_v29 }
 0x11b   : > { %v2188_v37 = vpop.f32.mrb[4].mxu0 }
 0x11c   : > { %v2189_v38 = vpop.f32.mrb[5].mxu0  ;;  %v2210_v39 = vpop.f32.mrb[4].mxu1 }
 0x11d   : > { %v2190_v40 = vadd.f32 %v2189_v38, %v2188_v37  ;;  %v2191_v42 = vpop.f32.mrb[6].mxu0  ;;  %v2211_v43 = vpop.f32.mrb[5].mxu1 }
 0x11e   : > { %v2192_v44 = vpop.f32.mrb[7].mxu0  ;;  %v2212_v46 = vadd.f32 %v2211_v43, %v2210_v39  ;;  %v2213_v47 = vpop.f32.mrb[6].mxu1 }
 0x11f   : > { %v939_v45 = vadd.f32 %v2190_v40, %v703_v36  ;;  %v2214_v48 = vpop.f32.mrb[7].mxu1 }
 0x121   : > { %v979_v49 = vadd.f32 %v2212_v46, %v939_v45 }
 0x13b   : > { %v2232_v50 = vpop.f32.mrb[8].mxu0 }
 0x13c   : > { %v2233_v51 = vpop.f32.mrb[9].mxu0 }
 0x13d   : > { %v2254_v52 = vpop.f32.mrb[8].mxu1  ;;  %v2234_v53 = vadd.f32 %v2233_v51, %v2232_v50  ;;  %v2235_v54 = vpop.f32.mrb[10].mxu0 }
 0x13e   : > { %v2255_v55 = vpop.f32.mrb[9].mxu1  ;;  %v2236_v41 = vpop.f32.mrb[11].mxu0 }
 0x13f   : > { %v2256_v56 = vadd.f32 %v2255_v55, %v2254_v52  ;;  %v2257_v57 = vpop.f32.mrb[10].mxu1 }
 0x140   : > { %v2258_v58 = vpop.f32.mrb[11].mxu1 }
 0x141   : > { %v1345_v59 = vadd.f32 %v2256_v56, %v2234_v53 }
 0x143   : > { %v1350_v60 = vadd.f32 %v1345_v59, %v979_v49 }
 0x15b   : > { %v2276_v61 = vpop.f32.mrb[12].mxu0 }
 0x15c   : > { %v2277_v62 = vpop.f32.mrb[13].mxu0 }
 0x15d   : > { %v2298_v63 = vpop.f32.mrb[12].mxu1  ;;  %v2278_v0 = vadd.f32 %v2277_v62, %v2276_v61  ;;  %v2279_v1 = vpop.f32.mrb[14].mxu0 }
 0x15e   : > { %v2299_v2 = vpop.f32.mrb[13].mxu1  ;;  %v2280_v3 = vpop.f32.mrb[15].mxu0 }
 0x15f   : > { %v2300_v4 = vadd.f32 %v2299_v2, %v2298_v63  ;;  %v2301_v5 = vpop.f32.mrb[14].mxu1 }
 0x160   : > { %v2302_v6 = vpop.f32.mrb[15].mxu1 }
 0x161   : > { %v1699_v7 = vadd.f32 %v2300_v4, %v2278_v0 }
 0x163   : > { %v1704_v9 = vadd.f32 %v1699_v7, %v1350_v60 }
 0x165   : > { %v1706_v10 = vadd.f32 %v1705_v8, %v1704_v9 }
 0x167   : > { %1707 = vst [vmem:[%s262_s28] sm:$0x1] %v1706_v10 }
 0x168 PF: > { %s14_s17 = sadd.s32 1, %s2479_s17   ;;  %s2973_s15 = smov %s2475_s16 }
 0x169   : > { %p11_p5 = scmp.ge.s32.totalorder %s14_s17, 4   ;;  %s2974_s16 = smov %s2976_s18 }
 0x16b   :  { %13 = sbr.rel (!%p11_p5) target bundleno = 2 (0x2), region = 72 }

</bundles_post_ra>
